<compile_context>
chip_gen: v7x
topology: tpu7x:2x2x1
jax: 0.10.0
libtpu: 0.0.40
codegen_flags: <defaults>
</compile_context>

<pallas_src>
import numpy as np
import jax
import jax.numpy as jnp
from jax import lax
from jax.experimental import pallas as pl
from jax.experimental.pallas import tpu as pltpu


# Flat per-sample row counts (row = 10*i + j, padded to multiples of 8).
NP1 = 112   # conv1 2x2-block grid: 10x10 = 100 real rows (+ zero pad)
NP2 = 96    # conv2 grid: real rows are 10*i+j with i,j <= 8
NP3 = 72    # conv3 grid: real rows are 10*i+j with i,j <= 6
T2 = (0, 1, 10, 11)                        # conv2 tap offsets in the flat conv1 layout
T3 = (0, 1, 2, 10, 11, 12, 20, 21, 22)     # conv3 tap offsets in the flat conv2 layout


# ---------------------------------------------------------------------------
# Kernel A: conv1 + conv2 + conv3, one MXU matmul per layer, VMEM resident.
# ---------------------------------------------------------------------------
def _conv_stack_kernel(xp_ref, w1_ref, b1_ref, w2_ref, b2_ref, w3_ref, b3_ref,
                       o_ref, s1_ref, s2_ref):
    tb = xp_ref.shape[0]
    k1 = xp_ref.shape[2]
    cdt = s1_ref.dtype

    # conv1: each row of xp is the 12x12xC input patch of one 2x2 block of
    # conv1 outputs; the 128 output columns are (parity dh,dw) x 32 channels,
    # i.e. conv1's output lands directly in space-to-depth(2) layout.
    a1 = jnp.dot(xp_ref[...].reshape(tb * NP1, k1), w1_ref[...],
                 preferred_element_type=jnp.float32)
    a1 = jnp.maximum(a1 + b1_ref[...], 0.0).astype(cdt)
    s1_ref[...] = a1.reshape(tb, NP1, 128)

    # conv2 (4x4/s2 == 2x2/s1 on the s2d(2) grid): VMEM-only im2col, K = 512.
    win2 = jnp.concatenate(
        [s1_ref[:, t:t + NP2, :].reshape(tb * NP2, 128) for t in T2], axis=1)
    a2 = jnp.dot(win2, w2_ref[...], preferred_element_type=jnp.float32)
    a2 = jnp.maximum(a2 + b2_ref[...], 0.0).astype(cdt)
    s2_ref[...] = a2.reshape(tb, NP2, 64)

    # conv3 (3x3/s1): VMEM-only im2col, K = 576.
    win3 = jnp.concatenate(
        [s2_ref[:, t:t + NP3, :].reshape(tb * NP3, 64) for t in T3], axis=1)
    a3 = jnp.dot(win3, w3_ref[...], preferred_element_type=jnp.float32)
    a3 = jnp.maximum(a3 + b3_ref[...], 0.0)
    o_ref[...] = a3.reshape(tb, NP3, 32).astype(o_ref.dtype)


def conv_stack(patches, wp, tb):
    Bp, _, K1 = patches.shape
    cdt = wp["w1s"].dtype
    isz = jnp.dtype(cdt).itemsize
    macs = NP1 * K1 * 128 + NP2 * 512 * 64 + NP3 * 576 * 32
    wbytes = (wp["w1s"].size + wp["w2s"].size + wp["w3s"].size) * isz
    cost = pl.CostEstimate(
        flops=int(2 * Bp * macs),
        transcendentals=0,
        bytes_accessed=int(Bp * (NP1 * K1 + NP3 * 32) * isz + wbytes))
    return pl.pallas_call(
        _conv_stack_kernel,
        grid=(Bp // tb,),
        in_specs=[
            pl.BlockSpec((tb, NP1, K1), lambda i: (i, 0, 0)),
            pl.BlockSpec((K1, 128), lambda i: (0, 0)),     # resident weights
            pl.BlockSpec((1, 128), lambda i: (0, 0)),
            pl.BlockSpec((512, 64), lambda i: (0, 0)),
            pl.BlockSpec((1, 64), lambda i: (0, 0)),
            pl.BlockSpec((576, 32), lambda i: (0, 0)),
            pl.BlockSpec((1, 32), lambda i: (0, 0)),
        ],
        out_specs=pl.BlockSpec((tb, NP3, 32), lambda i: (i, 0, 0)),
        out_shape=jax.ShapeDtypeStruct((Bp, NP3, 32), cdt),
        scratch_shapes=[
            pltpu.VMEM((tb, NP1, 128), cdt),   # conv1 activations (VMEM only)
            pltpu.VMEM((tb, NP2, 64), cdt),    # conv2 activations (VMEM only)
        ],
        compiler_params=pltpu.CompilerParams(
            dimension_semantics=("parallel",),
            vmem_limit_bytes=48 * 1024 * 1024),
        cost_estimate=cost,
    )(patches, wp["w1s"], wp["b1"], wp["w2s"], wp["b2"], wp["w3s"], wp["b3"])


# ---------------------------------------------------------------------------
# Kernel B: linear1 + fused [critic | actor] heads (output padded to 128 lanes).
# ---------------------------------------------------------------------------
def _mlp_head_kernel(f_ref, w1_ref, b1_ref, wh_ref, bh_ref, o_ref):
    h = jnp.dot(f_ref[...], w1_ref[...], preferred_element_type=jnp.float32)
    h = jnp.maximum(h + b1_ref[...], 0.0)
    o = jnp.dot(h.astype(wh_ref.dtype), wh_ref[...],
                preferred_element_type=jnp.float32) + bh_ref[...]
    o_ref[...] = o


def mlp_head(feat, wp, tbb):
    Bp, F = feat.shape
    Hd = wp["w1l"].shape[1]
    NO = wp["whead"].shape[1]
    isz = jnp.dtype(wp["w1l"].dtype).itemsize
    cost = pl.CostEstimate(
        flops=int(2 * Bp * (F * Hd + Hd * NO)),
        transcendentals=0,
        bytes_accessed=int(Bp * F * isz + (F * Hd + Hd * NO) * isz + Bp * NO * 4))
    return pl.pallas_call(
        _mlp_head_kernel,
        grid=(Bp // tbb,),
        in_specs=[
            pl.BlockSpec((tbb, F), lambda i: (i, 0)),
            pl.BlockSpec((F, Hd), lambda i: (0, 0)),       # resident
            pl.BlockSpec((1, Hd), lambda i: (0, 0)),
            pl.BlockSpec((Hd, NO), lambda i: (0, 0)),
            pl.BlockSpec((1, NO), lambda i: (0, 0)),
        ],
        out_specs=pl.BlockSpec((tbb, NO), lambda i: (i, 0)),
        out_shape=jax.ShapeDtypeStruct((Bp, NO), jnp.float32),
        compiler_params=pltpu.CompilerParams(
            dimension_semantics=("parallel",),
            vmem_limit_bytes=48 * 1024 * 1024),
        cost_estimate=cost,
    )(feat, wp["w1l"], wp["b1l"], wp["whead"], wp["bhead"])


# ---------------------------------------------------------------------------
# Parameter init (PyTorch-like) and hoisted kernel-format prep.
# ---------------------------------------------------------------------------
def init_params(key, num_inputs, n_actions, hidden_size):
    relu_gain = float(np.sqrt(2.0))  # nn.init.calculate_gain('relu')
    ks = jax.random.split(key, 6)

    def kaiming(k, shape, fan_in, extra_gain=1.0):
        std = np.sqrt(2.0 / fan_in) * extra_gain
        return jax.random.normal(k, shape, jnp.float32) * std

    conv_out = 32 * 7 * 7  # _get_conv_out((num_inputs, 84, 84))
    return {
        "conv1_w": kaiming(ks[0], (8, 8, num_inputs, 32), num_inputs * 8 * 8, relu_gain),
        "conv1_b": jnp.zeros((32,), jnp.float32),
        "conv2_w": kaiming(ks[1], (4, 4, 32, 64), 32 * 4 * 4, relu_gain),
        "conv2_b": jnp.zeros((64,), jnp.float32),
        "conv3_w": kaiming(ks[2], (3, 3, 64, 32), 64 * 3 * 3, relu_gain),
        "conv3_b": jnp.zeros((32,), jnp.float32),
        "linear1_w": kaiming(ks[3], (conv_out, hidden_size), conv_out, relu_gain),
        "linear1_b": jnp.zeros((hidden_size,), jnp.float32),
        "critic_w": kaiming(ks[4], (hidden_size, 1), hidden_size),
        "critic_b": jnp.zeros((1,), jnp.float32),
        "actor_w": kaiming(ks[5], (hidden_size, n_actions), hidden_size),
        "actor_b": jnp.zeros((n_actions,), jnp.float32),
    }


def prepare_params(params, compute_dtype=jnp.bfloat16):
    """One-time (hoisted) conversion of logical params into kernel layout."""
    cd = compute_dtype
    C = params["conv1_w"].shape[2]
    hid = params["linear1_w"].shape[1]
    n_out = 1 + params["actor_w"].shape[1]
    assert n_out <= 128

    # conv1 -> "2x2 output block" weight: rows are the 12x12xC patch of one
    # coarse (stride-8) block in (u,v,p,q,ci) order; cols are (dh,dw,cout).
    w1 = np.asarray(params["conv1_w"], np.float32).reshape(2, 4, 2, 4, C, 32)  # (a,p,b,q,ci,co)
    w1s = np.zeros((3, 3, 4, 4, C, 2, 2, 32), np.float32)                      # (u,v,p,q,ci,dh,dw,co)
    for dh in range(2):
        for dw in range(2):
            for a in range(2):
                for b in range(2):
                    w1s[dh + a, dw + b, :, :, :, dh, dw, :] = w1[a, :, b, :, :, :]
    w1s = w1s.reshape(144 * C, 128)
    b1 = np.tile(np.asarray(params["conv1_b"], np.float32), 4).reshape(1, 128)

    # conv2 (4x4/s2) as a 2x2 stride-1 conv over the s2d(2) grid, taps K-stacked.
    w2 = np.asarray(params["conv2_w"], np.float32).reshape(2, 2, 2, 2, 32, 64)  # (a,dh,b,dw,ci,co)
    w2s = w2.transpose(0, 2, 1, 3, 4, 5).reshape(512, 64)                       # (a,b,dh,dw,ci) rows
    b2 = np.asarray(params["conv2_b"], np.float32).reshape(1, 64)

    # conv3 (3x3/s1), taps K-stacked in (kh,kw,ci) order.
    w3s = np.asarray(params["conv3_w"], np.float32).reshape(9 * 64, 32)
    b3 = np.asarray(params["conv3_b"], np.float32).reshape(1, 32)

    # linear1: permute rows from torch (c,h,w) flatten order to the compact
    # (h,w,c) feature order produced by the conv kernel -- no zero padding.
    lin = np.asarray(params["linear1_w"], np.float32)            # (1568, hid)
    cc, hh, ww = np.unravel_index(np.arange(32 * 7 * 7), (32, 7, 7))
    dst = (hh * 7 + ww) * 32 + cc
    w1l = np.zeros_like(lin)
    w1l[dst] = lin
    b1l = np.asarray(params["linear1_b"], np.float32).reshape(1, hid)

    # fused heads, zero-padded to 128 output lanes (lane-dense store).
    whead = np.zeros((hid, 128), np.float32)
    whead[:, 0:1] = np.asarray(params["critic_w"], np.float32)
    whead[:, 1:n_out] = np.asarray(params["actor_w"], np.float32)
    bhead = np.zeros((1, 128), np.float32)
    bhead[0, 0] = float(np.asarray(params["critic_b"], np.float32)[0])
    bhead[0, 1:n_out] = np.asarray(params["actor_b"], np.float32)

    return {
        "w1s": jnp.asarray(w1s, cd), "b1": jnp.asarray(b1, jnp.float32),
        "w2s": jnp.asarray(w2s, cd), "b2": jnp.asarray(b2, jnp.float32),
        "w3s": jnp.asarray(w3s, cd), "b3": jnp.asarray(b3, jnp.float32),
        "w1l": jnp.asarray(w1l, cd), "b1l": jnp.asarray(b1l, jnp.float32),
        "whead": jnp.asarray(whead, cd), "bhead": jnp.asarray(bhead, jnp.float32),
    }


def _prep_input(x_nchw, compute_dtype):
    """NCHW 84x84 -> per-sample conv1 block patches (B, NP1, 144*C)."""
    B, C, Hin, Win = x_nchw.shape
    assert Hin == 84 and Win == 84, "linear1's in_features is derived from 84x84"
    x = jnp.transpose(x_nchw, (0, 2, 3, 1)).astype(jnp.float32)           # NHWC
    xc = x.reshape(B, 21, 4, 21, 4, C).transpose(0, 1, 3, 2, 4, 5)        # (B,21,21,4,4,C)
    pieces = [xc[:, u:u + 19:2, v:v + 19:2] for u in range(3) for v in range(3)]
    p = jnp.stack(pieces, axis=3)                                         # (B,10,10,9,4,4,C)
    p = p.reshape(B, 100, 144 * C)
    p = jnp.pad(p, ((0, 0), (0, NP1 - 100), (0, 0)))                      # zero rows 100..111
    return p.astype(compute_dtype)


def _plan_batch(B, tb_max):
    """(batch tile, padded batch): keep the parallel grid at an even number of
    >= 2 steps so both v7x TensorCores get work; v5e/v6e may use larger tb_max."""
    if B <= tb_max:
        tb = max(1, (B + 1) // 2)
        steps = 2
    else:
        tb = tb_max
        steps = -(-B // tb)
        if steps % 2:
            steps += 1
    return tb, tb * steps


def _pick_head_tile(Bp):
    """Head tile: either the full (tiny) batch, or a multiple of 8 dividing Bp."""
    if Bp % 16 != 0:
        return Bp
    tbb = 8
    while tbb * 2 <= 256 and Bp % (tbb * 2) == 0 and Bp // (tbb * 2) >= 2:
        tbb *= 2
    return tbb


# ---------------------------------------------------------------------------
# Forward pass (ActorCritic.forward with normalize=False).
# ---------------------------------------------------------------------------
# TODO(synk): ob_rms (RunningMeanStd) normalization branch is not implemented
#             (class not provided; module default is normalize=False).
def actor_critic_forward(wp, x_nchw, n_actions, tb_max=8):
    B = x_nchw.shape[0]
    cdt = wp["w1s"].dtype
    patches = _prep_input(x_nchw, cdt)                       # (B, NP1, 144C)

    tb, Bp = _plan_batch(B, tb_max)
    if Bp != B:
        patches = jnp.pad(patches, ((0, Bp - B), (0, 0), (0, 0)))

    conv_out = conv_stack(patches, wp, tb)                   # (Bp, 72, 32)
    # Keep only the real 7x7 conv3 positions (rows 10*i+j, i,j<7) -> (Bp, 1568).
    feat = conv_out[:, :70, :].reshape(Bp, 7, 10, 32)[:, :, :7, :].reshape(Bp, 7 * 7 * 32)

    out = mlp_head(feat, wp, _pick_head_tile(Bp))            # (Bp, 128) f32
    out = out[:B]
    return out[:, :1], out[:, 1:1 + n_actions]


# ---------------------------------------------------------------------------
# Pure-JAX f32 reference (full precision) for correctness checking.
# ---------------------------------------------------------------------------
def reference_forward(params, x_nchw):
    hi = lax.Precision.HIGHEST
    x = jnp.transpose(x_nchw, (0, 2, 3, 1)).astype(jnp.float32)
    dn = ("NHWC", "HWIO", "NHWC")

    def conv(x, w, b, s):
        y = lax.conv_general_dilated(x, w, (s, s), "VALID",
                                     dimension_numbers=dn, precision=hi)
        return jax.nn.relu(y + b)

    x = conv(x, params["conv1_w"], params["conv1_b"], 4)
    x = conv(x, params["conv2_w"], params["conv2_b"], 2)
    x = conv(x, params["conv3_w"], params["conv3_b"], 1)
    B = x.shape[0]
    feat = jnp.transpose(x, (0, 3, 1, 2)).reshape(B, -1)     # torch (C,H,W) order
    h = jax.nn.relu(jnp.dot(feat, params["linear1_w"], precision=hi)
                    + params["linear1_b"])
    critic = jnp.dot(h, params["critic_w"], precision=hi) + params["critic_b"]
    actor = jnp.dot(h, params["actor_w"], precision=hi) + params["actor_b"]
    return critic, actor


if __name__ == "__main__":
    key = jax.random.PRNGKey(0)
    k_params, k_x = jax.random.split(key)

    batch, num_inputs, n_actions, hidden_size = 2, 4, 6, 32
    params = init_params(k_params, num_inputs, n_actions, hidden_size)
    # Spatial size must be 84x84: linear1's in_features is derived from it.
    x = jax.random.normal(k_x, (batch, num_inputs, 84, 84), jnp.float32)

    c_ref, a_ref = reference_forward(params, x)
    fwd = jax.jit(actor_critic_forward, static_argnames=("n_actions", "tb_max"))

    # Structural check (f32 compute path): validates the block-weight / flat-grid
    # / permutation logic with a tight tolerance, independent of bf16 rounding.
    wp32 = prepare_params(params, compute_dtype=jnp.float32)
    c32, a32 = fwd(wp32, x, n_actions=n_actions)
    jax.block_until_ready((c32, a32))
    np.testing.assert_allclose(np.asarray(c32), np.asarray(c_ref), rtol=1e-3, atol=1e-3)
    np.testing.assert_allclose(np.asarray(a32), np.asarray(a_ref), rtol=1e-3, atol=1e-3)

    # Performance path: bf16 matmul operands, f32 accumulation.
    wp = prepare_params(params)  # bf16
    critic, actor = fwd(wp, x, n_actions=n_actions)
    jax.block_until_ready((critic, actor))
    assert critic.shape == (batch, 1) and actor.shape == (batch, n_actions)
    np.testing.assert_allclose(np.asarray(critic), np.asarray(c_ref), rtol=5e-2, atol=2e-1)
    np.testing.assert_allclose(np.asarray(actor), np.asarray(a_ref), rtol=5e-2, atol=2e-1)

    print("KERNEL_OK")
</pallas_src>

<mosaic_0001>
module attributes {stable_mosaic.version = 11 : i64} {
  func.func @_conv_stack_kernel(%arg0: i32, %arg1: memref<1x112x576xf32, #tpu.memory_space<vmem>>, %arg2: memref<576x128xf32, #tpu.memory_space<vmem>>, %arg3: memref<1x128xf32, #tpu.memory_space<vmem>>, %arg4: memref<512x64xf32, #tpu.memory_space<vmem>>, %arg5: memref<1x64xf32, #tpu.memory_space<vmem>>, %arg6: memref<576x32xf32, #tpu.memory_space<vmem>>, %arg7: memref<1x32xf32, #tpu.memory_space<vmem>>, %arg8: memref<1x72x32xf32, #tpu.memory_space<vmem>>, %arg9: memref<1x112x128xf32, #tpu.memory_space<vmem>>, %arg10: memref<1x96x64xf32, #tpu.memory_space<vmem>>) attributes {dimension_semantics = [#tpu.dimension_semantics<parallel>], iteration_bounds = array<i64: 2>, scalar_prefetch = 0 : i64, scratch_operands = 2 : i64, tpu.core_type = #tpu.core_type<tc>, window_params = [{transform_indices = @transform_0, window_bounds = array<i64: 1, 112, 576>}, {pipeline_mode = #tpu.pipeline_mode<synchronous>, transform_indices = @transform_1, window_bounds = array<i64: 576, 128>}, {pipeline_mode = #tpu.pipeline_mode<synchronous>, transform_indices = @transform_2, window_bounds = array<i64: 1, 128>}, {pipeline_mode = #tpu.pipeline_mode<synchronous>, transform_indices = @transform_3, window_bounds = array<i64: 512, 64>}, {pipeline_mode = #tpu.pipeline_mode<synchronous>, transform_indices = @transform_4, window_bounds = array<i64: 1, 64>}, {pipeline_mode = #tpu.pipeline_mode<synchronous>, transform_indices = @transform_5, window_bounds = array<i64: 576, 32>}, {pipeline_mode = #tpu.pipeline_mode<synchronous>, transform_indices = @transform_6, window_bounds = array<i64: 1, 32>}, {transform_indices = @transform_7, window_bounds = array<i64: 1, 72, 32>}]} {
    %c0 = arith.constant 0 : index
    %c0_0 = arith.constant 0 : index
    %c0_1 = arith.constant 0 : index
    %0 = vector.load %arg1[%c0, %c0_0, %c0_1] : memref<1x112x576xf32, #tpu.memory_space<vmem>>, vector<1x112x576xf32>
    %1 = vector.shape_cast %0 : vector<1x112x576xf32> to vector<112x576xf32>
    %c0_2 = arith.constant 0 : index
    %c0_3 = arith.constant 0 : index
    %2 = vector.load %arg2[%c0_2, %c0_3] : memref<576x128xf32, #tpu.memory_space<vmem>>, vector<576x128xf32>
    %cst = arith.constant dense<0.000000e+00> : vector<112x128xf32>
    %3 = tpu.matmul %1, %2, %cst {dimension_numbers = #tpu.dot_dimension_numbers<[1], [0], [0], [1], [0, 0, 1, 1], [], []>} : vector<112x576xf32>, vector<576x128xf32>, vector<112x128xf32> -> vector<112x128xf32>
    %c0_4 = arith.constant 0 : index
    %c0_5 = arith.constant 0 : index
    %4 = vector.load %arg3[%c0_4, %c0_5] : memref<1x128xf32, #tpu.memory_space<vmem>>, vector<1x128xf32>
    %5 = vector.broadcast %4 : vector<1x128xf32> to vector<112x128xf32>
    %6 = arith.addf %3, %5 : vector<112x128xf32>
    %cst_6 = arith.constant 0.000000e+00 : f32
    %7 = vector.broadcast %cst_6 : f32 to vector<112x128xf32>
    %8 = arith.maximumf %6, %7 : vector<112x128xf32>
    %9 = vector.shape_cast %8 : vector<112x128xf32> to vector<1x112x128xf32>
    %c0_7 = arith.constant 0 : index
    %c0_8 = arith.constant 0 : index
    %c0_9 = arith.constant 0 : index
    %10 = vector.load %arg9[%c0_7, %c0_8, %c0_9] : memref<1x112x128xf32, #tpu.memory_space<vmem>>, vector<1x112x128xf32>
    tpu.vector_store %arg9[%c0_7, %c0_8, %c0_9], %9 {strides = array<i32>} : memref<1x112x128xf32, #tpu.memory_space<vmem>>, vector<1x112x128xf32>,
    %c0_10 = arith.constant 0 : index
    %c0_11 = arith.constant 0 : index
    %c0_12 = arith.constant 0 : index
    %11 = vector.load %arg9[%c0_10, %c0_11, %c0_12] : memref<1x112x128xf32, #tpu.memory_space<vmem>>, vector<1x96x128xf32>
    %12 = vector.shape_cast %11 : vector<1x96x128xf32> to vector<96x128xf32>
    %c0_13 = arith.constant 0 : index
    %c1 = arith.constant 1 : index
    %c0_14 = arith.constant 0 : index
    %13 = vector.load %arg9[%c0_13, %c1, %c0_14] : memref<1x112x128xf32, #tpu.memory_space<vmem>>, vector<1x96x128xf32>
    %14 = vector.shape_cast %13 : vector<1x96x128xf32> to vector<96x128xf32>
    %c0_15 = arith.constant 0 : index
    %c10 = arith.constant 10 : index
    %c0_16 = arith.constant 0 : index
    %15 = vector.load %arg9[%c0_15, %c10, %c0_16] : memref<1x112x128xf32, #tpu.memory_space<vmem>>, vector<1x96x128xf32>
    %16 = vector.shape_cast %15 : vector<1x96x128xf32> to vector<96x128xf32>
    %c0_17 = arith.constant 0 : index
    %c11 = arith.constant 11 : index
    %c0_18 = arith.constant 0 : index
    %17 = vector.load %arg9[%c0_17, %c11, %c0_18] : memref<1x112x128xf32, #tpu.memory_space<vmem>>, vector<1x96x128xf32>
    %18 = vector.shape_cast %17 : vector<1x96x128xf32> to vector<96x128xf32>
    %19 = tpu.concatenate %12, %14, %16, %18 in 1 : vector<96x128xf32>, vector<96x128xf32>, vector<96x128xf32>, vector<96x128xf32> -> vector<96x512xf32>
    %c0_19 = arith.constant 0 : index
    %c0_20 = arith.constant 0 : index
    %20 = vector.load %arg4[%c0_19, %c0_20] : memref<512x64xf32, #tpu.memory_space<vmem>>, vector<512x64xf32>
    %cst_21 = arith.constant dense<0.000000e+00> : vector<96x64xf32>
    %21 = tpu.matmul %19, %20, %cst_21 {dimension_numbers = #tpu.dot_dimension_numbers<[1], [0], [0], [1], [0, 0, 1, 1], [], []>} : vector<96x512xf32>, vector<512x64xf32>, vector<96x64xf32> -> vector<96x64xf32>
    %c0_22 = arith.constant 0 : index
    %c0_23 = arith.constant 0 : index
    %22 = vector.load %arg5[%c0_22, %c0_23] : memref<1x64xf32, #tpu.memory_space<vmem>>, vector<1x64xf32>
    %23 = vector.broadcast %22 : vector<1x64xf32> to vector<96x64xf32>
    %24 = arith.addf %21, %23 : vector<96x64xf32>
    %cst_24 = arith.constant 0.000000e+00 : f32
    %25 = vector.broadcast %cst_24 : f32 to vector<96x64xf32>
    %26 = arith.maximumf %24, %25 : vector<96x64xf32>
    %27 = vector.shape_cast %26 : vector<96x64xf32> to vector<1x96x64xf32>
    %c0_25 = arith.constant 0 : index
    %c0_26 = arith.constant 0 : index
    %c0_27 = arith.constant 0 : index
    %28 = vector.load %arg10[%c0_25, %c0_26, %c0_27] : memref<1x96x64xf32, #tpu.memory_space<vmem>>, vector<1x96x64xf32>
    tpu.vector_store %arg10[%c0_25, %c0_26, %c0_27], %27 {strides = array<i32>} : memref<1x96x64xf32, #tpu.memory_space<vmem>>, vector<1x96x64xf32>,
    %c0_28 = arith.constant 0 : index
    %c0_29 = arith.constant 0 : index
    %c0_30 = arith.constant 0 : index
    %29 = vector.load %arg10[%c0_28, %c0_29, %c0_30] : memref<1x96x64xf32, #tpu.memory_space<vmem>>, vector<1x72x64xf32>
    %30 = vector.shape_cast %29 : vector<1x72x64xf32> to vector<72x64xf32>
    %c0_31 = arith.constant 0 : index
    %c1_32 = arith.constant 1 : index
    %c0_33 = arith.constant 0 : index
    %31 = vector.load %arg10[%c0_31, %c1_32, %c0_33] : memref<1x96x64xf32, #tpu.memory_space<vmem>>, vector<1x72x64xf32>
    %32 = vector.shape_cast %31 : vector<1x72x64xf32> to vector<72x64xf32>
    %c0_34 = arith.constant 0 : index
    %c2 = arith.constant 2 : index
    %c0_35 = arith.constant 0 : index
    %33 = vector.load %arg10[%c0_34, %c2, %c0_35] : memref<1x96x64xf32, #tpu.memory_space<vmem>>, vector<1x72x64xf32>
    %34 = vector.shape_cast %33 : vector<1x72x64xf32> to vector<72x64xf32>
    %c0_36 = arith.constant 0 : index
    %c10_37 = arith.constant 10 : index
    %c0_38 = arith.constant 0 : index
    %35 = vector.load %arg10[%c0_36, %c10_37, %c0_38] : memref<1x96x64xf32, #tpu.memory_space<vmem>>, vector<1x72x64xf32>
    %36 = vector.shape_cast %35 : vector<1x72x64xf32> to vector<72x64xf32>
    %c0_39 = arith.constant 0 : index
    %c11_40 = arith.constant 11 : index
    %c0_41 = arith.constant 0 : index
    %37 = vector.load %arg10[%c0_39, %c11_40, %c0_41] : memref<1x96x64xf32, #tpu.memory_space<vmem>>, vector<1x72x64xf32>
    %38 = vector.shape_cast %37 : vector<1x72x64xf32> to vector<72x64xf32>
    %c0_42 = arith.constant 0 : index
    %c12 = arith.constant 12 : index
    %c0_43 = arith.constant 0 : index
    %39 = vector.load %arg10[%c0_42, %c12, %c0_43] : memref<1x96x64xf32, #tpu.memory_space<vmem>>, vector<1x72x64xf32>
    %40 = vector.shape_cast %39 : vector<1x72x64xf32> to vector<72x64xf32>
    %c0_44 = arith.constant 0 : index
    %c20 = arith.constant 20 : index
    %c0_45 = arith.constant 0 : index
    %41 = vector.load %arg10[%c0_44, %c20, %c0_45] : memref<1x96x64xf32, #tpu.memory_space<vmem>>, vector<1x72x64xf32>
    %42 = vector.shape_cast %41 : vector<1x72x64xf32> to vector<72x64xf32>
    %c0_46 = arith.constant 0 : index
    %c21 = arith.constant 21 : index
    %c0_47 = arith.constant 0 : index
    %43 = vector.load %arg10[%c0_46, %c21, %c0_47] : memref<1x96x64xf32, #tpu.memory_space<vmem>>, vector<1x72x64xf32>
    %44 = vector.shape_cast %43 : vector<1x72x64xf32> to vector<72x64xf32>
    %c0_48 = arith.constant 0 : index
    %c22 = arith.constant 22 : index
    %c0_49 = arith.constant 0 : index
    %45 = vector.load %arg10[%c0_48, %c22, %c0_49] : memref<1x96x64xf32, #tpu.memory_space<vmem>>, vector<1x72x64xf32>
    %46 = vector.shape_cast %45 : vector<1x72x64xf32> to vector<72x64xf32>
    %47 = tpu.concatenate %30, %32, %34, %36, %38, %40, %42, %44, %46 in 1 : vector<72x64xf32>, vector<72x64xf32>, vector<72x64xf32>, vector<72x64xf32>, vector<72x64xf32>, vector<72x64xf32>, vector<72x64xf32>, vector<72x64xf32>, vector<72x64xf32> -> vector<72x576xf32>
    %c0_50 = arith.constant 0 : index
    %c0_51 = arith.constant 0 : index
    %48 = vector.load %arg6[%c0_50, %c0_51] : memref<576x32xf32, #tpu.memory_space<vmem>>, vector<576x32xf32>
    %cst_52 = arith.constant dense<0.000000e+00> : vector<72x32xf32>
    %49 = tpu.matmul %47, %48, %cst_52 {dimension_numbers = #tpu.dot_dimension_numbers<[1], [0], [0], [1], [0, 0, 1, 1], [], []>} : vector<72x576xf32>, vector<576x32xf32>, vector<72x32xf32> -> vector<72x32xf32>
    %c0_53 = arith.constant 0 : index
    %c0_54 = arith.constant 0 : index
    %50 = vector.load %arg7[%c0_53, %c0_54] : memref<1x32xf32, #tpu.memory_space<vmem>>, vector<1x32xf32>
    %51 = vector.broadcast %50 : vector<1x32xf32> to vector<72x32xf32>
    %52 = arith.addf %49, %51 : vector<72x32xf32>
    %cst_55 = arith.constant 0.000000e+00 : f32
    %53 = vector.broadcast %cst_55 : f32 to vector<72x32xf32>
    %54 = arith.maximumf %52, %53 : vector<72x32xf32>
    %55 = vector.shape_cast %54 : vector<72x32xf32> to vector<1x72x32xf32>
    %c0_56 = arith.constant 0 : index
    %c0_57 = arith.constant 0 : index
    %c0_58 = arith.constant 0 : index
    %56 = vector.load %arg8[%c0_56, %c0_57, %c0_58] : memref<1x72x32xf32, #tpu.memory_space<vmem>>, vector<1x72x32xf32>
    tpu.vector_store %arg8[%c0_56, %c0_57, %c0_58], %55 {strides = array<i32>} : memref<1x72x32xf32, #tpu.memory_space<vmem>>, vector<1x72x32xf32>,
    return
  }
  func.func @transform_0(%arg0: i32) -> (i32, i32, i32) {
    %c0_i32 = arith.constant 0 : i32
    %c0_i32_0 = arith.constant 0 : i32
    %c0_i32_1 = arith.constant 0 : i32
    return %arg0, %c0_i32, %c0_i32_0 : i32, i32, i32
  }
  func.func @transform_1(%arg0: i32) -> (i32, i32) {
    %c0_i32 = arith.constant 0 : i32
    %c0_i32_0 = arith.constant 0 : i32
    %c0_i32_1 = arith.constant 0 : i32
    return %c0_i32, %c0_i32_0 : i32, i32
  }
  func.func @transform_2(%arg0: i32) -> (i32, i32) {
    %c0_i32 = arith.constant 0 : i32
    %c0_i32_0 = arith.constant 0 : i32
    %c0_i32_1 = arith.constant 0 : i32
    return %c0_i32, %c0_i32_0 : i32, i32
  }
  func.func @transform_3(%arg0: i32) -> (i32, i32) {
    %c0_i32 = arith.constant 0 : i32
    %c0_i32_0 = arith.constant 0 : i32
    %c0_i32_1 = arith.constant 0 : i32
    return %c0_i32, %c0_i32_0 : i32, i32
  }
  func.func @transform_4(%arg0: i32) -> (i32, i32) {
    %c0_i32 = arith.constant 0 : i32
    %c0_i32_0 = arith.constant 0 : i32
    %c0_i32_1 = arith.constant 0 : i32
    return %c0_i32, %c0_i32_0 : i32, i32
  }
  func.func @transform_5(%arg0: i32) -> (i32, i32) {
    %c0_i32 = arith.constant 0 : i32
    %c0_i32_0 = arith.constant 0 : i32
    %c0_i32_1 = arith.constant 0 : i32
    return %c0_i32, %c0_i32_0 : i32, i32
  }
  func.func @transform_6(%arg0: i32) -> (i32, i32) {
    %c0_i32 = arith.constant 0 : i32
    %c0_i32_0 = arith.constant 0 : i32
    %c0_i32_1 = arith.constant 0 : i32
    return %c0_i32, %c0_i32_0 : i32, i32
  }
  func.func @transform_7(%arg0: i32) -> (i32, i32, i32) {
    %c0_i32 = arith.constant 0 : i32
    %c0_i32_0 = arith.constant 0 : i32
    %c0_i32_1 = arith.constant 0 : i32
    return %arg0, %c0_i32, %c0_i32_0 : i32, i32, i32
  }
}

module attributes {stable_mosaic.version = 11 : i64} {
  func.func @_mlp_head_kernel(%arg0: i32, %arg1: memref<2x1568xf32, #tpu.memory_space<vmem>>, %arg2: memref<1568x32xf32, #tpu.memory_space<vmem>>, %arg3: memref<1x32xf32, #tpu.memory_space<vmem>>, %arg4: memref<32x128xf32, #tpu.memory_space<vmem>>, %arg5: memref<1x128xf32, #tpu.memory_space<vmem>>, %arg6: memref<2x128xf32, #tpu.memory_space<vmem>>) attributes {dimension_semantics = [#tpu.dimension_semantics<parallel>], iteration_bounds = array<i64: 1>, scalar_prefetch = 0 : i64, scratch_operands = 0 : i64, tpu.core_type = #tpu.core_type<tc>, window_params = [{transform_indices = @transform_0, window_bounds = array<i64: 2, 1568>}, {pipeline_mode = #tpu.pipeline_mode<synchronous>, transform_indices = @transform_1, window_bounds = array<i64: 1568, 32>}, {pipeline_mode = #tpu.pipeline_mode<synchronous>, transform_indices = @transform_2, window_bounds = array<i64: 1, 32>}, {pipeline_mode = #tpu.pipeline_mode<synchronous>, transform_indices = @transform_3, window_bounds = array<i64: 32, 128>}, {pipeline_mode = #tpu.pipeline_mode<synchronous>, transform_indices = @transform_4, window_bounds = array<i64: 1, 128>}, {transform_indices = @transform_5, window_bounds = array<i64: 2, 128>}]} {
    %c0 = arith.constant 0 : index
    %c0_0 = arith.constant 0 : index
    %0 = vector.load %arg1[%c0, %c0_0] : memref<2x1568xf32, #tpu.memory_space<vmem>>, vector<2x1568xf32>
    %c0_1 = arith.constant 0 : index
    %c0_2 = arith.constant 0 : index
    %1 = vector.load %arg2[%c0_1, %c0_2] : memref<1568x32xf32, #tpu.memory_space<vmem>>, vector<1568x32xf32>
    %cst = arith.constant dense<0.000000e+00> : vector<2x32xf32>
    %2 = tpu.matmul %0, %1, %cst {dimension_numbers = #tpu.dot_dimension_numbers<[1], [0], [0], [1], [0, 0, 1, 1], [], []>} : vector<2x1568xf32>, vector<1568x32xf32>, vector<2x32xf32> -> vector<2x32xf32>
    %c0_3 = arith.constant 0 : index
    %c0_4 = arith.constant 0 : index
    %3 = vector.load %arg3[%c0_3, %c0_4] : memref<1x32xf32, #tpu.memory_space<vmem>>, vector<1x32xf32>
    %4 = vector.broadcast %3 : vector<1x32xf32> to vector<2x32xf32>
    %5 = arith.addf %2, %4 : vector<2x32xf32>
    %cst_5 = arith.constant 0.000000e+00 : f32
    %6 = vector.broadcast %cst_5 : f32 to vector<2x32xf32>
    %7 = arith.maximumf %5, %6 : vector<2x32xf32>
    %c0_6 = arith.constant 0 : index
    %c0_7 = arith.constant 0 : index
    %8 = vector.load %arg4[%c0_6, %c0_7] : memref<32x128xf32, #tpu.memory_space<vmem>>, vector<32x128xf32>
    %cst_8 = arith.constant dense<0.000000e+00> : vector<2x128xf32>
    %9 = tpu.matmul %7, %8, %cst_8 {dimension_numbers = #tpu.dot_dimension_numbers<[1], [0], [0], [1], [0, 0, 1, 1], [], []>} : vector<2x32xf32>, vector<32x128xf32>, vector<2x128xf32> -> vector<2x128xf32>
    %c0_9 = arith.constant 0 : index
    %c0_10 = arith.constant 0 : index
    %10 = vector.load %arg5[%c0_9, %c0_10] : memref<1x128xf32, #tpu.memory_space<vmem>>, vector<1x128xf32>
    %11 = vector.broadcast %10 : vector<1x128xf32> to vector<2x128xf32>
    %12 = arith.addf %9, %11 : vector<2x128xf32>
    %c0_11 = arith.constant 0 : index
    %c0_12 = arith.constant 0 : index
    %13 = vector.load %arg6[%c0_11, %c0_12] : memref<2x128xf32, #tpu.memory_space<vmem>>, vector<2x128xf32>
    tpu.vector_store %arg6[%c0_11, %c0_12], %12 {strides = array<i32>} : memref<2x128xf32, #tpu.memory_space<vmem>>, vector<2x128xf32>,
    return
  }
  func.func @transform_0(%arg0: i32) -> (i32, i32) {
    %c0_i32 = arith.constant 0 : i32
    %c0_i32_0 = arith.constant 0 : i32
    return %arg0, %c0_i32 : i32, i32
  }
  func.func @transform_1(%arg0: i32) -> (i32, i32) {
    %c0_i32 = arith.constant 0 : i32
    %c0_i32_0 = arith.constant 0 : i32
    %c0_i32_1 = arith.constant 0 : i32
    return %c0_i32, %c0_i32_0 : i32, i32
  }
  func.func @transform_2(%arg0: i32) -> (i32, i32) {
    %c0_i32 = arith.constant 0 : i32
    %c0_i32_0 = arith.constant 0 : i32
    %c0_i32_1 = arith.constant 0 : i32
    return %c0_i32, %c0_i32_0 : i32, i32
  }
  func.func @transform_3(%arg0: i32) -> (i32, i32) {
    %c0_i32 = arith.constant 0 : i32
    %c0_i32_0 = arith.constant 0 : i32
    %c0_i32_1 = arith.constant 0 : i32
    return %c0_i32, %c0_i32_0 : i32, i32
  }
  func.func @transform_4(%arg0: i32) -> (i32, i32) {
    %c0_i32 = arith.constant 0 : i32
    %c0_i32_0 = arith.constant 0 : i32
    %c0_i32_1 = arith.constant 0 : i32
    return %c0_i32, %c0_i32_0 : i32, i32
  }
  func.func @transform_5(%arg0: i32) -> (i32, i32) {
    %c0_i32 = arith.constant 0 : i32
    %c0_i32_0 = arith.constant 0 : i32
    return %arg0, %c0_i32 : i32, i32
  }
}

</mosaic_0001>

<bundles_post_ra>
// kernel: actor_critic_forward.3
= control target key start
LH: loop header
LB: loop body
LE: loop exit
PB: predicated region body
PF: predicated region fallthrough
CT: control target
= control target key end

     0   :  { %10 = vsyncpa [#allocation3], 0  ;;  %s2123_s0 = inlined_call_operand.vmem [shape: f32[2,1568], index: 0, kind: input, shape index: {}]   ;;  %s2124_s1 = inlined_call_operand.vmem [shape: f32[1568,32], index: 1, kind: input, shape index: {}]   ;;  %s2125_s2 = inlined_call_operand.hbm [shape: f32[1,32], index: 2, kind: input, shape index: {}]   ;;  %s2126_s3 = inlined_call_operand.vmem [shape: f32[32,128], index: 3, kind: input, shape index: {}]   ;;  %s2127_s4 = inlined_call_operand.hbm [shape: f32[1,128], index: 4, kind: input, shape index: {}]   ;;  %s2128_s5 = inlined_call_operand.vmem [shape: f32[2,128], index: 5, kind: output, shape index: {}]  }
   0x1   :  { %11 = vsyncpa [#allocation5], 0  ;;  %s1418_s18 = smov [#allocation2]   ;;  %s1419_s20 = smov [#allocation4]  }
   0x2   :  { %s22_s19 = sshll.u32 %s1418_s18, 4  ;;  %s34_s21 = sshll.u32 %s1419_s20, 4  ;;  %s23_s19 = int_to_ptr.vmem [resolvable:$true] %s22_s19  ;;  %s35_s21 = int_to_ptr.vmem [resolvable:$true] %s34_s21 }
   0x3   :  { %s1370_s24 = scalar_lea.hbm %s2125_s2, 16 }
   0x4   :  { %p1371_p0 = scmp.ne.s32.totalorder %s2125_s2, %s1370_s24  ;;  %p1374_p1 = scmp.lt.u32.totalorder %s1370_s24, %s2125_s2 }
   0x6   :  { %p1376_p2 = pnand %p1374_p1, %p1371_p0 }
   0x8   :  { %1379 = shalt.err (!%p1376_p2)
}
   0x9   :  { %s1380_s29 = scalar_lea.vmem %s23_s19, 16  ;;  %s1384_s30 = scalar_lea.vmem %s23_s19, 32 }
   0xa   :  { %p1381_p3 = scmp.ne.s32.totalorder %s23_s19, %s1380_s29  ;;  %p1385_p4 = scmp.lt.s32.totalorder %s23_s19, %s23_s19 }
   0xb   :  { %p1386_p5 = scmp.lt.s32.totalorder %s1384_s30, %s1380_s29 }
   0xd   :  { %p1387_p6 = por %p1386_p5, %p1385_p4 }
   0xf   :  { %p1388_p7 = pnand %p1387_p6, %p1381_p3 }
  0x11   :  { %1391 = shalt.err (!%p1388_p7)
}
  0x12   :  { %25 = dma.hbm_to_vmem [thread:$0]  %s2125_s2, 16, %s23_s19, [#allocation3]  }
  0x13   :  { %s1392_s10 = scalar_lea.hbm %s2127_s4, 16 }
  0x14   :  { %p1393_p8 = scmp.ne.s32.totalorder %s2127_s4, %s1392_s10  ;;  %p1396_p9 = scmp.lt.u32.totalorder %s1392_s10, %s2127_s4 }
  0x16   :  { %p1398_p10 = pnand %p1396_p9, %p1393_p8 }
  0x18   :  { %1401 = shalt.err (!%p1398_p10)
}
  0x19   :  { %s1402_s15 = scalar_lea.vmem %s35_s21, 16  ;;  %s1406_s16 = scalar_lea.vmem %s35_s21, 32 }
  0x1a   :  { %p1403_p11 = scmp.ne.s32.totalorder %s35_s21, %s1402_s15  ;;  %p1407_p12 = scmp.lt.s32.totalorder %s35_s21, %s35_s21 }
  0x1b   :  { %p1408_p13 = scmp.lt.s32.totalorder %s1406_s16, %s1402_s15 }
  0x1d   :  { %p1409_p0 = por %p1408_p13, %p1407_p12 }
  0x1f   :  { %p1410_p1 = pnand %p1409_p0, %p1403_p11 }
  0x21   :  { %1413 = shalt.err (!%p1410_p1)
}
  0x22   :  { %37 = dma.hbm_to_vmem [thread:$0]  %s2127_s4, 16, %s35_s21, [#allocation5]  }
  0x23   :  { %1414 = dma.done.wait [#allocation3], 16  }
  0x24   :  { %1415 = vsyncadd [#allocation3], 4294967280 }
  0x25   :  { %1416 = dma.done.wait [#allocation5], 16  }
  0x26   :  { %1417 = vsyncadd [#allocation5], 4294967280  ;;  %v64_v0 = vld [vmem:[%s2124_s1 + $0x80] sm:$0xff]  ;;  %v65_v1 = vld [vmem:[%s2124_s1 + $0x88] sm:$0xff]  ;;  %v1420_v43 = vmov 1983009808   ;;  %v259_v45 = vlaneseq }
  0x27   :  { %v48_v2 = vld [vmem:[%s2124_s1] sm:$0xff]  ;;  %v1157_v3 = vpack.c.bf16 %v65_v1, %v64_v0  ;;  %v49_v4 = vld [vmem:[%s2124_s1 + $0x8] sm:$0xff]  ;;  %v66_v11 = vld [vmem:[%s2124_s1 + $0x90] sm:$0xff]  ;;  %v257_v44 = vunpack.c.l.s4 %v1420_v43  ;;  %vm1422_vm0 = vmmov 0   ;;  %vm325_vm1 = vcmask 261120  }
  0x28   :  { %v96_v5 = vld [vmem:[%s2124_s1 + $0x180] sm:$0xff]  ;;  %v97_v6 = vld [vmem:[%s2124_s1 + $0x188] sm:$0xff]  ;;  %v1159_v7 = vpack.c.bf16 %v49_v4, %v48_v2  ;;  %v67_v13 = vld [vmem:[%s2124_s1 + $0x98] sm:$0xff]  ;;  %v260_v60 = vshrl.u32 %v259_v45, 7 }
  0x29   :  { %v1189_v8 = vpack.c.bf16 %v97_v6, %v96_v5  ;;  %v80_v9 = vld [vmem:[%s2124_s1 + $0x100] sm:$0xff]  ;;  %v81_v10 = vld [vmem:[%s2124_s1 + $0x108] sm:$0xff]  ;;  %1158 = vmatprep.subr.bf16.mxu0 %v1157_v3  ;;  %v50_v14 = vld [vmem:[%s2124_s1 + $0x10] sm:$0xff]  ;;  %v1161_v16 = vpack.c.bf16 %v67_v13, %v66_v11  ;;  %v258_v59 = vunpack.c.0.s8 %v257_v44 }
  0x2a   :  { %v1191_v12 = vpack.c.bf16 %v81_v10, %v80_v9  ;;  %v51_v15 = vld [vmem:[%s2124_s1 + $0x18] sm:$0xff]  ;;  %1160 = vmatpush3.bf16.msra.mxu0 %v1159_v7  ;;  %v98_v18 = vld [vmem:[%s2124_s1 + $0x190] sm:$0xff]  ;;  %v68_v23 = vld [vmem:[%s2124_s1 + $0xa0] sm:$0xff] }
  0x2b   :  { %1190 = vmatprep.subr.bf16.mxu1 %v1189_v8  ;;  %v1163_v17 = vpack.c.bf16 %v51_v15, %v50_v14  ;;  %v99_v19 = vld [vmem:[%s2124_s1 + $0x198] sm:$0xff]  ;;  %v82_v20 = vld [vmem:[%s2124_s1 + $0x110] sm:$0xff]  ;;  %v69_v24 = vld [vmem:[%s2124_s1 + $0xa8] sm:$0xff]  ;;  %1162 = vmatprep.subr.bf16.mxu0 %v1161_v16  ;;  %v1622_v10 = vsub.s32 %v258_v59, %v260_v60 }
  0x2c   :  { %1192 = vmatpush3.bf16.msra.mxu1 %v1191_v12  ;;  %v1193_v21 = vpack.c.bf16 %v99_v19, %v98_v18  ;;  %v83_v22 = vld [vmem:[%s2124_s1 + $0x118] sm:$0xff]  ;;  %v1165_v26 = vpack.c.bf16 %v69_v24, %v68_v23  ;;  %v52_v27 = vld [vmem:[%s2124_s1 + $0x20] sm:$0xff]  ;;  %v53_v28 = vld [vmem:[%s2124_s1 + $0x28] sm:$0xff] }
  0x2d   :  { %v1195_v25 = vpack.c.bf16 %v83_v22, %v82_v20  ;;  %v100_v29 = vld [vmem:[%s2124_s1 + $0x1a0] sm:$0xff]  ;;  %v101_v30 = vld [vmem:[%s2124_s1 + $0x1a8] sm:$0xff]  ;;  %v1167_v33 = vpack.c.bf16 %v53_v28, %v52_v27  ;;  %v70_v35 = vld [vmem:[%s2124_s1 + $0xb0] sm:$0xff] }
  0x2e   :  { %1194 = vmatprep.subr.bf16.mxu1 %v1193_v21  ;;  %v84_v31 = vld [vmem:[%s2124_s1 + $0x120] sm:$0xff]  ;;  %v85_v32 = vld [vmem:[%s2124_s1 + $0x128] sm:$0xff]  ;;  %1164 = vmatpush3.bf16.msra.mxu0 %v1163_v17  ;;  %v1197_v34 = vpack.c.bf16 %v101_v30, %v100_v29  ;;  %v71_v36 = vld [vmem:[%s2124_s1 + $0xb8] sm:$0xff] }
  0x2f   :  { %v54_v37 = vld [vmem:[%s2124_s1 + $0x30] sm:$0xff]  ;;  %1166 = vmatprep.subr.bf16.mxu0 %v1165_v26  ;;  %v1199_v38 = vpack.c.bf16 %v85_v32, %v84_v31  ;;  %v1169_v39 = vpack.c.bf16 %v71_v36, %v70_v35  ;;  %v55_v40 = vld [vmem:[%s2124_s1 + $0x38] sm:$0xff]  ;;  %v72_v49 = vld [vmem:[%s2124_s1 + $0xc0] sm:$0xff] }
  0x30   :  { %1196 = vmatpush3.bf16.msra.mxu1 %v1195_v25  ;;  %v102_v41 = vld [vmem:[%s2124_s1 + $0x1b0] sm:$0xff]  ;;  %v103_v42 = vld [vmem:[%s2124_s1 + $0x1b8] sm:$0xff]  ;;  %v73_v50 = vld [vmem:[%s2124_s1 + $0xc8] sm:$0xff]  ;;  %v1171_v51 = vpack.c.bf16 %v55_v40, %v54_v37 }
  0x31   :  { %1198 = vmatprep.subr.bf16.mxu1 %v1197_v34  ;;  %v1201_v46 = vpack.c.bf16 %v103_v42, %v102_v41  ;;  %v86_v47 = vld [vmem:[%s2124_s1 + $0x130] sm:$0xff]  ;;  %v87_v48 = vld [vmem:[%s2124_s1 + $0x138] sm:$0xff]  ;;  %v104_v52 = vld [vmem:[%s2124_s1 + $0x1c0] sm:$0xff]  ;;  %v1173_v55 = vpack.c.bf16 %v73_v50, %v72_v49 }
  0x32   :  { %1168 = vmatpush3.bf16.msra.mxu0 %v1167_v33  ;;  %v105_v53 = vld [vmem:[%s2124_s1 + $0x1c8] sm:$0xff]  ;;  %v1203_v54 = vpack.c.bf16 %v87_v48, %v86_v47  ;;  %v56_v56 = vld [vmem:[%s2124_s1 + $0x40] sm:$0xff]  ;;  %v74_v63 = vld [vmem:[%s2124_s1 + $0xd0] sm:$0xff] }
  0x33   :  { %1170 = vmatprep.subr.bf16.mxu0 %v1169_v39  ;;  %v57_v57 = vld [vmem:[%s2124_s1 + $0x48] sm:$0xff]  ;;  %v88_v58 = vld [vmem:[%s2124_s1 + $0x140] sm:$0xff]  ;;  %v1205_v61 = vpack.c.bf16 %v105_v53, %v104_v52  ;;  %v75_v0 = vld [vmem:[%s2124_s1 + $0xd8] sm:$0xff] }
  0x34   :  { %1200 = vmatpush3.bf16.msra.mxu1 %v1199_v38  ;;  %v89_v62 = vld [vmem:[%s2124_s1 + $0x148] sm:$0xff]  ;;  %v106_v1 = vld [vmem:[%s2124_s1 + $0x1d0] sm:$0xff]  ;;  %v107_v2 = vld [vmem:[%s2124_s1 + $0x1d8] sm:$0xff]  ;;  %v1175_v3 = vpack.c.bf16 %v57_v57, %v56_v56  ;;  %v1177_v6 = vpack.c.bf16 %v75_v0, %v74_v63 }
  0x35   :  { %1202 = vmatprep.subr.bf16.mxu1 %v1201_v46  ;;  %v58_v4 = vld [vmem:[%s2124_s1 + $0x50] sm:$0xff]  ;;  %v1207_v5 = vpack.c.bf16 %v89_v62, %v88_v58  ;;  %v59_v7 = vld [vmem:[%s2124_s1 + $0x58] sm:$0xff]  ;;  %v1209_v11 = vpack.c.bf16 %v107_v2, %v106_v1  ;;  %v76_v12 = vld [vmem:[%s2124_s1 + $0xe0] sm:$0xff] }
  0x36   :  { %1172 = vmatpush3.bf16.msra.mxu0 %v1171_v51  ;;  %v90_v8 = vld [vmem:[%s2124_s1 + $0x150] sm:$0xff]  ;;  %v91_v9 = vld [vmem:[%s2124_s1 + $0x158] sm:$0xff]  ;;  %v77_v13 = vld [vmem:[%s2124_s1 + $0xe8] sm:$0xff]  ;;  %v1179_v16 = vpack.c.bf16 %v59_v7, %v58_v4 }
  0x37   :  { %1174 = vmatprep.subr.bf16.mxu0 %v1173_v55  ;;  %v108_v14 = vld [vmem:[%s2124_s1 + $0x1e0] sm:$0xff]  ;;  %v109_v15 = vld [vmem:[%s2124_s1 + $0x1e8] sm:$0xff]  ;;  %v1211_v17 = vpack.c.bf16 %v91_v9, %v90_v8  ;;  %v1181_v19 = vpack.c.bf16 %v77_v13, %v76_v12  ;;  %v78_v27 = vld [vmem:[%s2124_s1 + $0xf0] sm:$0xff] }
  0x38   :  { %1204 = vmatpush3.bf16.msra.mxu1 %v1203_v54  ;;  %v44_v18 = vld [vmem:[%s2123_s0] sm:$0xff]  ;;  %v61_v21 = vld [vmem:[%s2124_s1 + $0x68] sm:$0xff]  ;;  %v1213_v25 = vpack.c.bf16 %v109_v15, %v108_v14  ;;  %v79_v28 = vld [vmem:[%s2124_s1 + $0xf8] sm:$0xff] }
  0x39   :  { %1206 = vmatprep.subr.bf16.mxu1 %v1205_v61  ;;  %v60_v20 = vld [vmem:[%s2124_s1 + $0x60] sm:$0xff]  ;;  %v262_v23 = vrot.slane %v44_v18, %v1622_v10  ;;  %v255_v24 = vcombine.high %v44_v18, %v44_v18  ;;  %v93_v26 = vld [vmem:[%s2124_s1 + $0x168] sm:$0xff]  ;;  %v110_v29 = vld [vmem:[%s2124_s1 + $0x1f0] sm:$0xff]  ;;  %v1185_v35 = vpack.c.bf16 %v79_v28, %v78_v27 }
  0x3a   :  { %1176 = vmatpush3.bf16.msra.mxu0 %v1175_v3  ;;  %v92_v22 = vld [vmem:[%s2124_s1 + $0x160] sm:$0xff]  ;;  %v111_v30 = vld [vmem:[%s2124_s1 + $0x1f8] sm:$0xff]  ;;  %v1183_v33 = vpack.c.bf16 %v61_v21, %v60_v20  ;;  %v62_v36 = vld [vmem:[%s2124_s1 + $0x70] sm:$0xff] }
  0x3b   :  { %1178 = vmatprep.subr.bf16.mxu0 %v1177_v6  ;;  %v270_v31 = vcombine.high %v262_v23, %v262_v23  ;;  %v269_v32 = vrot.slane %v255_v24, %v1622_v10  ;;  %v1215_v34 = vpack.c.bf16 %v93_v26, %v92_v22  ;;  %v63_v37 = vld [vmem:[%s2124_s1 + $0x78] sm:$0xff]  ;;  %v94_v38 = vld [vmem:[%s2124_s1 + $0x170] sm:$0xff]  ;;  %v1217_v40 = vpack.c.bf16 %v111_v30, %v110_v29  ;;  %v128_v42 = vld [vmem:[%s2124_s1 + $0x280] sm:$0xff] }
  0x3c   :  { %1208 = vmatpush3.bf16.msra.mxu1 %v1207_v5  ;;  %v95_v41 = vld [vmem:[%s2124_s1 + $0x178] sm:$0xff]  ;;  %v129_v43 = vld [vmem:[%s2124_s1 + $0x288] sm:$0xff]  ;;  %v160_v44 = vld [vmem:[%s2124_s1 + $0x380] sm:$0xff]  ;;  %v1187_v46 = vpack.c.bf16 %v63_v37, %v62_v36 }
  0x3d   :  { %1210 = vmatprep.subr.bf16.mxu1 %v1209_v11  ;;  %v271_v39 = vcombine.high %v269_v32, %v269_v32  ;;  %392 = vmatprep.mubr.f32.mxu0 %v270_v31  ;;  %v161_v45 = vld [vmem:[%s2124_s1 + $0x388] sm:$0xff]  ;;  %v1219_v47 = vpack.c.bf16 %v95_v41, %v94_v38  ;;  %v1221_v48 = vpack.c.bf16 %v129_v43, %v128_v42  ;;  %v112_v49 = vld [vmem:[%s2124_s1 + $0x200] sm:$0xff]  ;;  %v130_v54 = vld [vmem:[%s2124_s1 + $0x290] sm:$0xff] }
  0x3e   :  { %1180 = vmatpush3.bf16.msra.mxu0 %v1179_v16  ;;  %v113_v50 = vld [vmem:[%s2124_s1 + $0x208] sm:$0xff]  ;;  %v144_v51 = vld [vmem:[%s2124_s1 + $0x300] sm:$0xff]  ;;  %v1253_v52 = vpack.c.bf16 %v161_v45, %v160_v44  ;;  %v131_v55 = vld [vmem:[%s2124_s1 + $0x298] sm:$0xff] }
  0x3f   :  { %1182 = vmatprep.subr.bf16.mxu0 %v1181_v19  ;;  %462 = vmatprep.mubr.f32.mxu1 %v271_v39  ;;  %v145_v53 = vld [vmem:[%s2124_s1 + $0x308] sm:$0xff]  ;;  %v162_v56 = vld [vmem:[%s2124_s1 + $0x390] sm:$0xff]  ;;  %v163_v57 = vld [vmem:[%s2124_s1 + $0x398] sm:$0xff]  ;;  %v1223_v58 = vpack.c.bf16 %v113_v50, %v112_v49  ;;  %v1225_v60 = vpack.c.bf16 %v131_v55, %v130_v54 }
  0x40   :  { %1212 = vmatpush3.bf16.msra.mxu1 %v1211_v17  ;;  %v1255_v59 = vpack.c.bf16 %v145_v53, %v144_v51  ;;  %v114_v61 = vld [vmem:[%s2124_s1 + $0x210] sm:$0xff]  ;;  %v115_v62 = vld [vmem:[%s2124_s1 + $0x218] sm:$0xff]  ;;  %v1257_v0 = vpack.c.bf16 %v163_v57, %v162_v56  ;;  %v132_v2 = vld [vmem:[%s2124_s1 + $0x2a0] sm:$0xff] }
  0x41   :  { %1214 = vmatprep.subr.bf16.mxu1 %v1213_v25  ;;  %v146_v63 = vld [vmem:[%s2124_s1 + $0x310] sm:$0xff]  ;;  %v147_v1 = vld [vmem:[%s2124_s1 + $0x318] sm:$0xff]  ;;  %v133_v3 = vld [vmem:[%s2124_s1 + $0x2a8] sm:$0xff]  ;;  %v1227_v6 = vpack.c.bf16 %v115_v62, %v114_v61 }
  0x42   :  { %1184 = vmatpush3.bf16.msra.mxu0 %v1183_v33  ;;  %v164_v4 = vld [vmem:[%s2124_s1 + $0x3a0] sm:$0xff]  ;;  %v165_v5 = vld [vmem:[%s2124_s1 + $0x3a8] sm:$0xff]  ;;  %v1259_v7 = vpack.c.bf16 %v147_v1, %v146_v63  ;;  %v1229_v8 = vpack.c.bf16 %v133_v3, %v132_v2  ;;  %v134_v15 = vld [vmem:[%s2124_s1 + $0x2b0] sm:$0xff] }
  0x43   :  { %1186 = vmatprep.subr.bf16.mxu0 %v1185_v35  ;;  %v116_v9 = vld [vmem:[%s2124_s1 + $0x220] sm:$0xff]  ;;  %v117_v11 = vld [vmem:[%s2124_s1 + $0x228] sm:$0xff]  ;;  %v1261_v13 = vpack.c.bf16 %v165_v5, %v164_v4  ;;  %v135_v16 = vld [vmem:[%s2124_s1 + $0x2b8] sm:$0xff] }
  0x44   :  { %1216 = vmatpush3.bf16.msra.mxu1 %v1215_v34  ;;  %v148_v12 = vld [vmem:[%s2124_s1 + $0x320] sm:$0xff]  ;;  %v149_v14 = vld [vmem:[%s2124_s1 + $0x328] sm:$0xff]  ;;  %v166_v17 = vld [vmem:[%s2124_s1 + $0x3b0] sm:$0xff]  ;;  %v1231_v19 = vpack.c.bf16 %v117_v11, %v116_v9  ;;  %v1233_v22 = vpack.c.bf16 %v135_v16, %v134_v15 }
  0x45   :  { %1218 = vmatprep.subr.bf16.mxu1 %v1217_v40  ;;  %v167_v18 = vld [vmem:[%s2124_s1 + $0x3b8] sm:$0xff]  ;;  %v118_v20 = vld [vmem:[%s2124_s1 + $0x230] sm:$0xff]  ;;  %v1263_v21 = vpack.c.bf16 %v149_v14, %v148_v12  ;;  %v136_v27 = vld [vmem:[%s2124_s1 + $0x2c0] sm:$0xff] }
  0x46   :  { %1188 = vmatpush3.bf16.msra.mxu0 %v1187_v46  ;;  %v150_v24 = vld [vmem:[%s2124_s1 + $0x330] sm:$0xff]  ;;  %v151_v25 = vld [vmem:[%s2124_s1 + $0x338] sm:$0xff]  ;;  %v1265_v26 = vpack.c.bf16 %v167_v18, %v166_v17  ;;  %v137_v28 = vld [vmem:[%s2124_s1 + $0x2c8] sm:$0xff] }
  0x47   :  { %1222 = vmatprep.subr.bf16.mxu0 %v1221_v48  ;;  %v45_v29 = vld [vmem:[%s2123_s0 + $0x8] sm:$0xff]  ;;  %v168_v30 = vld [vmem:[%s2124_s1 + $0x3c0] sm:$0xff]  ;;  %v1267_v35 = vpack.c.bf16 %v151_v25, %v150_v24  ;;  %v1237_v36 = vpack.c.bf16 %v137_v28, %v136_v27  ;;  %v138_v44 = vld [vmem:[%s2124_s1 + $0x2d0] sm:$0xff] }
  0x48   :  { %1220 = vmatpush3.bf16.msra.mxu1 %v1219_v47  ;;  %v169_v31 = vld [vmem:[%s2124_s1 + $0x3c8] sm:$0xff]  ;;  %v272_v33 = vcombine.high %v45_v29, %v45_v29  ;;  %v120_v37 = vld [vmem:[%s2124_s1 + $0x240] sm:$0xff]  ;;  %v139_v45 = vld [vmem:[%s2124_s1 + $0x2d8] sm:$0xff] }
  0x49   :  { %1254 = vmatprep.subr.bf16.mxu1 %v1253_v52  ;;  %393 = vmatmul.mubr.f32.vlgmr.msra.gmra.mrb[0].mxu0 %v262_v23  ;;  %v119_v23 = vld [vmem:[%s2124_s1 + $0x238] sm:$0xff]  ;;  %v121_v38 = vld [vmem:[%s2124_s1 + $0x248] sm:$0xff]  ;;  %v152_v39 = vld [vmem:[%s2124_s1 + $0x340] sm:$0xff]  ;;  %v1269_v42 = vpack.c.bf16 %v169_v31, %v168_v30  ;;  %v1241_v51 = vpack.c.bf16 %v139_v45, %v138_v44 }
  0x4a   :  { %1224 = vmatpush3.bf16.msra.mxu0 %v1223_v58  ;;  %v1235_v34 = vpack.c.bf16 %v119_v23, %v118_v20  ;;  %v1803_v41 = vrot.slane %v272_v33, %v1622_v10  ;;  %v153_v43 = vld [vmem:[%s2124_s1 + $0x348] sm:$0xff]  ;;  %v170_v46 = vld [vmem:[%s2124_s1 + $0x3d0] sm:$0xff]  ;;  %v171_v47 = vld [vmem:[%s2124_s1 + $0x3d8] sm:$0xff]  ;;  %v1239_v49 = vpack.c.bf16 %v121_v38, %v120_v37 }
  0x4b   :  { %463 = vmatmul.mubr.f32.vlgmr.msra.gmra.mrb[0].mxu1 %v269_v32  ;;  %1226 = vmatprep.subr.bf16.mxu0 %v1225_v60  ;;  %v1789_v32 = vrot.slane %v45_v29, %v1622_v10  ;;  %v1271_v50 = vpack.c.bf16 %v153_v43, %v152_v39  ;;  %v122_v52 = vld [vmem:[%s2124_s1 + $0x250] sm:$0xff]  ;;  %v123_v53 = vld [vmem:[%s2124_s1 + $0x258] sm:$0xff]  ;;  %v1273_v55 = vpack.c.bf16 %v171_v47, %v170_v46  ;;  %v140_v57 = vld [vmem:[%s2124_s1 + $0x2e0] sm:$0xff] }
  0x4c   :  { %1256 = vmatpush3.bf16.msra.mxu1 %v1255_v59  ;;  %v288_v48 = vcombine.high %v1803_v41, %v1803_v41  ;;  %v154_v54 = vld [vmem:[%s2124_s1 + $0x350] sm:$0xff]  ;;  %v155_v56 = vld [vmem:[%s2124_s1 + $0x358] sm:$0xff]  ;;  %v141_v58 = vld [vmem:[%s2124_s1 + $0x2e8] sm:$0xff]  ;;  %v1243_v61 = vpack.c.bf16 %v123_v53, %v122_v52 }
  0x4d   :  { %1258 = vmatprep.subr.bf16.mxu1 %v1257_v0  ;;  %v287_v40 = vcombine.high %v1789_v32, %v1789_v32  ;;  %v172_v59 = vld [vmem:[%s2124_s1 + $0x3e0] sm:$0xff]  ;;  %v173_v60 = vld [vmem:[%s2124_s1 + $0x3e8] sm:$0xff]  ;;  %v1275_v62 = vpack.c.bf16 %v155_v56, %v154_v54  ;;  %v1245_v63 = vpack.c.bf16 %v141_v58, %v140_v57  ;;  %v142_v5 = vld [vmem:[%s2124_s1 + $0x2f0] sm:$0xff] }
  0x4e   :  { %1228 = vmatpush3.bf16.msra.mxu0 %v1227_v6  ;;  %602 = vmatprep.mubr.f32.mxu1 %v288_v48  ;;  %v124_v0 = vld [vmem:[%s2124_s1 + $0x260] sm:$0xff]  ;;  %v125_v1 = vld [vmem:[%s2124_s1 + $0x268] sm:$0xff]  ;;  %v1277_v3 = vpack.c.bf16 %v173_v60, %v172_v59  ;;  %v143_v6 = vld [vmem:[%s2124_s1 + $0x2f8] sm:$0xff] }
  0x4f   :  { %1230 = vmatprep.subr.bf16.mxu0 %v1229_v8  ;;  %532 = vmatprep.mubr.f32.mxu0 %v287_v40  ;;  %v156_v2 = vld [vmem:[%s2124_s1 + $0x360] sm:$0xff]  ;;  %v157_v4 = vld [vmem:[%s2124_s1 + $0x368] sm:$0xff]  ;;  %v175_v8 = vld [vmem:[%s2124_s1 + $0x3f8] sm:$0xff]  ;;  %v1247_v9 = vpack.c.bf16 %v125_v1, %v124_v0  ;;  %v1249_v12 = vpack.c.bf16 %v143_v6, %v142_v5 }
  0x50   :  { %1260 = vmatpush3.bf16.msra.mxu1 %v1259_v7  ;;  %v174_v7 = vld [vmem:[%s2124_s1 + $0x3f0] sm:$0xff]  ;;  %v1279_v11 = vpack.c.bf16 %v157_v4, %v156_v2  ;;  %v127_v14 = vld [vmem:[%s2124_s1 + $0x278] sm:$0xff]  ;;  %v192_v18 = vld [vmem:[%s2124_s1 + $0x480] sm:$0xff] }
  0x51   :  { %1262 = vmatprep.subr.bf16.mxu1 %v1261_v13  ;;  %v126_v13 = vld [vmem:[%s2124_s1 + $0x270] sm:$0xff]  ;;  %v1281_v16 = vpack.c.bf16 %v175_v8, %v174_v7  ;;  %v159_v17 = vld [vmem:[%s2124_s1 + $0x378] sm:$0xff]  ;;  %v224_v20 = vld [vmem:[%s2124_s1 + $0x580] sm:$0xff] }
  0x52   :  { %1232 = vmatpush3.bf16.msra.mxu0 %v1231_v19  ;;  %v158_v15 = vld [vmem:[%s2124_s1 + $0x370] sm:$0xff]  ;;  %v193_v19 = vld [vmem:[%s2124_s1 + $0x488] sm:$0xff]  ;;  %v176_v23 = vld [vmem:[%s2124_s1 + $0x400] sm:$0xff] }
  0x53   :  { %1234 = vmatprep.subr.bf16.mxu0 %v1233_v22  ;;  %v1251_v22 = vpack.c.bf16 %v127_v14, %v126_v13  ;;  %v1283_v24 = vpack.c.bf16 %v159_v17, %v158_v15  ;;  %v1285_v25 = vpack.c.bf16 %v193_v19, %v192_v18  ;;  %v208_v27 = vld [vmem:[%s2124_s1 + $0x500] sm:$0xff]  ;;  %v209_v28 = vld [vmem:[%s2124_s1 + $0x508] sm:$0xff]  ;;  %v194_v30 = vld [vmem:[%s2124_s1 + $0x490] sm:$0xff] }
  0x54   :  { %1264 = vmatpush3.bf16.msra.mxu1 %v1263_v21  ;;  %v225_v21 = vld [vmem:[%s2124_s1 + $0x588] sm:$0xff]  ;;  %v195_v31 = vld [vmem:[%s2124_s1 + $0x498] sm:$0xff]  ;;  %v226_v33 = vld [vmem:[%s2124_s1 + $0x590] sm:$0xff] }
  0x55   :  { %1266 = vmatprep.subr.bf16.mxu1 %v1265_v26  ;;  %v177_v26 = vld [vmem:[%s2124_s1 + $0x408] sm:$0xff]  ;;  %v1317_v29 = vpack.c.bf16 %v225_v21, %v224_v20  ;;  %v46_v37 = vld [vmem:[%s2123_s0 + $0x10] sm:$0xff]  ;;  %v1289_v38 = vpack.c.bf16 %v195_v31, %v194_v30  ;;  %v179_v40 = vld [vmem:[%s2124_s1 + $0x418] sm:$0xff] }
  0x56   :  { %1236 = vmatpush3.bf16.msra.mxu0 %v1235_v34  ;;  %v227_v34 = vld [vmem:[%s2124_s1 + $0x598] sm:$0xff]  ;;  %v178_v39 = vld [vmem:[%s2124_s1 + $0x410] sm:$0xff]  ;;  %v1931_v43 = vrot.slane %v46_v37, %v1622_v10  ;;  %v289_v44 = vcombine.high %v46_v37, %v46_v37  ;;  %v196_v47 = vld [vmem:[%s2124_s1 + $0x4a0] sm:$0xff] }
  0x57   :  { %1238 = vmatprep.subr.bf16.mxu0 %v1237_v36  ;;  %v1319_v36 = vpack.c.bf16 %v209_v28, %v208_v27  ;;  %v1321_v45 = vpack.c.bf16 %v227_v34, %v226_v33  ;;  %v211_v46 = vld [vmem:[%s2124_s1 + $0x518] sm:$0xff]  ;;  %v197_v48 = vld [vmem:[%s2124_s1 + $0x4a8] sm:$0xff]  ;;  %v1291_v53 = vpack.c.bf16 %v179_v40, %v178_v39  ;;  %v198_v59 = vld [vmem:[%s2124_s1 + $0x4b0] sm:$0xff] }
  0x58   :  { %1268 = vmatpush3.bf16.msra.mxu1 %v1267_v35  ;;  %v1287_v35 = vpack.c.bf16 %v177_v26, %v176_v23  ;;  %v1952_v52 = vrot.slane %v289_v44, %v1622_v10  ;;  %v1293_v54 = vpack.c.bf16 %v197_v48, %v196_v47  ;;  %v181_v56 = vld [vmem:[%s2124_s1 + $0x428] sm:$0xff]  ;;  %v212_v10 = vld [vmem:[%s2124_s1 + $0x520] sm:$0xff]  ;;  %v199_v60 = vld [vmem:[%s2124_s1 + $0x4b8] sm:$0xff] }
  0x59   :  { %1270 = vmatprep.subr.bf16.mxu1 %v1269_v42  ;;  %v210_v42 = vld [vmem:[%s2124_s1 + $0x510] sm:$0xff]  ;;  %v213_v58 = vld [vmem:[%s2124_s1 + $0x528] sm:$0xff]  ;;  %v1297_v1 = vpack.c.bf16 %v199_v60, %v198_v59  ;;  %v215_v6 = vld [vmem:[%s2124_s1 + $0x538] sm:$0xff] }
  0x5a   :  { %1240 = vmatpush3.bf16.msra.mxu0 %v1239_v49  ;;  %v228_v49 = vld [vmem:[%s2124_s1 + $0x5a0] sm:$0xff]  ;;  %v1327_v0 = vpack.c.bf16 %v213_v58, %v212_v10  ;;  %v182_v2 = vld [vmem:[%s2124_s1 + $0x430] sm:$0xff]  ;;  %v201_v8 = vld [vmem:[%s2124_s1 + $0x4c8] sm:$0xff] }
  0x5b   :  { %1242 = vmatprep.subr.bf16.mxu0 %v1241_v51  ;;  %v304_v51 = vcombine.high %v1931_v43, %v1931_v43  ;;  %v214_v4 = vld [vmem:[%s2124_s1 + $0x530] sm:$0xff]  ;;  %v200_v7 = vld [vmem:[%s2124_s1 + $0x4c0] sm:$0xff]  ;;  %v217_v19 = vld [vmem:[%s2124_s1 + $0x548] sm:$0xff] }
  0x5c   :  { %1272 = vmatpush3.bf16.msra.mxu1 %v1271_v50  ;;  %v229_v50 = vld [vmem:[%s2124_s1 + $0x5a8] sm:$0xff]  ;;  %v1331_v13 = vpack.c.bf16 %v215_v6, %v214_v4  ;;  %v1301_v14 = vpack.c.bf16 %v201_v8, %v200_v7  ;;  %v184_v15 = vld [vmem:[%s2124_s1 + $0x440] sm:$0xff]  ;;  %v202_v20 = vld [vmem:[%s2124_s1 + $0x4d0] sm:$0xff] }
  0x5d   :  { %1274 = vmatprep.subr.bf16.mxu1 %v1273_v55  ;;  %v180_v55 = vld [vmem:[%s2124_s1 + $0x420] sm:$0xff]  ;;  %v1325_v57 = vpack.c.bf16 %v229_v50, %v228_v49  ;;  %v203_v21 = vld [vmem:[%s2124_s1 + $0x4d8] sm:$0xff]  ;;  %v186_v27 = vld [vmem:[%s2124_s1 + $0x450] sm:$0xff] }
  0x5e   :  { %1244 = vmatpush3.bf16.msra.mxu0 %v1243_v61  ;;  %v230_v61 = vld [vmem:[%s2124_s1 + $0x5b0] sm:$0xff]  ;;  %v216_v17 = vld [vmem:[%s2124_s1 + $0x540] sm:$0xff]  ;;  %v235_v23 = vld [vmem:[%s2124_s1 + $0x5d8] sm:$0xff]  ;;  %v1305_v26 = vpack.c.bf16 %v203_v21, %v202_v20 }
  0x5f   :  { %1246 = vmatprep.subr.bf16.mxu0 %v1245_v63  ;;  %v1295_v63 = vpack.c.bf16 %v181_v56, %v180_v55  ;;  %v187_v28 = vld [vmem:[%s2124_s1 + $0x458] sm:$0xff]  ;;  %v204_v33 = vld [vmem:[%s2124_s1 + $0x4e0] sm:$0xff]  ;;  %v205_v34 = vld [vmem:[%s2124_s1 + $0x4e8] sm:$0xff] }
  0x60   :  { %1276 = vmatpush3.bf16.msra.mxu1 %v1275_v62  ;;  %v231_v62 = vld [vmem:[%s2124_s1 + $0x5b8] sm:$0xff]  ;;  %v1307_v37 = vpack.c.bf16 %v187_v28, %v186_v27  ;;  %v1309_v39 = vpack.c.bf16 %v205_v34, %v204_v33  ;;  %v188_v40 = vld [vmem:[%s2124_s1 + $0x460] sm:$0xff]  ;;  %v206_v47 = vld [vmem:[%s2124_s1 + $0x4f0] sm:$0xff] }
  0x61   :  { %1278 = vmatprep.subr.bf16.mxu1 %v1277_v3  ;;  %v183_v3 = vld [vmem:[%s2124_s1 + $0x438] sm:$0xff]  ;;  %v1329_v5 = vpack.c.bf16 %v231_v62, %v230_v61  ;;  %v220_v44 = vld [vmem:[%s2124_s1 + $0x560] sm:$0xff]  ;;  %v238_v49 = vld [vmem:[%s2124_s1 + $0x5f0] sm:$0xff]  ;;  %v1421_v62 = vmov 0.0|0.0  }
  0x62   :  { %1248 = vmatpush3.bf16.msra.mxu0 %v1247_v9  ;;  %v232_v9 = vld [vmem:[%s2124_s1 + $0x5c0] sm:$0xff]  ;;  %v219_v31 = vld [vmem:[%s2124_s1 + $0x558] sm:$0xff]  ;;  %v222_v10 = vld [vmem:[%s2124_s1 + $0x570] sm:$0xff] }
  0x63   :  { %1250 = vmatprep.subr.bf16.mxu0 %v1249_v12  ;;  %v1299_v12 = vpack.c.bf16 %v183_v3, %v182_v2  ;;  %v207_v48 = vld [vmem:[%s2124_s1 + $0x4f8] sm:$0xff]  ;;  %v240_v59 = vld [vmem:[%s2124_s1 + $0x600] sm:$0xff]  ;;  %v241_v60 = vld [vmem:[%s2124_s1 + $0x608] sm:$0xff]  ;;  %v1423_v2 = vmov 0.0  }
  0x64   :  { %1280 = vmatpush3.bf16.msra.mxu1 %v1279_v11  ;;  %v233_v11 = vld [vmem:[%s2124_s1 + $0x5c8] sm:$0xff]  ;;  %v239_v50 = vld [vmem:[%s2124_s1 + $0x5f8] sm:$0xff]  ;;  %v1350_v61 = vpack.c.bf16 %v241_v60, %v240_v59 }
  0x65   :  { %1282 = vmatprep.subr.bf16.mxu1 %v1281_v16  ;;  %v185_v16 = vld [vmem:[%s2124_s1 + $0x448] sm:$0xff]  ;;  %v1333_v18 = vpack.c.bf16 %v233_v11, %v232_v9  ;;  %v191_v55 = vld [vmem:[%s2124_s1 + $0x478] sm:$0xff]  ;;  %v1345_v56 = vpack.c.bf16 %v239_v50, %v238_v49  ;;  %v910_v9 = vld [vmem:[#allocation2] ss:$0 sm:$0xff] }
  0x66   :  { %1252 = vmatpush3.bf16.msra.mxu0 %v1251_v22  ;;  %v234_v22 = vld [vmem:[%s2124_s1 + $0x5d0] sm:$0xff]  ;;  %v911_v3 = vld.sshfl [vmem:[%s2123_s0 + $0x18] sm:$0x3 pattern:$0x76325410] }
  0x67   :  { %1286 = vmatprep.subr.bf16.mxu0 %v1285_v25  ;;  %v1335_v25 = vpack.c.bf16 %v217_v19, %v216_v17  ;;  %v1337_v30 = vpack.c.bf16 %v235_v23, %v234_v22  ;;  %v822_v6 = vld [vmem:[%s2126_s3 + $0x18] sm:$0xff] }
  0x68   :  { %1284 = vmatpush3.bf16.msra.mxu1 %v1283_v24  ;;  %v1303_v24 = vpack.c.bf16 %v185_v16, %v184_v15 }
  0x69   :  { %1318 = vmatprep.subr.bf16.mxu1 %v1317_v29  ;;  %533 = vmatmul.mubr.f32.vlgmr.msra.gmra.mrb[2].mxu0 %v1789_v32  ;;  %v1323_v32 = vpack.c.bf16 %v211_v46, %v210_v42  ;;  %v218_v29 = vld [vmem:[%s2124_s1 + $0x550] sm:$0xff]  ;;  %v189_v42 = vld [vmem:[%s2124_s1 + $0x468] sm:$0xff] }
  0x6a   :  { %1288 = vmatpush3.bf16.msra.mxu0 %v1287_v35  ;;  %672 = vmatprep.mubr.f32.mxu0 %v304_v51  ;;  %v236_v35 = vld [vmem:[%s2124_s1 + $0x5e0] sm:$0xff]  ;;  %v221_v46 = vld [vmem:[%s2124_s1 + $0x568] sm:$0xff]  ;;  %v1311_v51 = vpack.c.bf16 %v189_v42, %v188_v40 }
  0x6b   :  { %603 = vmatmul.mubr.f32.vlgmr.msra.gmra.mrb[2].mxu1 %v1803_v41  ;;  %1290 = vmatprep.subr.bf16.mxu0 %v1289_v38  ;;  %v305_v41 = vcombine.high %v1952_v52, %v1952_v52  ;;  %v1339_v38 = vpack.c.bf16 %v219_v31, %v218_v29 }
  0x6c   :  { %1320 = vmatpush3.bf16.msra.mxu1 %v1319_v36  ;;  %v237_v36 = vld [vmem:[%s2124_s1 + $0x5e8] sm:$0xff] }
  0x6d   :  { %1322 = vmatprep.subr.bf16.mxu1 %v1321_v45  ;;  %742 = vmatprep.mubr.f32.mxu1 %v305_v41  ;;  %v1341_v45 = vpack.c.bf16 %v237_v36, %v236_v35  ;;  %v223_v41 = vld [vmem:[%s2124_s1 + $0x578] sm:$0xff] }
  0x6e   :  { %1292 = vmatpush3.bf16.msra.mxu0 %v1291_v53  ;;  %v1343_v53 = vpack.c.bf16 %v221_v46, %v220_v44  ;;  %v1347_v58 = vpack.c.bf16 %v223_v41, %v222_v10 }
  0x6f   :  { %1294 = vmatprep.subr.bf16.mxu0 %v1293_v54  ;;  %v190_v54 = vld [vmem:[%s2124_s1 + $0x470] sm:$0xff] }
  0x70   :  { %1324 = vmatpush3.bf16.msra.mxu1 %v1323_v32  ;;  %v1313_v32 = vpack.c.bf16 %v207_v48, %v206_v47 }
  0x71   :  { %1326 = vmatprep.subr.bf16.mxu1 %v1325_v57  ;;  %v1315_v57 = vpack.c.bf16 %v191_v55, %v190_v54 }
  0x72   :  { %1296 = vmatpush3.bf16.msra.mxu0 %v1295_v63  ;;  %v242_v63 = vld [vmem:[%s2124_s1 + $0x610] sm:$0xff] }
  0x73   :  { %1298 = vmatprep.subr.bf16.mxu0 %v1297_v1 }
  0x74   :  { %1328 = vmatpush3.bf16.msra.mxu1 %v1327_v0  ;;  %v243_v0 = vld [vmem:[%s2124_s1 + $0x618] sm:$0xff] }
  0x75   :  { %1330 = vmatprep.subr.bf16.mxu1 %v1329_v5  ;;  %v1353_v1 = vpack.c.bf16 %v243_v0, %v242_v63  ;;  %v821_v5 = vld [vmem:[%s2126_s3 + $0x10] sm:$0xff] }
  0x76   :  { %1300 = vmatpush3.bf16.msra.mxu0 %v1299_v12  ;;  %v1359_v7 = vpack.c.bf16 %v822_v6, %v821_v5 }
  0x77   :  { %1302 = vmatprep.subr.bf16.mxu0 %v1301_v14 }
  0x78   :  { %1332 = vmatpush3.bf16.msra.mxu1 %v1331_v13 }
  0x79   :  { %1334 = vmatprep.subr.bf16.mxu1 %v1333_v18 }
  0x7a   :  { %1304 = vmatpush3.bf16.msra.mxu0 %v1303_v24 }
  0x7b   :  { %1306 = vmatprep.subr.bf16.mxu0 %v1305_v26 }
  0x7c   :  { %1336 = vmatpush3.bf16.msra.mxu1 %v1335_v25 }
  0x7d   :  { %1338 = vmatprep.subr.bf16.mxu1 %v1337_v30 }
  0x7e   :  { %1308 = vmatpush3.bf16.msra.mxu0 %v1307_v37 }
  0x7f   :  { %1310 = vmatprep.subr.bf16.mxu0 %v1309_v39  ;;  %v913_v39 = vld [vmem:[#allocation4] ss:$0 sm:$0xff] }
  0x80   :  { %1340 = vmatpush3.bf16.msra.mxu1 %v1339_v38 }
  0x81   :  { %1342 = vmatprep.subr.bf16.mxu1 %v1341_v45 }
  0x82   :  { %1312 = vmatpush3.bf16.msra.mxu0 %v1311_v51 }
  0x83   :  { %1314 = vmatprep.subr.bf16.mxu0 %v1313_v32 }
  0x84   :  { %1344 = vmatpush3.bf16.msra.mxu1 %v1343_v53 }
  0x85   :  { %1346 = vmatprep.subr.bf16.mxu1 %v1345_v56 }
  0x86   :  { %1316 = vmatpush3.bf16.msra.mxu0 %v1315_v57 }
  0x87   :  { %1349 = vmatprep.subr.bf16.mxu0 %v1421_v62 }
  0x88   :  { %1348 = vmatpush3.bf16.msra.mxu1 %v1347_v58 }
  0x89   :  { %1355 = vmatprep.subr.bf16.mxu1 %v1421_v62  ;;  %673 = vmatmul.mubr.f32.vlgmr.msra.gmra.mrb[4].mxu0 %v1931_v43  ;;  %v819_v43 = vld [vmem:[%s2126_s3] sm:$0xff] }
  0x8a   :  { %1351 = vmatpush3.bf16.msra.mxu0 %v1350_v61  ;;  %1143 = vmatprep.mubr.msk.f32.mxu0 %vm1422_vm0, %v1423_v2 }
  0x8b   :  { %743 = vmatmul.mubr.f32.vlgmr.msra.gmra.mrb[4].mxu1 %v1952_v52  ;;  %1352 = vmatprep.subr.bf16.mxu0 %v1421_v62  ;;  %v820_v52 = vld [vmem:[%s2126_s3 + $0x8] sm:$0xff] }
  0x8c   :  { %1154 = vmatprep.mubr.msk.f32.mxu1 %vm1422_vm0, %v1423_v2  ;;  %v1356_v4 = vpack.c.bf16 %v820_v52, %v819_v43 }
  0x8e   :  { %1354 = vmatpush3.bf16.msra.mxu0 %v1353_v1  ;;  %1357 = vmatpush3.bf16.msra.mxu1 %v1356_v4 }
  0x8f   :  { %1358 = vmatprep.subr.bf16.mxu1 %v1421_v62 }
  0x91   :  { %1144 = vmatmul.mubr.msk.f32.vlgmr.msra.gmra.mrb[6].mxu0 %vm325_vm1, %v911_v3 }
  0x92   :  { %1360 = vmatpush3.bf16.msra.mxu1 %v1359_v7 }
 0x11c   :  { %v947_v8 = vpop.f32.mrb[0].mxu0 }
 0x11d   :  { %v948_v11 = vpop.f32.mrb[1].mxu0 }
 0x11e   :  { %v982_v12 = vpop.f32.mrb[0].mxu1  ;;  %v949_v13 = vadd.f32 %v948_v11, %v947_v8 }
 0x11f   :  { %v983_v14 = vpop.f32.mrb[1].mxu1 }
 0x120   :  { %v984_v15 = vadd.f32 %v983_v14, %v982_v12  ;;  %v395_v16 = vadd.f32 %v949_v13, %v910_v9 }
 0x122   :  { %v465_v17 = vadd.f32 %v984_v15, %v395_v16 }
 0x13c   :  { %v1017_v18 = vpop.f32.mrb[2].mxu0 }
 0x13d   :  { %v1018_v19 = vpop.f32.mrb[3].mxu0 }
 0x13e   :  { %v1052_v20 = vpop.f32.mrb[2].mxu1  ;;  %v1019_v21 = vadd.f32 %v1018_v19, %v1017_v18 }
 0x13f   :  { %v1053_v22 = vpop.f32.mrb[3].mxu1 }
 0x140   :  { %v1054_v23 = vadd.f32 %v1053_v22, %v1052_v20  ;;  %v535_v24 = vadd.f32 %v1019_v21, %v465_v17 }
 0x142   :  { %v605_v25 = vadd.f32 %v1054_v23, %v535_v24 }
 0x15c   :  { %v1087_v26 = vpop.f32.mrb[4].mxu0 }
 0x15d   :  { %v1088_v27 = vpop.f32.mrb[5].mxu0 }
 0x15e   :  { %v1122_v28 = vpop.f32.mrb[4].mxu1  ;;  %v1089_v29 = vadd.f32 %v1088_v27, %v1087_v26 }
 0x15f   :  { %v1123_v30 = vpop.f32.mrb[5].mxu1 }
 0x160   :  { %v1124_v31 = vadd.f32 %v1123_v30, %v1122_v28  ;;  %v675_v33 = vadd.f32 %v1089_v29, %v605_v25 }
 0x162   :  { %v745_v34 = vadd.f32 %v1124_v31, %v675_v33 }
 0x164   :  { %v814_v35 = vpop.f32.mrb[6].mxu0 }
 0x165   :  { %v815_v36 = vadd.f32 %v814_v35, %v745_v34  ;;  %v1145_v37 = vpop.f32.mrb[7].mxu0 }
 0x167   :  { %v818_v38 = vmax.f32 %v815_v36, 0.0 }
 0x169   :  { %1155 = vmatmul.mubr.msk.f32.vlgmr.msra.gmra.mrb[6].mxu1 %vm325_vm1, %v818_v38 }
 0x23c   :  { %v899_v40 = vpop.f32.mrb[6].mxu1 }
 0x23d   :  { %v900_v42 = vadd.f32 %v913_v39, %v899_v40  ;;  %v1156_v44 = vpop.f32.mrb[7].mxu1 }
 0x23f   :  { %903 = vst [vmem:[%s2128_s5] sm:$0x3] %v900_v42 }
 0x240   :  { %908 = vsyncpa [#allocation3], 1 }
 0x241   :  { %909 = vsyncpa [#allocation5], 1 }

// kernel: actor_critic_forward.2
= control target key start
LH: loop header
LB: loop body
LE: loop exit
PB: predicated region body
PF: predicated region fallthrough
CT: control target
= control target key end

     0   :  { %12 = vsyncpa [#allocation5], 0  ;;  %s4349_s0 = inlined_call_operand.vmem [shape: f32[2,112,576], index: 0, kind: input, shape index: {}]   ;;  %s4350_s1 = inlined_call_operand.vmem [shape: f32[576,128], index: 1, kind: input, shape index: {}]   ;;  %s4351_s2 = inlined_call_operand.hbm [shape: f32[1,128], index: 2, kind: input, shape index: {}]   ;;  %s4352_s3 = inlined_call_operand.vmem [shape: f32[512,64], index: 3, kind: input, shape index: {}]   ;;  %s4353_s4 = inlined_call_operand.hbm [shape: f32[1,64], index: 4, kind: input, shape index: {}]   ;;  %s4354_s5 = inlined_call_operand.vmem [shape: f32[576,32], index: 5, kind: input, shape index: {}]   ;;  %s4355_s6 = inlined_call_operand.hbm [shape: f32[1,32], index: 6, kind: input, shape index: {}]   ;;  %s4356_s7 = inlined_call_operand.vmem [shape: f32[2,72,32], index: 7, kind: output, shape index: {}]  }
   0x1   :  { %13 = vsyncpa [#allocation7], 0  ;;  %s3185_s24 = smov 0  }
   0x2 LB: > { %s3191_s25 = sadd.s32 4294967295, %s3136_s24   ;;  %p2123_p0 = scmp.ge.s32.totalorder %s3136_s24, 1  ;;  %s3136_s24 = sphi %s3185_s24, %s19_s24  }
   0x3   : > { %p202_p1 = scmp.lt.s32.totalorder %s3136_s24, 3  ;;  %p4357_p2 = scmp.eq.s32.totalorder %s3191_s25, 0 }
   0x4   : > { %s3138_s27 = smov [#allocation6]   ;;  %s3139_s29 = smov [#allocation4]  }
   0x5   : > { %p3196_p3 = pnand %p2123_p0, %p202_p1  ;;  %s232_s28 = sshll.u32 %s3138_s27, 4  ;;  %s233_s28 = int_to_ptr.vmem [resolvable:$true] %s232_s28 }
   0x6   : > { %s218_s30 = sshll.u32 %s3139_s29, 4  ;;  %s3140_s8 = smov [#allocation8]   ;;  %s3208_s30 = int_to_ptr.vmem [resolvable:$true] %s218_s30 }
   0x7   : > { %s4359_s26 = scalar_select %p3196_p3, 1, 0 }
   0x8   : > { %p2917_p4 = pneg %p3196_p3  ;;  %s246_s9 = sshll.u32 %s3140_s8, 4  ;;  %s3210_s9 = int_to_ptr.vmem [resolvable:$true] %s246_s9 }
   0x9   : > { %s3038_s13 = scalar_lea.hbm %s4353_s4, 16 }
   0xa   : > { %p3204_p5 = pnand %p4357_p2, %p2917_p4  ;;  %p3039_p6 = scmp.ne.s32.totalorder %s4353_s4, %s3038_s13 }
   0xb   : > { %p3045_p10 = scmp.lt.u32.totalorder %s3038_s13, %s4353_s4 }
   0xc   : > { %p3220_p7 = pneg %p3204_p5 }
   0xe   : > { %p3041_p8 = pnand %p3220_p7, %p3039_p6 }
  0x10   : > { %p3042_p9 = pneg %p3041_p8 }
  0x12   : > { %p3047_p11 = pnand %p3045_p10, %p3042_p9 }
  0x14   : > { %3050 = shalt.err (!%p3047_p11)
}
  0x15   : > { %s3051_s19 = scalar_lea.vmem %s233_s28, 16  ;;  %s3058_s20 = scalar_lea.vmem %s233_s28, 32 }
  0x16   : > { %p3052_p12 = scmp.ne.s32.totalorder %s233_s28, %s3051_s19  ;;  %p3059_p1 = scmp.lt.s32.totalorder %s233_s28, %s233_s28 }
  0x17   : > { %p3060_p4 = scmp.lt.s32.totalorder %s3058_s20, %s3051_s19 }
  0x18   : > { %p3054_p13 = pnand %p3052_p12, %p3220_p7 }
  0x19   : > { %p3061_p2 = por %p3060_p4, %p3059_p1 }
  0x1a   : > { %p3055_p0 = pneg %p3054_p13 }
  0x1c   : > { %p3062_p3 = pnand %p3061_p2, %p3055_p0 }
  0x1e   : > { %3065 = shalt.err (!%p3062_p3)
}
  0x1f   : > { %2923 = dma.hbm_to_vmem [thread:$0]  (!%p3204_p5), %s4353_s4, 16, %s233_s28, [#allocation7]  }
  0x20   : > { %s3066_s29 = scalar_lea.hbm %s4351_s2, 16 }
  0x21   : > { %p3067_p6 = scmp.ne.s32.totalorder %s4351_s2, %s3066_s29  ;;  %p3073_p2 = scmp.lt.u32.totalorder %s3066_s29, %s4351_s2 }
  0x23   : > { %p3069_p8 = pnand %p3067_p6, %p3220_p7 }
  0x25   : > { %p3070_p9 = pneg %p3069_p8 }
  0x27   : > { %p3075_p3 = pnand %p3073_p2, %p3070_p9 }
  0x29   : > { %3078 = shalt.err (!%p3075_p3)
}
  0x2a   : > { %s3079_s28 = scalar_lea.vmem %s3208_s30, 16  ;;  %s3086_s14 = scalar_lea.vmem %s3208_s30, 32 }
  0x2b   : > { %p3080_p10 = scmp.ne.s32.totalorder %s3208_s30, %s3079_s28  ;;  %p3087_p13 = scmp.lt.s32.totalorder %s3208_s30, %s3208_s30 }
  0x2c   : > { %p3088_p0 = scmp.lt.s32.totalorder %s3086_s14, %s3079_s28 }
  0x2d   : > { %p3082_p11 = pnand %p3080_p10, %p3220_p7 }
  0x2e   : > { %p3089_p1 = por %p3088_p0, %p3087_p13 }
  0x2f   : > { %p3083_p12 = pneg %p3082_p11 }
  0x31   : > { %p3090_p4 = pnand %p3089_p1, %p3083_p12 }
  0x33   : > { %3093 = shalt.err (!%p3090_p4)
}
  0x34   : > { %2920 = dma.hbm_to_vmem [thread:$0]  (!%p3204_p5), %s4351_s2, 16, %s3208_s30, [#allocation5]  }
  0x35   : > { %s3094_s20 = scalar_lea.hbm %s4355_s6, 16 }
  0x36   : > { %p3095_p6 = scmp.ne.s32.totalorder %s4355_s6, %s3094_s20  ;;  %p3101_p2 = scmp.lt.u32.totalorder %s3094_s20, %s4355_s6 }
  0x38   : > { %p3097_p8 = pnand %p3095_p6, %p3220_p7 }
  0x3a   : > { %p3098_p9 = pneg %p3097_p8 }
  0x3c   : > { %p3103_p3 = pnand %p3101_p2, %p3098_p9 }
  0x3e   : > { %3106 = shalt.err (!%p3103_p3)
}
  0x3f   : > { %s3107_s30 = scalar_lea.vmem %s3210_s9, 16  ;;  %s3114_s29 = scalar_lea.vmem %s3210_s9, 32 }
  0x40   : > { %p3108_p10 = scmp.ne.s32.totalorder %s3210_s9, %s3107_s30  ;;  %p3115_p13 = scmp.lt.s32.totalorder %s3210_s9, %s3210_s9 }
  0x41   : > { %p3116_p0 = scmp.lt.s32.totalorder %s3114_s29, %s3107_s30 }
  0x42   : > { %p3110_p11 = pnand %p3108_p10, %p3220_p7 }
  0x43   : > { %p3117_p1 = por %p3116_p0, %p3115_p13 }
  0x44   : > { %p3111_p12 = pneg %p3110_p11 }
  0x46   : > { %p3118_p4 = pnand %p3117_p1, %p3111_p12 }
  0x48   : > { %3121 = shalt.err (!%p3118_p4)
}
  0x49   : > { %2926 = dma.hbm_to_vmem [thread:$0]  (!%p3204_p5), %s4355_s6, 16, %s3210_s9, [#allocation7]  }
  0x4a   : > { %p4362_p6 = scmp.ne.s32.totalorder %s4359_s26, 0 }
  0x4b   : > { %p4363_p7 = scmp.eq.s32.totalorder (!%p4362_p6), %s3191_s25, 0 }
  0x4c   : > { %267 = sbr.rel (%p4362_p6) target bundleno = 1051 (0x41b), region = 48 }
  0x53   : > { %3127 = dma.done.wait (%p4363_p7), [#allocation5], 16   ;;  %p4364_p8 = pmov %p4363_p7 }
  0x54   : > { %p4365_p9 = pmov %p4363_p7 }
  0x55   : > { %3129 = vsyncadd (%p4364_p8), [#allocation5], 4294967280 }
  0x56   : > { %3131 = dma.done.wait (%p4365_p9), [#allocation7], 32   ;;  %p4366_p2 = pmov %p4363_p7 }
  0x57   : > { %v403_v0 = vld [vmem:[%s4350_s1 + $0x80] sm:$0xff]  ;;  %v404_v1 = vld [vmem:[%s4350_s1 + $0x88] sm:$0xff]  ;;  %v405_v11 = vld [vmem:[%s4350_s1 + $0x90] sm:$0xff]  ;;  %p307_p5 = scmp.lt.s32.totalorder %s3191_s25, 1  ;;  %vm466_vm0 = vcmask 523264   ;;  %s3142_s9 = smov 64  }
  0x58   : > { %3133 = vsyncadd (%p4366_p2), [#allocation7], 4294967264  ;;  %v387_v2 = vld [vmem:[%s4350_s1] sm:$0xff]  ;;  %v2683_v3 = vpack.c.bf16 %v404_v1, %v403_v0  ;;  %v388_v4 = vld [vmem:[%s4350_s1 + $0x8] sm:$0xff]  ;;  %vm3143_vm1 = vmmov 0   ;;  %vm2025_vm2 = vcmask 261120  }
  0x59   : > { %v435_v5 = vld [vmem:[%s4350_s1 + $0x180] sm:$0xff]  ;;  %v436_v6 = vld [vmem:[%s4350_s1 + $0x188] sm:$0xff]  ;;  %v2685_v7 = vpack.c.bf16 %v388_v4, %v387_v2  ;;  %v406_v13 = vld [vmem:[%s4350_s1 + $0x98] sm:$0xff]  ;;  %s4368_s25 = smov (!%p307_p5, %s3191_s25), 1 }
  0x5a   : > { %v2715_v8 = vpack.c.bf16 %v436_v6, %v435_v5  ;;  %v419_v9 = vld [vmem:[%s4350_s1 + $0x100] sm:$0xff]  ;;  %v420_v10 = vld [vmem:[%s4350_s1 + $0x108] sm:$0xff]  ;;  %2684 = vmatprep.subr.bf16.mxu0 %v2683_v3  ;;  %v389_v14 = vld [vmem:[%s4350_s1 + $0x10] sm:$0xff]  ;;  %v2687_v16 = vpack.c.bf16 %v406_v13, %v405_v11  ;;  %s2903_s23 = smul.u32 560, %s4368_s25 }
  0x5b   : > { %v2717_v12 = vpack.c.bf16 %v420_v10, %v419_v9  ;;  %v390_v15 = vld [vmem:[%s4350_s1 + $0x18] sm:$0xff]  ;;  %2686 = vmatpush3.bf16.msra.mxu0 %v2685_v7  ;;  %v437_v18 = vld [vmem:[%s4350_s1 + $0x190] sm:$0xff]  ;;  %v407_v23 = vld [vmem:[%s4350_s1 + $0xa0] sm:$0xff]  ;;  %s2904_s26 = smul.u32 72, %s4368_s25 }
  0x5c   : > { %2716 = vmatprep.subr.bf16.mxu1 %v2715_v8  ;;  %v2689_v17 = vpack.c.bf16 %v390_v15, %v389_v14  ;;  %v438_v19 = vld [vmem:[%s4350_s1 + $0x198] sm:$0xff]  ;;  %v421_v20 = vld [vmem:[%s4350_s1 + $0x110] sm:$0xff]  ;;  %v408_v24 = vld [vmem:[%s4350_s1 + $0xa8] sm:$0xff]  ;;  %2688 = vmatprep.subr.bf16.mxu0 %v2687_v16  ;;  %s3445_s21 = scalar_lea.vmem %s4349_s0, %s2903_s23 }
  0x5d   : > { %2718 = vmatpush3.bf16.msra.mxu1 %v2717_v12  ;;  %v2719_v21 = vpack.c.bf16 %v438_v19, %v437_v18  ;;  %v422_v22 = vld [vmem:[%s4350_s1 + $0x118] sm:$0xff]  ;;  %v2691_v26 = vpack.c.bf16 %v408_v24, %v407_v23  ;;  %v391_v27 = vld [vmem:[%s4350_s1 + $0x20] sm:$0xff]  ;;  %v392_v28 = vld [vmem:[%s4350_s1 + $0x28] sm:$0xff]  ;;  %s4316_s14 = scalar_lea.vmem %s4356_s7, %s2904_s26 }
  0x5e   : > { %v2721_v25 = vpack.c.bf16 %v422_v22, %v421_v20  ;;  %v439_v29 = vld [vmem:[%s4350_s1 + $0x1a0] sm:$0xff]  ;;  %v440_v30 = vld [vmem:[%s4350_s1 + $0x1a8] sm:$0xff]  ;;  %v2693_v33 = vpack.c.bf16 %v392_v28, %v391_v27  ;;  %v409_v35 = vld [vmem:[%s4350_s1 + $0xb0] sm:$0xff] }
  0x5f   : > { %2720 = vmatprep.subr.bf16.mxu1 %v2719_v21  ;;  %v423_v31 = vld [vmem:[%s4350_s1 + $0x120] sm:$0xff]  ;;  %v424_v32 = vld [vmem:[%s4350_s1 + $0x128] sm:$0xff]  ;;  %2690 = vmatpush3.bf16.msra.mxu0 %v2689_v17  ;;  %v2723_v34 = vpack.c.bf16 %v440_v30, %v439_v29  ;;  %v410_v36 = vld [vmem:[%s4350_s1 + $0xb8] sm:$0xff] }
  0x60   : > { %v393_v37 = vld [vmem:[%s4350_s1 + $0x30] sm:$0xff]  ;;  %2692 = vmatprep.subr.bf16.mxu0 %v2691_v26  ;;  %v2725_v38 = vpack.c.bf16 %v424_v32, %v423_v31  ;;  %v2695_v39 = vpack.c.bf16 %v410_v36, %v409_v35  ;;  %v394_v40 = vld [vmem:[%s4350_s1 + $0x38] sm:$0xff]  ;;  %v411_v46 = vld [vmem:[%s4350_s1 + $0xc0] sm:$0xff] }
  0x61   : > { %2722 = vmatpush3.bf16.msra.mxu1 %v2721_v25  ;;  %v441_v41 = vld [vmem:[%s4350_s1 + $0x1b0] sm:$0xff]  ;;  %v442_v42 = vld [vmem:[%s4350_s1 + $0x1b8] sm:$0xff]  ;;  %v412_v47 = vld [vmem:[%s4350_s1 + $0xc8] sm:$0xff]  ;;  %v2697_v48 = vpack.c.bf16 %v394_v40, %v393_v37 }
  0x62   : > { %2724 = vmatprep.subr.bf16.mxu1 %v2723_v34  ;;  %v2727_v43 = vpack.c.bf16 %v442_v42, %v441_v41  ;;  %v425_v44 = vld [vmem:[%s4350_s1 + $0x130] sm:$0xff]  ;;  %v426_v45 = vld [vmem:[%s4350_s1 + $0x138] sm:$0xff]  ;;  %v443_v49 = vld [vmem:[%s4350_s1 + $0x1c0] sm:$0xff]  ;;  %v2699_v52 = vpack.c.bf16 %v412_v47, %v411_v46 }
  0x63   : > { %2694 = vmatpush3.bf16.msra.mxu0 %v2693_v33  ;;  %v444_v50 = vld [vmem:[%s4350_s1 + $0x1c8] sm:$0xff]  ;;  %v2729_v51 = vpack.c.bf16 %v426_v45, %v425_v44  ;;  %v395_v53 = vld [vmem:[%s4350_s1 + $0x40] sm:$0xff]  ;;  %v413_v58 = vld [vmem:[%s4350_s1 + $0xd0] sm:$0xff] }
  0x64   : > { %2696 = vmatprep.subr.bf16.mxu0 %v2695_v39  ;;  %v396_v54 = vld [vmem:[%s4350_s1 + $0x48] sm:$0xff]  ;;  %v427_v55 = vld [vmem:[%s4350_s1 + $0x140] sm:$0xff]  ;;  %v2731_v56 = vpack.c.bf16 %v444_v50, %v443_v49  ;;  %v414_v59 = vld [vmem:[%s4350_s1 + $0xd8] sm:$0xff] }
  0x65   : > { %2726 = vmatpush3.bf16.msra.mxu1 %v2725_v38  ;;  %v428_v57 = vld [vmem:[%s4350_s1 + $0x148] sm:$0xff]  ;;  %v445_v60 = vld [vmem:[%s4350_s1 + $0x1d0] sm:$0xff]  ;;  %v446_v61 = vld [vmem:[%s4350_s1 + $0x1d8] sm:$0xff]  ;;  %v2701_v62 = vpack.c.bf16 %v396_v54, %v395_v53  ;;  %v2703_v0 = vpack.c.bf16 %v414_v59, %v413_v58 }
  0x66   : > { %2728 = vmatprep.subr.bf16.mxu1 %v2727_v43  ;;  %v2733_v63 = vpack.c.bf16 %v428_v57, %v427_v55  ;;  %v397_v1 = vld [vmem:[%s4350_s1 + $0x50] sm:$0xff]  ;;  %v398_v2 = vld [vmem:[%s4350_s1 + $0x58] sm:$0xff]  ;;  %v2735_v4 = vpack.c.bf16 %v446_v61, %v445_v60  ;;  %v415_v6 = vld [vmem:[%s4350_s1 + $0xe0] sm:$0xff] }
  0x67   : > { %2698 = vmatpush3.bf16.msra.mxu0 %v2697_v48  ;;  %v429_v3 = vld [vmem:[%s4350_s1 + $0x150] sm:$0xff]  ;;  %v430_v5 = vld [vmem:[%s4350_s1 + $0x158] sm:$0xff]  ;;  %v416_v7 = vld [vmem:[%s4350_s1 + $0xe8] sm:$0xff]  ;;  %v2705_v10 = vpack.c.bf16 %v398_v2, %v397_v1 }
  0x68   : > { %2700 = vmatprep.subr.bf16.mxu0 %v2699_v52  ;;  %v447_v8 = vld [vmem:[%s4350_s1 + $0x1e0] sm:$0xff]  ;;  %v448_v9 = vld [vmem:[%s4350_s1 + $0x1e8] sm:$0xff]  ;;  %v2737_v13 = vpack.c.bf16 %v430_v5, %v429_v3  ;;  %v2707_v14 = vpack.c.bf16 %v416_v7, %v415_v6  ;;  %v417_v19 = vld [vmem:[%s4350_s1 + $0xf0] sm:$0xff] }
  0x69   : > { %2730 = vmatpush3.bf16.msra.mxu1 %v2729_v51  ;;  %v399_v11 = vld [vmem:[%s4350_s1 + $0x60] sm:$0xff]  ;;  %v318_v12 = vld [vmem:[%s3445_s21 + $0x8] sm:$0xff]  ;;  %v2739_v18 = vpack.c.bf16 %v448_v9, %v447_v8  ;;  %v418_v20 = vld [vmem:[%s4350_s1 + $0xf8] sm:$0xff] }
  0x6a   : > { %2732 = vmatprep.subr.bf16.mxu1 %v2731_v56  ;;  %v400_v15 = vld [vmem:[%s4350_s1 + $0x68] sm:$0xff]  ;;  %v431_v16 = vld [vmem:[%s4350_s1 + $0x160] sm:$0xff]  ;;  %573 = vmatprep.mubr.f32.mxu0 %v318_v12  ;;  %v320_v21 = vld [vmem:[%s3445_s21 + $0x18] sm:$0xff]  ;;  %v2711_v26 = vpack.c.bf16 %v418_v20, %v417_v19 }
  0x6b   : > { %2702 = vmatpush3.bf16.msra.mxu0 %v2701_v62  ;;  %v432_v17 = vld [vmem:[%s4350_s1 + $0x168] sm:$0xff]  ;;  %v449_v22 = vld [vmem:[%s4350_s1 + $0x1f0] sm:$0xff]  ;;  %v450_v23 = vld [vmem:[%s4350_s1 + $0x1f8] sm:$0xff]  ;;  %708 = vmatprep.mubr.f32.mxu1 %v320_v21  ;;  %v2709_v24 = vpack.c.bf16 %v400_v15, %v399_v11 }
  0x6c   : > { %2704 = vmatprep.subr.bf16.mxu0 %v2703_v0  ;;  %v2741_v25 = vpack.c.bf16 %v432_v17, %v431_v16  ;;  %v401_v27 = vld [vmem:[%s4350_s1 + $0x70] sm:$0xff]  ;;  %v402_v28 = vld [vmem:[%s4350_s1 + $0x78] sm:$0xff]  ;;  %v2743_v30 = vpack.c.bf16 %v450_v23, %v449_v22  ;;  %v451_v32 = vld [vmem:[%s4350_s1 + $0x200] sm:$0xff] }
  0x6d   : > { %2734 = vmatpush3.bf16.msra.mxu1 %v2733_v63  ;;  %v433_v29 = vld [vmem:[%s4350_s1 + $0x170] sm:$0xff]  ;;  %v434_v31 = vld [vmem:[%s4350_s1 + $0x178] sm:$0xff]  ;;  %v452_v33 = vld [vmem:[%s4350_s1 + $0x208] sm:$0xff]  ;;  %v2713_v34 = vpack.c.bf16 %v402_v28, %v401_v27 }
  0x6e   : > { %2736 = vmatprep.subr.bf16.mxu1 %v2735_v4  ;;  %v2745_v35 = vpack.c.bf16 %v434_v31, %v433_v29  ;;  %v2747_v36 = vpack.c.bf16 %v452_v33, %v451_v32  ;;  %v453_v37 = vld [vmem:[%s4350_s1 + $0x210] sm:$0xff]  ;;  %v454_v38 = vld [vmem:[%s4350_s1 + $0x218] sm:$0xff]  ;;  %v317_v39 = vld [vmem:[%s3445_s21] sm:$0xff] }
  0x6f   : > { %2706 = vmatpush3.bf16.msra.mxu0 %v2705_v10  ;;  %v319_v40 = vld [vmem:[%s3445_s21 + $0x10] sm:$0xff]  ;;  %v325_v42 = vld [vmem:[%s3445_s21 + $0x40] sm:$0xff]  ;;  %v2751_v43 = vpack.c.bf16 %v454_v38, %v453_v37  ;;  %v456_v45 = vld [vmem:[%s4350_s1 + $0x228] sm:$0xff] }
  0x70   : > { %2708 = vmatprep.subr.bf16.mxu0 %v2707_v14  ;;  %v323_v41 = vld [vmem:[%s3445_s21 + $0x30] sm:$0xff]  ;;  %v455_v44 = vld [vmem:[%s4350_s1 + $0x220] sm:$0xff]  ;;  %v322_v46 = vld [vmem:[%s3445_s21 + $0x28] sm:$0xff] }
  0x71   : > { %2738 = vmatpush3.bf16.msra.mxu1 %v2737_v13  ;;  %v324_v47 = vld [vmem:[%s3445_s21 + $0x38] sm:$0xff]  ;;  %v330_v49 = vld [vmem:[%s3445_s21 + $0x68] sm:$0xff]  ;;  %v2755_v50 = vpack.c.bf16 %v456_v45, %v455_v44  ;;  %v457_v51 = vld [vmem:[%s4350_s1 + $0x230] sm:$0xff] }
  0x72   : > { %2740 = vmatprep.subr.bf16.mxu1 %v2739_v18  ;;  %v328_v48 = vld [vmem:[%s3445_s21 + $0x58] sm:$0xff]  ;;  %v327_v53 = vld [vmem:[%s3445_s21 + $0x50] sm:$0xff]  ;;  %v329_v54 = vld [vmem:[%s3445_s21 + $0x60] sm:$0xff] }
  0x73   : > { %2710 = vmatpush3.bf16.msra.mxu0 %v2709_v24  ;;  %v458_v52 = vld [vmem:[%s4350_s1 + $0x238] sm:$0xff]  ;;  %v333_v55 = vld [vmem:[%s3445_s21 + $0x80] sm:$0xff]  ;;  %v335_v56 = vld [vmem:[%s3445_s21 + $0x90] sm:$0xff] }
  0x74   : > { %2712 = vmatprep.subr.bf16.mxu0 %v2711_v26  ;;  %v2759_v57 = vpack.c.bf16 %v458_v52, %v457_v51  ;;  %v332_v58 = vld [vmem:[%s3445_s21 + $0x78] sm:$0xff]  ;;  %v334_v59 = vld [vmem:[%s3445_s21 + $0x88] sm:$0xff]  ;;  %v337_v62 = vld [vmem:[%s3445_s21 + $0xa0] sm:$0xff] }
  0x75   : > { %2742 = vmatpush3.bf16.msra.mxu1 %v2741_v25  ;;  %v338_v60 = vld [vmem:[%s3445_s21 + $0xa8] sm:$0xff]  ;;  %v340_v61 = vld [vmem:[%s3445_s21 + $0xb8] sm:$0xff]  ;;  %v339_v63 = vld [vmem:[%s3445_s21 + $0xb0] sm:$0xff] }
  0x76   : > { %2744 = vmatprep.subr.bf16.mxu1 %v2743_v30  ;;  %v343_v0 = vld [vmem:[%s3445_s21 + $0xd0] sm:$0xff]  ;;  %v345_v1 = vld [vmem:[%s3445_s21 + $0xe0] sm:$0xff]  ;;  %v342_v2 = vld [vmem:[%s3445_s21 + $0xc8] sm:$0xff] }
  0x77   : > { %2714 = vmatpush3.bf16.msra.mxu0 %v2713_v34  ;;  %v344_v3 = vld [vmem:[%s3445_s21 + $0xd8] sm:$0xff]  ;;  %v350_v5 = vld [vmem:[%s3445_s21 + $0x108] sm:$0xff]  ;;  %v347_v6 = vld [vmem:[%s3445_s21 + $0xf0] sm:$0xff] }
  0x78   : > { %2748 = vmatprep.subr.bf16.mxu0 %v2747_v36  ;;  %v348_v4 = vld [vmem:[%s3445_s21 + $0xf8] sm:$0xff]  ;;  %v349_v7 = vld [vmem:[%s3445_s21 + $0x100] sm:$0xff]  ;;  %v355_v9 = vld [vmem:[%s3445_s21 + $0x130] sm:$0xff] }
  0x79   : > { %2746 = vmatpush3.bf16.msra.mxu1 %v2745_v35  ;;  %v353_v8 = vld [vmem:[%s3445_s21 + $0x120] sm:$0xff]  ;;  %v352_v10 = vld [vmem:[%s3445_s21 + $0x118] sm:$0xff]  ;;  %v354_v11 = vld [vmem:[%s3445_s21 + $0x128] sm:$0xff] }
  0x7a   : > { %574 = vmatmul.mubr.f32.vlgmr.msra.gmra.mrb[0].mxu0 %v317_v39  ;;  %v358_v12 = vld [vmem:[%s3445_s21 + $0x148] sm:$0xff]  ;;  %v360_v13 = vld [vmem:[%s3445_s21 + $0x158] sm:$0xff]  ;;  %v357_v14 = vld [vmem:[%s3445_s21 + $0x140] sm:$0xff] }
  0x7b   : > { %2750 = vmatpush3.bf16.msra.mxu0 %v2747_v36  ;;  %578 = vmatprep.mubr.f32.mxu0 %v323_v41  ;;  %v359_v15 = vld [vmem:[%s3445_s21 + $0x150] sm:$0xff]  ;;  %v365_v17 = vld [vmem:[%s3445_s21 + $0x180] sm:$0xff]  ;;  %v362_v18 = vld [vmem:[%s3445_s21 + $0x168] sm:$0xff] }
  0x7c   : > { %709 = vmatmul.mubr.f32.vlgmr.msra.gmra.mrb[0].mxu1 %v319_v40  ;;  %2752 = vmatprep.subr.bf16.mxu0 %v2751_v43  ;;  %v363_v16 = vld [vmem:[%s3445_s21 + $0x170] sm:$0xff]  ;;  %v364_v19 = vld [vmem:[%s3445_s21 + $0x178] sm:$0xff]  ;;  %v370_v21 = vld [vmem:[%s3445_s21 + $0x1a8] sm:$0xff] }
  0x7d   : > { %713 = vmatprep.mubr.f32.mxu1 %v325_v42  ;;  %v368_v20 = vld [vmem:[%s3445_s21 + $0x198] sm:$0xff]  ;;  %v367_v22 = vld [vmem:[%s3445_s21 + $0x190] sm:$0xff]  ;;  %v369_v23 = vld [vmem:[%s3445_s21 + $0x1a0] sm:$0xff] }
  0x7e   : > { %579 = vmatmul.mubr.f32.gmra.mrb[2].mxu0 %v322_v46  ;;  %v373_v24 = vld [vmem:[%s3445_s21 + $0x1c0] sm:$0xff]  ;;  %v375_v25 = vld [vmem:[%s3445_s21 + $0x1d0] sm:$0xff]  ;;  %v372_v26 = vld [vmem:[%s3445_s21 + $0x1b8] sm:$0xff] }
  0x7f   : > { %583 = vmatprep.mubr.f32.mxu0 %v328_v48  ;;  %2754 = vmatpush3.bf16.msra.mxu0 %v2751_v43  ;;  %v374_v27 = vld [vmem:[%s3445_s21 + $0x1c8] sm:$0xff]  ;;  %v380_v29 = vld [vmem:[%s3445_s21 + $0x1f8] sm:$0xff]  ;;  %v377_v30 = vld [vmem:[%s3445_s21 + $0x1e0] sm:$0xff] }
  0x80   : > { %714 = vmatmul.mubr.f32.gmra.mrb[2].mxu1 %v324_v47  ;;  %2756 = vmatprep.subr.bf16.mxu0 %v2755_v50  ;;  %v378_v28 = vld [vmem:[%s3445_s21 + $0x1e8] sm:$0xff]  ;;  %v379_v31 = vld [vmem:[%s3445_s21 + $0x1f0] sm:$0xff]  ;;  %v385_v33 = vld [vmem:[%s3445_s21 + $0x220] sm:$0xff] }
  0x81   : > { %718 = vmatprep.mubr.f32.mxu1 %v330_v49  ;;  %v383_v32 = vld [vmem:[%s3445_s21 + $0x210] sm:$0xff]  ;;  %v382_v34 = vld [vmem:[%s3445_s21 + $0x208] sm:$0xff]  ;;  %v384_v35 = vld [vmem:[%s3445_s21 + $0x218] sm:$0xff] }
  0x82   : > { %584 = vmatmul.mubr.f32.gmra.mrb[4].mxu0 %v327_v53  ;;  %v321_v36 = vld [vmem:[%s3445_s21 + $0x20] sm:$0xff]  ;;  %v326_v37 = vld [vmem:[%s3445_s21 + $0x48] sm:$0xff]  ;;  %v331_v38 = vld [vmem:[%s3445_s21 + $0x70] sm:$0xff] }
  0x83   : > { %588 = vmatprep.mubr.f32.mxu0 %v333_v55  ;;  %2758 = vmatpush3.bf16.msra.mxu0 %v2755_v50  ;;  %v336_v39 = vld [vmem:[%s3445_s21 + $0x98] sm:$0xff]  ;;  %v341_v40 = vld [vmem:[%s3445_s21 + $0xc0] sm:$0xff]  ;;  %v346_v41 = vld [vmem:[%s3445_s21 + $0xe8] sm:$0xff] }
  0x84   : > { %719 = vmatmul.mubr.f32.gmra.mrb[4].mxu1 %v329_v54  ;;  %2760 = vmatprep.subr.bf16.mxu0 %v2759_v57  ;;  %v351_v42 = vld [vmem:[%s3445_s21 + $0x110] sm:$0xff]  ;;  %v356_v43 = vld [vmem:[%s3445_s21 + $0x138] sm:$0xff]  ;;  %v361_v44 = vld [vmem:[%s3445_s21 + $0x160] sm:$0xff] }
  0x85   : > { %723 = vmatprep.mubr.f32.mxu1 %v335_v56  ;;  %v366_v45 = vld [vmem:[%s3445_s21 + $0x188] sm:$0xff]  ;;  %v371_v46 = vld [vmem:[%s3445_s21 + $0x1b0] sm:$0xff]  ;;  %v376_v47 = vld [vmem:[%s3445_s21 + $0x1d8] sm:$0xff] }
  0x86   : > { %589 = vmatmul.mubr.f32.gmra.mrb[6].mxu0 %v332_v58  ;;  %v381_v48 = vld [vmem:[%s3445_s21 + $0x200] sm:$0xff]  ;;  %v386_v49 = vld [vmem:[%s3445_s21 + $0x228] sm:$0xff]  ;;  %v1008_v56 = vld [vmem:[%s4352_s3 + $0x90] sm:$0xff] }
  0x87   : > { %593 = vmatprep.mubr.f32.mxu0 %v338_v60  ;;  %2762 = vmatpush3.bf16.msra.mxu0 %v2759_v57  ;;  %v1006_v50 = vld [vmem:[%s4352_s3 + $0x80] sm:$0xff]  ;;  %v1007_v51 = vld [vmem:[%s4352_s3 + $0x88] sm:$0xff]  ;;  %v1009_v57 = vld [vmem:[%s4352_s3 + $0x98] sm:$0xff] }
  0x88   : > { %724 = vmatmul.mubr.f32.gmra.mrb[6].mxu1 %v334_v59  ;;  %v990_v52 = vld [vmem:[%s4352_s3] sm:$0xff]  ;;  %v2763_v53 = vpack.c.bf16 %v1007_v51, %v1006_v50  ;;  %v991_v54 = vld [vmem:[%s4352_s3 + $0x8] sm:$0xff]  ;;  %v2767_v58 = vpack.c.bf16 %v1009_v57, %v1008_v56  ;;  %v992_v59 = vld [vmem:[%s4352_s3 + $0x10] sm:$0xff] }
  0x89   : > { %728 = vmatprep.mubr.f32.mxu1 %v340_v61  ;;  %v2765_v55 = vpack.c.bf16 %v991_v54, %v990_v52  ;;  %v993_v60 = vld [vmem:[%s4352_s3 + $0x18] sm:$0xff]  ;;  %v1018_v52 = vld [vmem:[%s4352_s3 + $0xe0] sm:$0xff]  ;;  %v1048_v54 = vld [vmem:[%s4352_s3 + $0x1d0] sm:$0xff] }
  0x8a   : > { %594 = vmatmul.mubr.f32.gmra.mrb[8].mxu0 %v337_v62  ;;  %2764 = vmatprep.subr.bf16.mxu1 %v2763_v53  ;;  %v2769_v61 = vpack.c.bf16 %v993_v60, %v992_v59  ;;  %v1010_v62 = vld [vmem:[%s4352_s3 + $0xa0] sm:$0xff]  ;;  %v1019_v53 = vld [vmem:[%s4352_s3 + $0xe8] sm:$0xff] }
  0x8b   : > { %598 = vmatprep.mubr.f32.mxu0 %v343_v0  ;;  %2766 = vmatpush3.bf16.msra.mxu1 %v2765_v55  ;;  %v994_v0 = vld [vmem:[%s4352_s3 + $0x20] sm:$0xff]  ;;  %v2787_v55 = vpack.c.bf16 %v1019_v53, %v1018_v52  ;;  %v1003_v57 = vld [vmem:[%s4352_s3 + $0x68] sm:$0xff] }
  0x8c   : > { %729 = vmatmul.mubr.f32.gmra.mrb[8].mxu1 %v339_v63  ;;  %2768 = vmatprep.subr.bf16.mxu1 %v2767_v58  ;;  %v1011_v63 = vld [vmem:[%s4352_s3 + $0xa8] sm:$0xff]  ;;  %v1002_v56 = vld [vmem:[%s4352_s3 + $0x60] sm:$0xff]  ;;  %v1049_v58 = vld [vmem:[%s4352_s3 + $0x1d8] sm:$0xff] }
  0x8d   : > { %733 = vmatprep.mubr.f32.mxu1 %v345_v1  ;;  %v2771_v1 = vpack.c.bf16 %v1011_v63, %v1010_v62  ;;  %v2789_v59 = vpack.c.bf16 %v1003_v57, %v1002_v56  ;;  %v2815_v60 = vpack.c.bf16 %v1049_v58, %v1048_v54  ;;  %v1033_v62 = vld [vmem:[%s4352_s3 + $0x158] sm:$0xff] }
  0x8e   : > { %599 = vmatmul.mubr.f32.gmra.mrb[10].mxu0 %v342_v2  ;;  %v995_v2 = vld [vmem:[%s4352_s3 + $0x28] sm:$0xff] }
  0x8f   : > { %603 = vmatprep.mubr.f32.mxu0 %v348_v4  ;;  %2770 = vmatpush3.bf16.msra.mxu1 %v2769_v61  ;;  %v1012_v4 = vld [vmem:[%s4352_s3 + $0xb0] sm:$0xff] }
  0x90   : > { %734 = vmatmul.mubr.f32.gmra.mrb[10].mxu1 %v344_v3  ;;  %v2773_v3 = vpack.c.bf16 %v995_v2, %v994_v0  ;;  %2772 = vmatprep.subr.bf16.mxu1 %v2771_v1  ;;  %v1032_v61 = vld [vmem:[%s4352_s3 + $0x150] sm:$0xff]  ;;  %v1021_v1 = vld [vmem:[%s4352_s3 + $0xf8] sm:$0xff]  ;;  %v1050_v2 = vld [vmem:[%s4352_s3 + $0x1e0] sm:$0xff] }
  0x91   : > { %738 = vmatprep.mubr.f32.mxu1 %v350_v5  ;;  %v1013_v5 = vld [vmem:[%s4352_s3 + $0xb8] sm:$0xff]  ;;  %v2817_v63 = vpack.c.bf16 %v1033_v62, %v1032_v61  ;;  %v1020_v0 = vld [vmem:[%s4352_s3 + $0xf0] sm:$0xff] }
  0x92   : > { %604 = vmatmul.mubr.f32.gmra.mrb[12].mxu0 %v347_v6  ;;  %v996_v6 = vld [vmem:[%s4352_s3 + $0x30] sm:$0xff] }
  0x93   : > { %608 = vmatprep.mubr.f32.mxu0 %v353_v8  ;;  %2774 = vmatpush3.bf16.msra.mxu1 %v2773_v3  ;;  %v997_v8 = vld [vmem:[%s4352_s3 + $0x38] sm:$0xff]  ;;  %v2791_v3 = vpack.c.bf16 %v1021_v1, %v1020_v0 }
  0x94   : > { %739 = vmatmul.mubr.f32.gmra.mrb[12].mxu1 %v349_v7  ;;  %v2775_v7 = vpack.c.bf16 %v1013_v5, %v1012_v4  ;;  %v1004_v4 = vld [vmem:[%s4352_s3 + $0x70] sm:$0xff]  ;;  %v1005_v5 = vld [vmem:[%s4352_s3 + $0x78] sm:$0xff] }
  0x95   : > { %743 = vmatprep.mubr.f32.mxu1 %v355_v9  ;;  %v1038_v9 = vld [vmem:[%s4352_s3 + $0x180] sm:$0xff] }
  0x96   : > { %609 = vmatmul.mubr.f32.gmra.mrb[14].mxu0 %v352_v10  ;;  %v1039_v10 = vld [vmem:[%s4352_s3 + $0x188] sm:$0xff]  ;;  %2776 = vmatprep.subr.bf16.mxu1 %v2775_v7  ;;  %v2793_v7 = vpack.c.bf16 %v1005_v5, %v1004_v4 }
  0x97   : > { %613 = vmatprep.mubr.f32.mxu0 %v358_v12  ;;  %v2795_v12 = vpack.c.bf16 %v1039_v10, %v1038_v9  ;;  %v1034_v9 = vld [vmem:[%s4352_s3 + $0x160] sm:$0xff]  ;;  %v1035_v10 = vld [vmem:[%s4352_s3 + $0x168] sm:$0xff] }
  0x98   : > { %744 = vmatmul.mubr.f32.gmra.mrb[14].mxu1 %v354_v11  ;;  %v2777_v11 = vpack.c.bf16 %v997_v8, %v996_v6  ;;  %v1051_v6 = vld [vmem:[%s4352_s3 + $0x1e8] sm:$0xff] }
  0x99   : > { %748 = vmatprep.mubr.f32.mxu1 %v360_v13  ;;  %v1022_v13 = vld [vmem:[%s4352_s3 + $0x100] sm:$0xff]  ;;  %2796 = vmatprep.subr.bf16.mxu0 %v2795_v12  ;;  %v2819_v8 = vpack.c.bf16 %v1051_v6, %v1050_v2  ;;  %v1052_v12 = vld [vmem:[%s4352_s3 + $0x1f0] sm:$0xff] }
  0x9a   : > { %614 = vmatmul.mubr.f32.gmra.mrb[16].mxu0 %v357_v14  ;;  %v1023_v14 = vld [vmem:[%s4352_s3 + $0x108] sm:$0xff]  ;;  %2778 = vmatpush3.bf16.msra.mxu1 %v2777_v11  ;;  %v2821_v11 = vpack.c.bf16 %v1035_v10, %v1034_v9 }
  0x9b   : > { %618 = vmatprep.mubr.f32.mxu0 %v363_v16  ;;  %v1040_v16 = vld [vmem:[%s4352_s3 + $0x190] sm:$0xff] }
  0x9c   : > { %749 = vmatmul.mubr.f32.gmra.mrb[16].mxu1 %v359_v15  ;;  %v2797_v15 = vpack.c.bf16 %v1023_v14, %v1022_v13  ;;  %v1053_v13 = vld [vmem:[%s4352_s3 + $0x1f8] sm:$0xff] }
  0x9d   : > { %753 = vmatprep.mubr.f32.mxu1 %v365_v17  ;;  %v1041_v17 = vld [vmem:[%s4352_s3 + $0x198] sm:$0xff]  ;;  %v2823_v14 = vpack.c.bf16 %v1053_v13, %v1052_v12 }
  0x9e   : > { %619 = vmatmul.mubr.f32.gmra.mrb[18].mxu0 %v362_v18  ;;  %v2799_v18 = vpack.c.bf16 %v1041_v17, %v1040_v16  ;;  %v1037_v16 = vld [vmem:[%s4352_s3 + $0x178] sm:$0xff] }
  0x9f   : > { %623 = vmatprep.mubr.f32.mxu0 %v368_v20  ;;  %v1025_v20 = vld [vmem:[%s4352_s3 + $0x118] sm:$0xff] }
  0xa0   : > { %754 = vmatmul.mubr.f32.gmra.mrb[18].mxu1 %v364_v19  ;;  %v1024_v19 = vld [vmem:[%s4352_s3 + $0x110] sm:$0xff] }
  0xa1   : > { %758 = vmatprep.mubr.f32.mxu1 %v370_v21  ;;  %v2801_v21 = vpack.c.bf16 %v1025_v20, %v1024_v19  ;;  %v3798_v19 = vld [vmem:[#allocation4] ss:$0 sm:$0xff] }
  0xa2   : > { %624 = vmatmul.mubr.f32.gmra.mrb[20].mxu0 %v367_v22  ;;  %v1014_v22 = vld [vmem:[%s4352_s3 + $0xc0] sm:$0xff] }
  0xa3   : > { %628 = vmatprep.mubr.f32.mxu0 %v373_v24  ;;  %v998_v24 = vld [vmem:[%s4352_s3 + $0x40] sm:$0xff] }
  0xa4   : > { %759 = vmatmul.mubr.f32.gmra.mrb[20].mxu1 %v369_v23  ;;  %v1015_v23 = vld [vmem:[%s4352_s3 + $0xc8] sm:$0xff] }
  0xa5   : > { %763 = vmatprep.mubr.f32.mxu1 %v375_v25  ;;  %v2779_v25 = vpack.c.bf16 %v1015_v23, %v1014_v22 }
  0xa6   : > { %629 = vmatmul.mubr.f32.gmra.mrb[22].mxu0 %v372_v26  ;;  %v999_v26 = vld [vmem:[%s4352_s3 + $0x48] sm:$0xff] }
  0xa7   : > { %633 = vmatprep.mubr.f32.mxu0 %v378_v28  ;;  %v1043_v28 = vld [vmem:[%s4352_s3 + $0x1a8] sm:$0xff]  ;;  %2780 = vmatprep.subr.bf16.mxu1 %v2779_v25 }
  0xa8   : > { %764 = vmatmul.mubr.f32.gmra.mrb[22].mxu1 %v374_v27  ;;  %v1042_v27 = vld [vmem:[%s4352_s3 + $0x1a0] sm:$0xff] }
  0xa9   : > { %768 = vmatprep.mubr.f32.mxu1 %v380_v29  ;;  %v2781_v29 = vpack.c.bf16 %v999_v26, %v998_v24 }
  0xaa   : > { %634 = vmatmul.mubr.f32.gmra.mrb[24].mxu0 %v377_v30  ;;  %v2803_v30 = vpack.c.bf16 %v1043_v28, %v1042_v27 }
  0xab   : > { %638 = vmatprep.mubr.f32.mxu0 %v383_v32  ;;  %v1027_v32 = vld [vmem:[%s4352_s3 + $0x128] sm:$0xff]  ;;  %2782 = vmatpush3.bf16.msra.mxu1 %v2781_v29 }
  0xac   : > { %769 = vmatmul.mubr.f32.gmra.mrb[24].mxu1 %v379_v31  ;;  %v1026_v31 = vld [vmem:[%s4352_s3 + $0x120] sm:$0xff] }
  0xad   : > { %773 = vmatprep.mubr.f32.mxu1 %v385_v33  ;;  %v2805_v33 = vpack.c.bf16 %v1027_v32, %v1026_v31 }
  0xae   : > { %639 = vmatmul.mubr.f32.gmra.mrb[26].mxu0 %v382_v34  ;;  %v1016_v34 = vld [vmem:[%s4352_s3 + $0xd0] sm:$0xff] }
  0xaf   : > { %2619 = vmatprep.mubr.msk.f32.mxu0 %vm466_vm0, %v321_v36  ;;  %v1044_v36 = vld [vmem:[%s4352_s3 + $0x1b0] sm:$0xff] }
  0xb0   : > { %774 = vmatmul.mubr.f32.gmra.mrb[26].mxu1 %v384_v35  ;;  %v1017_v35 = vld [vmem:[%s4352_s3 + $0xd8] sm:$0xff] }
  0xb2   : > { %2620 = vmatmul.mubr.msk.f32.vlgmr.msra.gmra.mrb[28].mxu0 %vm466_vm0, %v326_v37  ;;  %v2783_v37 = vpack.c.bf16 %v1017_v35, %v1016_v34 }
  0xb3   : > { %2622 = vmatprep.mubr.msk.f32.mxu0 %vm466_vm0, %v331_v38  ;;  %2798 = vmatpush3.bf16.msra.mxu0 %v2797_v15  ;;  %v1045_v38 = vld [vmem:[%s4352_s3 + $0x1b8] sm:$0xff]  ;;  %v1036_v15 = vld [vmem:[%s4352_s3 + $0x170] sm:$0xff] }
  0xb4   : > { %2800 = vmatprep.subr.bf16.mxu0 %v2799_v18  ;;  %2784 = vmatprep.subr.bf16.mxu1 %v2783_v37  ;;  %v2825_v17 = vpack.c.bf16 %v1037_v16, %v1036_v15 }
  0xb6   : > { %2623 = vmatmul.mubr.msk.f32.gmra.mrb[30].mxu0 %vm466_vm0, %v336_v39  ;;  %v1028_v39 = vld [vmem:[%s4352_s3 + $0x130] sm:$0xff] }
  0xb7   : > { %2625 = vmatprep.mubr.msk.f32.mxu0 %vm466_vm0, %v341_v40  ;;  %2802 = vmatpush3.bf16.msra.mxu0 %v2801_v21  ;;  %v1029_v40 = vld [vmem:[%s4352_s3 + $0x138] sm:$0xff] }
  0xb8   : > { %2804 = vmatprep.subr.bf16.mxu0 %v2803_v30 }
  0xba   : > { %2626 = vmatmul.mubr.msk.f32.gmra.mrb[32].mxu0 %vm466_vm0, %v346_v41  ;;  %v2807_v41 = vpack.c.bf16 %v1045_v38, %v1044_v36 }
  0xbb   : > { %2628 = vmatprep.mubr.msk.f32.mxu0 %vm466_vm0, %v351_v42  ;;  %2806 = vmatpush3.bf16.msra.mxu0 %v2805_v33  ;;  %v2809_v42 = vpack.c.bf16 %v1029_v40, %v1028_v39 }
  0xbc   : > { %2808 = vmatprep.subr.bf16.mxu0 %v2807_v41 }
  0xbe   : > { %2629 = vmatmul.mubr.msk.f32.gmra.mrb[34].mxu0 %vm466_vm0, %v356_v43  ;;  %v1000_v43 = vld [vmem:[%s4352_s3 + $0x50] sm:$0xff] }
  0xbf   : > { %2631 = vmatprep.mubr.msk.f32.mxu0 %vm466_vm0, %v361_v44  ;;  %v1001_v44 = vld [vmem:[%s4352_s3 + $0x58] sm:$0xff]  ;;  %2810 = vmatpush3.bf16.msra.mxu0 %v2809_v42 }
  0xc2   : > { %2632 = vmatmul.mubr.msk.f32.gmra.mrb[36].mxu0 %vm466_vm0, %v366_v45  ;;  %v1046_v45 = vld [vmem:[%s4352_s3 + $0x1c0] sm:$0xff] }
  0xc3   : > { %2634 = vmatprep.mubr.msk.f32.mxu0 %vm466_vm0, %v371_v46  ;;  %v2785_v46 = vpack.c.bf16 %v1001_v44, %v1000_v43 }
  0xc5   : > { %2786 = vmatpush3.bf16.msra.mxu1 %v2785_v46 }
  0xc6   : > { %2635 = vmatmul.mubr.msk.f32.gmra.mrb[38].mxu0 %vm466_vm0, %v376_v47  ;;  %v1047_v47 = vld [vmem:[%s4352_s3 + $0x1c8] sm:$0xff]  ;;  %2788 = vmatprep.subr.bf16.mxu1 %v2787_v55 }
  0xc7   : > { %2637 = vmatprep.mubr.msk.f32.mxu0 %vm466_vm0, %v381_v48  ;;  %v1030_v48 = vld [vmem:[%s4352_s3 + $0x140] sm:$0xff]  ;;  %v2811_v50 = vpack.c.bf16 %v1047_v47, %v1046_v45 }
  0xc9   : > { %2812 = vmatprep.subr.bf16.mxu0 %v2811_v50  ;;  %2790 = vmatpush3.bf16.msra.mxu1 %v2789_v59 }
  0xca   : > { %2638 = vmatmul.mubr.msk.f32.gmra.mrb[40].mxu0 %vm466_vm0, %v386_v49  ;;  %v1031_v49 = vld [vmem:[%s4352_s3 + $0x148] sm:$0xff]  ;;  %2792 = vmatprep.subr.bf16.mxu1 %v2791_v3 }
  0xcb   : > { %v2813_v51 = vpack.c.bf16 %v1031_v49, %v1030_v48 }
  0xcd   : > { %2814 = vmatpush3.bf16.msra.mxu0 %v2813_v51  ;;  %2794 = vmatpush3.bf16.msra.mxu1 %v2793_v7 }
  0xce   : > { %2816 = vmatprep.subr.bf16.mxu0 %v2815_v60 }
  0xd1   : > { %2818 = vmatpush3.bf16.msra.mxu0 %v2817_v63 }
  0xd2   : > { %2820 = vmatprep.subr.bf16.mxu0 %v2819_v8 }
  0xd5   : > { %2822 = vmatpush3.bf16.msra.mxu0 %v2821_v11 }
  0xd6   : > { %2824 = vmatprep.subr.bf16.mxu0 %v2823_v14 }
  0xd9   : > { %2826 = vmatpush3.bf16.msra.mxu0 %v2825_v17 }
 0x14d   : > { %v2194_v18 = vpop.f32.mrb[0].mxu0 }
 0x14e   : > { %v2195_v20 = vpop.f32.mrb[1].mxu0 }
 0x14f   : > { %v2268_v21 = vpop.f32.mrb[0].mxu1  ;;  %v2196_v22 = vadd.f32 %v2195_v20, %v2194_v18 }
 0x150   : > { %v2269_v23 = vpop.f32.mrb[1].mxu1 }
 0x151   : > { %v2270_v24 = vadd.f32 %v2269_v23, %v2268_v21  ;;  %v576_v25 = vadd.f32 %v2196_v22, %v3798_v19  ;;  %v2197_v26 = vpop.f32.mrb[2].mxu0 }
 0x152   : > { %v2198_v27 = vpop.f32.mrb[3].mxu0 }
 0x153   : > { %v2271_v28 = vpop.f32.mrb[2].mxu1  ;;  %v2199_v29 = vadd.f32 %v2198_v27, %v2197_v26  ;;  %v3801_v31 = vadd.f32 %v2270_v24, %v576_v25 }
 0x154   : > { %v2272_v30 = vpop.f32.mrb[3].mxu1 }
 0x155   : > { %v2273_v32 = vadd.f32 %v2272_v30, %v2271_v28  ;;  %v581_v33 = vadd.f32 %v2199_v29, %v3798_v19  ;;  %v2200_v34 = vpop.f32.mrb[4].mxu0 }
 0x156   : > { %v2201_v35 = vpop.f32.mrb[5].mxu0 }
 0x157   : > { %v2274_v36 = vpop.f32.mrb[4].mxu1  ;;  %v2202_v37 = vadd.f32 %v2201_v35, %v2200_v34  ;;  %v3804_v39 = vadd.f32 %v2273_v32, %v581_v33 }
 0x158   : > { %v2275_v38 = vpop.f32.mrb[5].mxu1 }
 0x159   : > { %v2276_v40 = vadd.f32 %v2275_v38, %v2274_v36  ;;  %v586_v41 = vadd.f32 %v2202_v37, %v3798_v19  ;;  %v2203_v42 = vpop.f32.mrb[6].mxu0 }
 0x15a   : > { %v2204_v43 = vpop.f32.mrb[7].mxu0 }
 0x15b   : > { %v2277_v44 = vpop.f32.mrb[6].mxu1  ;;  %v2205_v45 = vadd.f32 %v2204_v43, %v2203_v42  ;;  %v3807_v47 = vadd.f32 %v2276_v40, %v586_v41 }
 0x15c   : > { %v2278_v46 = vpop.f32.mrb[7].mxu1 }
 0x15d   : > { %v2279_v48 = vadd.f32 %v2278_v46, %v2277_v44  ;;  %v591_v49 = vadd.f32 %v2205_v45, %v3798_v19  ;;  %v2206_v50 = vpop.f32.mrb[8].mxu0 }
 0x15e   : > { %v2207_v51 = vpop.f32.mrb[9].mxu0 }
 0x15f   : > { %v2280_v52 = vpop.f32.mrb[8].mxu1  ;;  %v2208_v53 = vadd.f32 %v2207_v51, %v2206_v50  ;;  %v3810_v55 = vadd.f32 %v2279_v48, %v591_v49 }
 0x160   : > { %v2281_v54 = vpop.f32.mrb[9].mxu1 }
 0x161   : > { %v2282_v56 = vadd.f32 %v2281_v54, %v2280_v52  ;;  %v596_v57 = vadd.f32 %v2208_v53, %v3798_v19  ;;  %v2209_v58 = vpop.f32.mrb[10].mxu0 }
 0x162   : > { %v2210_v59 = vpop.f32.mrb[11].mxu0 }
 0x163   : > { %v2283_v60 = vpop.f32.mrb[10].mxu1  ;;  %v2211_v61 = vadd.f32 %v2210_v59, %v2209_v58  ;;  %v3813_v63 = vadd.f32 %v2282_v56, %v596_v57 }
 0x164   : > { %v2284_v62 = vpop.f32.mrb[11].mxu1 }
 0x165   : > { %v2285_v0 = vadd.f32 %v2284_v62, %v2283_v60  ;;  %v601_v1 = vadd.f32 %v2211_v61, %v3798_v19  ;;  %v2212_v2 = vpop.f32.mrb[12].mxu0 }
 0x166   : > { %v2213_v3 = vpop.f32.mrb[13].mxu0 }
 0x167   : > { %v2286_v4 = vpop.f32.mrb[12].mxu1  ;;  %v2214_v5 = vadd.f32 %v2213_v3, %v2212_v2  ;;  %v3816_v7 = vadd.f32 %v2285_v0, %v601_v1 }
 0x168   : > { %v2287_v6 = vpop.f32.mrb[13].mxu1 }
 0x169   : > { %v2288_v8 = vadd.f32 %v2287_v6, %v2286_v4  ;;  %v606_v9 = vadd.f32 %v2214_v5, %v3798_v19  ;;  %v2215_v10 = vpop.f32.mrb[14].mxu0 }
 0x16a   : > { %v2216_v11 = vpop.f32.mrb[15].mxu0 }
 0x16b   : > { %v2289_v12 = vpop.f32.mrb[14].mxu1  ;;  %v2217_v13 = vadd.f32 %v2216_v11, %v2215_v10  ;;  %v3819_v15 = vadd.f32 %v2288_v8, %v606_v9 }
 0x16c   : > { %v2290_v14 = vpop.f32.mrb[15].mxu1 }
 0x16d   : > { %v2291_v16 = vadd.f32 %v2290_v14, %v2289_v12  ;;  %v611_v17 = vadd.f32 %v2217_v13, %v3798_v19  ;;  %v2218_v18 = vpop.f32.mrb[16].mxu0 }
 0x16e   : > { %v2219_v20 = vpop.f32.mrb[17].mxu0 }
 0x16f   : > { %v2292_v21 = vpop.f32.mrb[16].mxu1  ;;  %v2220_v22 = vadd.f32 %v2219_v20, %v2218_v18  ;;  %v3822_v24 = vadd.f32 %v2291_v16, %v611_v17 }
 0x170   : > { %v2293_v23 = vpop.f32.mrb[17].mxu1 }
 0x171   : > { %v2294_v25 = vadd.f32 %v2293_v23, %v2292_v21  ;;  %v616_v26 = vadd.f32 %v2220_v22, %v3798_v19  ;;  %v2221_v27 = vpop.f32.mrb[18].mxu0 }
 0x172   : > { %v2222_v28 = vpop.f32.mrb[19].mxu0 }
 0x173   : > { %v2295_v29 = vpop.f32.mrb[18].mxu1  ;;  %v2223_v30 = vadd.f32 %v2222_v28, %v2221_v27  ;;  %v3825_v33 = vadd.f32 %v2294_v25, %v616_v26 }
 0x174   : > { %v2296_v32 = vpop.f32.mrb[19].mxu1 }
 0x175   : > { %v2297_v34 = vadd.f32 %v2296_v32, %v2295_v29  ;;  %v621_v35 = vadd.f32 %v2223_v30, %v3798_v19  ;;  %v2224_v36 = vpop.f32.mrb[20].mxu0 }
 0x176   : > { %v2225_v37 = vpop.f32.mrb[21].mxu0 }
 0x177   : > { %v2298_v38 = vpop.f32.mrb[20].mxu1  ;;  %v2226_v40 = vadd.f32 %v2225_v37, %v2224_v36  ;;  %v3828_v42 = vadd.f32 %v2297_v34, %v621_v35 }
 0x178   : > { %v2299_v41 = vpop.f32.mrb[21].mxu1 }
 0x179   : > { %v2300_v43 = vadd.f32 %v2299_v41, %v2298_v38  ;;  %v626_v44 = vadd.f32 %v2226_v40, %v3798_v19  ;;  %v2227_v45 = vpop.f32.mrb[22].mxu0 }
 0x17a   : > { %v2228_v46 = vpop.f32.mrb[23].mxu0 }
 0x17b   : > { %v2301_v48 = vpop.f32.mrb[22].mxu1  ;;  %v2229_v49 = vadd.f32 %v2228_v46, %v2227_v45  ;;  %v3831_v51 = vadd.f32 %v2300_v43, %v626_v44 }
 0x17c   : > { %v2302_v50 = vpop.f32.mrb[23].mxu1 }
 0x17d   : > { %v2303_v52 = vadd.f32 %v2302_v50, %v2301_v48  ;;  %v631_v53 = vadd.f32 %v2229_v49, %v3798_v19  ;;  %v2230_v54 = vpop.f32.mrb[24].mxu0 }
 0x17e   : > { %v2231_v56 = vpop.f32.mrb[25].mxu0 }
 0x17f   : > { %v2304_v57 = vpop.f32.mrb[24].mxu1  ;;  %v2232_v58 = vadd.f32 %v2231_v56, %v2230_v54  ;;  %v3834_v60 = vadd.f32 %v2303_v52, %v631_v53 }
 0x180   : > { %v2305_v59 = vpop.f32.mrb[25].mxu1 }
 0x181   : > { %v2306_v61 = vadd.f32 %v2305_v59, %v2304_v57  ;;  %v636_v62 = vadd.f32 %v2232_v58, %v3798_v19  ;;  %v2233_v0 = vpop.f32.mrb[26].mxu0 }
 0x182   : > { %v2234_v1 = vpop.f32.mrb[27].mxu0 }
 0x183   : > { %v2307_v2 = vpop.f32.mrb[26].mxu1  ;;  %v2235_v3 = vadd.f32 %v2234_v1, %v2233_v0  ;;  %v3837_v5 = vadd.f32 %v2306_v61, %v636_v62 }
 0x184   : > { %v2308_v4 = vpop.f32.mrb[27].mxu1 }
 0x185   : > { %v2309_v6 = vadd.f32 %v2308_v4, %v2307_v2  ;;  %v641_v8 = vadd.f32 %v2235_v3, %v3798_v19  ;;  %v2621_v9 = vpop.f32.mrb[28].mxu0 }
 0x186   : > { %v851_v10 = vadd.f32 %v2621_v9, %v3804_v39  ;;  %v845_v11 = vpop.f32.mrb[29].mxu0 }
 0x187   : > { %v846_v12 = vadd.f32 %v845_v11, %v3801_v31  ;;  %v3842_v13 = vadd.f32 %v2309_v6, %v641_v8 }
 0x188   : > { %v915_v14 = vmax.f32 %v851_v10, 0.0 }
 0x189   : > { %v914_v16 = vmax.f32 %v846_v12, 0.0  ;;  %v2624_v17 = vpop.f32.mrb[30].mxu0 }
 0x18a   : > { %929 = vst [vmem:[#allocation2 + $0x8] sm:$0xff] %v915_v14  ;;  %v3845_v18 = vadd.f32 %v2624_v17, %v3810_v55  ;;  %v855_v20 = vpop.f32.mrb[31].mxu0 }
 0x18b   : > { %928 = vst [vmem:[#allocation2] sm:$0xff] %v914_v16  ;;  %v856_v21 = vadd.f32 %v855_v20, %v3807_v47 }
 0x18c   : > { %v917_v19 = vmax.f32 %v3845_v18, 0.0 }
 0x18d   : > { %v916_v22 = vmax.f32 %v856_v21, 0.0  ;;  %v2627_v39 = vpop.f32.mrb[32].mxu0 }
 0x18e   : > { %931 = vst [vmem:[#allocation2 + $0x18] sm:$0xff] %v917_v19  ;;  %v3850_v31 = vadd.f32 %v2627_v39, %v3816_v7  ;;  %v865_v23 = vpop.f32.mrb[33].mxu0 }
 0x18f   : > { %930 = vst [vmem:[#allocation2 + $0x10] sm:$0xff] %v916_v22  ;;  %v3853_v25 = vadd.f32 %v865_v23, %v3813_v63  ;;  %v1596_v23 = vld [vmem:[%s4354_s5 + $0x80] sm:$0xff] }
 0x190   : > { %v919_v55 = vmax.f32 %v3850_v31, 0.0 }
 0x191   : > { %v918_v26 = vmax.f32 %v3853_v25, 0.0  ;;  %v2630_v27 = vpop.f32.mrb[34].mxu0  ;;  %v1597_v25 = vld [vmem:[%s4354_s5 + $0x88] sm:$0xff] }
 0x192   : > { %933 = vst [vmem:[#allocation2 + $0x28] sm:$0xff] %v919_v55  ;;  %v3860_v47 = vadd.f32 %v2630_v27, %v3822_v24  ;;  %v875_v28 = vpop.f32.mrb[35].mxu0  ;;  %v954_v29 = vld [vmem:[#allocation2 + $0x1] sm:$0xff] }
 0x193   : > { %932 = vst [vmem:[#allocation2 + $0x20] sm:$0xff] %v918_v26  ;;  %v3865_v7 = vadd.f32 %v875_v28, %v3819_v15  ;;  %1125 = vmatprep.mubr.f32.mxu1 %v954_v29  ;;  %v1581_v27 = vld [vmem:[%s4354_s5 + $0x8] sm:$0xff]  ;;  %v1599_v28 = vld [vmem:[%s4354_s5 + $0x98] sm:$0xff] }
 0x194   : > { %v921_v63 = vmax.f32 %v3860_v47, 0.0  ;;  %1126 = vmatmul.mubr.f32.vlgmr.msra.gmra.mrb[28].mxu1 %v914_v16  ;;  %v1598_v47 = vld [vmem:[%s4354_s5 + $0x90] sm:$0xff] }
 0x195   : > { %v920_v30 = vmax.f32 %v3865_v7, 0.0  ;;  %v2633_v32 = vpop.f32.mrb[36].mxu0  ;;  %v2831_v7 = vpack.c.bf16 %v1599_v28, %v1598_v47 }
 0x196   : > { %935 = vst [vmem:[#allocation2 + $0x38] sm:$0xff] %v921_v63  ;;  %v3872_v24 = vadd.f32 %v2633_v32, %v3828_v42  ;;  %v885_v34 = vpop.f32.mrb[37].mxu0  ;;  %v955_v35 = vld [vmem:[#allocation2 + $0x9] sm:$0xff]  ;;  %v956_v40 = vld [vmem:[#allocation2 + $0x11] sm:$0xff]  ;;  %v1600_v32 = vld [vmem:[%s4354_s5 + $0xa0] sm:$0xff] }
 0x197   : > { %v978_v36 = vld [vmem:[#allocation2 + $0xb] sm:$0xff]  ;;  %934 = vst [vmem:[#allocation2 + $0x30] sm:$0xff] %v920_v30  ;;  %v3877_v15 = vadd.f32 %v885_v34, %v3825_v33  ;;  %1130 = vmatprep.mubr.f32.mxu1 %v955_v35  ;;  %v979_v41 = vld [vmem:[#allocation2 + $0x13] sm:$0xff] }
 0x198   : > { %v966_v37 = vld [vmem:[#allocation2 + $0xa] sm:$0xff]  ;;  %1250 = vmatprep.mubr.f32.mxu0 %v978_v36  ;;  %v923_v38 = vmax.f32 %v3872_v24, 0.0  ;;  %1131 = vmatmul.mubr.f32.gmra.mrb[30].mxu1 %v915_v14  ;;  %v967_v46 = vld [vmem:[#allocation2 + $0x12] sm:$0xff]  ;;  %v1584_v36 = vld [vmem:[%s4354_s5 + $0x20] sm:$0xff] }
 0x199   : > { %1251 = vmatmul.mubr.f32.vlgmr.msra.gmra.mrb[42].mxu0 %v966_v37  ;;  %v922_v42 = vmax.f32 %v3877_v15, 0.0  ;;  %v2636_v43 = vpop.f32.mrb[38].mxu0  ;;  %1135 = vmatprep.mubr.f32.mxu1 %v956_v40  ;;  %v1601_v24 = vld [vmem:[%s4354_s5 + $0xa8] sm:$0xff]  ;;  %v1602_v15 = vld [vmem:[%s4354_s5 + $0xb0] sm:$0xff] }
 0x19a   : > { %1255 = vmatprep.mubr.f32.mxu0 %v979_v41  ;;  %937 = vst [vmem:[#allocation2 + $0x48] sm:$0xff] %v923_v38  ;;  %v3884_v44 = vadd.f32 %v2636_v43, %v3834_v60  ;;  %v895_v33 = vpop.f32.mrb[39].mxu0  ;;  %v957_v49 = vld [vmem:[#allocation2 + $0x19] sm:$0xff]  ;;  %v958_v59 = vld [vmem:[#allocation2 + $0x21] sm:$0xff]  ;;  %v2835_v35 = vpack.c.bf16 %v1601_v24, %v1600_v32 }
 0x19b   : > { %936 = vst [vmem:[#allocation2 + $0x40] sm:$0xff] %v922_v42  ;;  %v3889_v45 = vadd.f32 %v895_v33, %v3831_v51  ;;  %v980_v50 = vld [vmem:[#allocation2 + $0x1b] sm:$0xff]  ;;  %v981_v60 = vld [vmem:[#allocation2 + $0x23] sm:$0xff]  ;;  %v1586_v33 = vld [vmem:[%s4354_s5 + $0x30] sm:$0xff] }
 0x19c   : > { %v925_v48 = vmax.f32 %v3884_v44, 0.0  ;;  %1136 = vmatmul.mubr.f32.gmra.mrb[32].mxu1 %v916_v22  ;;  %v968_v57 = vld [vmem:[#allocation2 + $0x1a] sm:$0xff]  ;;  %v969_v62 = vld [vmem:[#allocation2 + $0x22] sm:$0xff] }
 0x19d   : > { %1256 = vmatmul.mubr.f32.gmra.mrb[44].mxu0 %v967_v46  ;;  %v924_v52 = vmax.f32 %v3889_v45, 0.0  ;;  %v2639_v53 = vpop.f32.mrb[40].mxu0  ;;  %1140 = vmatprep.mubr.f32.mxu1 %v957_v49  ;;  %v1585_v37 = vld [vmem:[%s4354_s5 + $0x28] sm:$0xff]  ;;  %v1628_v41 = vld [vmem:[%s4354_s5 + $0x180] sm:$0xff]  ;;  %v1587_v45 = vld [vmem:[%s4354_s5 + $0x38] sm:$0xff] }
 0x19e   : > { %1260 = vmatprep.mubr.f32.mxu0 %v980_v50  ;;  %939 = vst [vmem:[#allocation2 + $0x58] sm:$0xff] %v925_v48  ;;  %v911_v54 = vadd.f32 %v2639_v53, %v3842_v13  ;;  %v905_v56 = vpop.f32.mrb[41].mxu0  ;;  %v959_v0 = vld [vmem:[#allocation2 + $0x29] sm:$0xff]  ;;  %v960_v3 = vld [vmem:[#allocation2 + $0x31] sm:$0xff]  ;;  %v2837_v40 = vpack.c.bf16 %v1585_v37, %v1584_v36  ;;  %v1612_v43 = vld [vmem:[%s4354_s5 + $0x100] sm:$0xff] }
 0x19f   : > { %938 = vst [vmem:[#allocation2 + $0x50] sm:$0xff] %v924_v52  ;;  %v906_v51 = vadd.f32 %v905_v56, %v3837_v5  ;;  %v982_v1 = vld [vmem:[#allocation2 + $0x2b] sm:$0xff]  ;;  %v983_v4 = vld [vmem:[#allocation2 + $0x33] sm:$0xff]  ;;  %v1604_v49 = vld [vmem:[%s4354_s5 + $0xc0] sm:$0xff] }
 0x1a0   : > { %v927_v58 = vmax.f32 %v911_v54, 0.0  ;;  %1141 = vmatmul.mubr.f32.gmra.mrb[34].mxu1 %v917_v19  ;;  %v970_v2 = vld [vmem:[#allocation2 + $0x2a] sm:$0xff]  ;;  %v971_v5 = vld [vmem:[#allocation2 + $0x32] sm:$0xff] }
 0x1a1   : > { %1261 = vmatmul.mubr.f32.gmra.mrb[46].mxu0 %v968_v57  ;;  %v926_v61 = vmax.f32 %v906_v51, 0.0  ;;  %1145 = vmatprep.mubr.f32.mxu1 %v958_v59  ;;  %v1605_v50 = vld [vmem:[%s4354_s5 + $0xc8] sm:$0xff]  ;;  %v1630_v53 = vld [vmem:[%s4354_s5 + $0x190] sm:$0xff]  ;;  %v1631_v54 = vld [vmem:[%s4354_s5 + $0x198] sm:$0xff]  ;;  %v2841_v57 = vpack.c.bf16 %v1587_v45, %v1586_v33 }
 0x1a2   : > { %1265 = vmatprep.mubr.f32.mxu0 %v981_v60  ;;  %941 = vst [vmem:[#allocation2 + $0x68] sm:$0xff] %v927_v58  ;;  %v961_v6 = vld [vmem:[#allocation2 + $0x39] sm:$0xff]  ;;  %v962_v10 = vld [vmem:[#allocation2 + $0x41] sm:$0xff]  ;;  %v1614_v56 = vld [vmem:[%s4354_s5 + $0x110] sm:$0xff]  ;;  %v2863_v58 = vpack.c.bf16 %v1631_v54, %v1630_v53  ;;  %v2843_v60 = vpack.c.bf16 %v1605_v50, %v1604_v49 }
 0x1a3   : > { %940 = vst [vmem:[#allocation2 + $0x60] sm:$0xff] %v926_v61  ;;  %v984_v8 = vld [vmem:[#allocation2 + $0x3b] sm:$0xff]  ;;  %v985_v11 = vld [vmem:[#allocation2 + $0x43] sm:$0xff]  ;;  %v1594_v45 = vld [vmem:[%s4354_s5 + $0x70] sm:$0xff] }
 0x1a4   : > { %1146 = vmatmul.mubr.f32.gmra.mrb[36].mxu1 %v918_v26  ;;  %v972_v9 = vld [vmem:[#allocation2 + $0x3a] sm:$0xff]  ;;  %v973_v12 = vld [vmem:[#allocation2 + $0x42] sm:$0xff]  ;;  %v2827_v26 = vpack.c.bf16 %v1597_v25, %v1596_v23 }
 0x1a5   : > { %1266 = vmatmul.mubr.f32.gmra.mrb[48].mxu0 %v969_v62  ;;  %1150 = vmatprep.mubr.f32.mxu1 %v959_v0  ;;  %v1615_v51 = vld [vmem:[%s4354_s5 + $0x118] sm:$0xff]  ;;  %v1588_v61 = vld [vmem:[%s4354_s5 + $0x40] sm:$0xff]  ;;  %v1589_v62 = vld [vmem:[%s4354_s5 + $0x48] sm:$0xff] }
 0x1a6   : > { %1270 = vmatprep.mubr.f32.mxu0 %v982_v1  ;;  %v963_v13 = vld [vmem:[#allocation2 + $0x49] sm:$0xff]  ;;  %v964_v17 = vld [vmem:[#allocation2 + $0x51] sm:$0xff]  ;;  %2828 = vmatprep.subr.bf16.mxu1 %v2827_v26  ;;  %v2865_v59 = vpack.c.bf16 %v1615_v51, %v1614_v56  ;;  %v1632_v53 = vld [vmem:[%s4354_s5 + $0x1a0] sm:$0xff] }
 0x1a7   : > { %v986_v14 = vld [vmem:[#allocation2 + $0x4b] sm:$0xff]  ;;  %v987_v18 = vld [vmem:[#allocation2 + $0x53] sm:$0xff]  ;;  %v1616_v56 = vld [vmem:[%s4354_s5 + $0x120] sm:$0xff] }
 0x1a8   : > { %1151 = vmatmul.mubr.f32.gmra.mrb[38].mxu1 %v919_v55  ;;  %v974_v16 = vld [vmem:[#allocation2 + $0x4a] sm:$0xff]  ;;  %v975_v20 = vld [vmem:[#allocation2 + $0x52] sm:$0xff]  ;;  %v1580_v55 = vld [vmem:[%s4354_s5] sm:$0xff] }
 0x1a9   : > { %1271 = vmatmul.mubr.f32.gmra.mrb[50].mxu0 %v970_v2  ;;  %1155 = vmatprep.mubr.f32.mxu1 %v960_v3  ;;  %v2829_v29 = vpack.c.bf16 %v1581_v27, %v1580_v55  ;;  %v1606_v0 = vld [vmem:[%s4354_s5 + $0xd0] sm:$0xff]  ;;  %v1607_v1 = vld [vmem:[%s4354_s5 + $0xd8] sm:$0xff]  ;;  %v2845_v2 = vpack.c.bf16 %v1589_v62, %v1588_v61  ;;  %v1633_v54 = vld [vmem:[%s4354_s5 + $0x1a8] sm:$0xff] }
 0x1aa   : > { %1275 = vmatprep.mubr.f32.mxu0 %v983_v4  ;;  %v965_v21 = vld [vmem:[#allocation2 + $0x59] sm:$0xff]  ;;  %v989_v39 = vld [vmem:[#allocation2 + $0x63] sm:$0xff]  ;;  %v2847_v3 = vpack.c.bf16 %v1607_v1, %v1606_v0  ;;  %v1590_v4 = vld [vmem:[%s4354_s5 + $0x50] sm:$0xff] }
 0x1ab   : > { %v988_v19 = vld [vmem:[#allocation2 + $0x5b] sm:$0xff]  ;;  %2830 = vmatpush3.bf16.msra.mxu1 %v2829_v29 }
 0x1ac   : > { %1156 = vmatmul.mubr.f32.gmra.mrb[40].mxu1 %v920_v30  ;;  %v976_v22 = vld [vmem:[#allocation2 + $0x5a] sm:$0xff]  ;;  %v977_v31 = vld [vmem:[#allocation2 + $0x62] sm:$0xff]  ;;  %2832 = vmatprep.subr.bf16.mxu1 %v2831_v7 }
 0x1ad   : > { %1276 = vmatmul.mubr.f32.gmra.mrb[52].mxu0 %v971_v5  ;;  %1160 = vmatprep.mubr.f32.mxu1 %v961_v6  ;;  %v1583_v30 = vld [vmem:[%s4354_s5 + $0x18] sm:$0xff]  ;;  %v1608_v6 = vld [vmem:[%s4354_s5 + $0xe0] sm:$0xff] }
 0x1ae   : > { %1280 = vmatprep.mubr.f32.mxu0 %v984_v8  ;;  %v1591_v5 = vld [vmem:[%s4354_s5 + $0x58] sm:$0xff]  ;;  %v1609_v8 = vld [vmem:[%s4354_s5 + $0xe8] sm:$0xff] }
 0x1b0   : > { %1161 = vmatmul.mubr.f32.gmra.mrb[42].mxu1 %v921_v63  ;;  %v1582_v63 = vld [vmem:[%s4354_s5 + $0x10] sm:$0xff] }
 0x1b1   : > { %1281 = vmatmul.mubr.f32.gmra.mrb[54].mxu0 %v972_v9  ;;  %1165 = vmatprep.mubr.f32.mxu1 %v962_v10  ;;  %v2833_v34 = vpack.c.bf16 %v1583_v30, %v1582_v63  ;;  %v2849_v9 = vpack.c.bf16 %v1591_v5, %v1590_v4  ;;  %v2851_v10 = vpack.c.bf16 %v1609_v8, %v1608_v6  ;;  %v1634_v5 = vld [vmem:[%s4354_s5 + $0x1b0] sm:$0xff]  ;;  %v1635_v6 = vld [vmem:[%s4354_s5 + $0x1b8] sm:$0xff] }
 0x1b2   : > { %1285 = vmatprep.mubr.f32.mxu0 %v985_v11  ;;  %v1592_v11 = vld [vmem:[%s4354_s5 + $0x60] sm:$0xff] }
 0x1b3   : > { %2834 = vmatpush3.bf16.msra.mxu1 %v2833_v34 }
 0x1b4   : > { %1166 = vmatmul.mubr.f32.gmra.mrb[44].mxu1 %v922_v42  ;;  %v1629_v42 = vld [vmem:[%s4354_s5 + $0x188] sm:$0xff]  ;;  %2836 = vmatprep.subr.bf16.mxu1 %v2835_v35 }
 0x1b5   : > { %1286 = vmatmul.mubr.f32.gmra.mrb[56].mxu0 %v973_v12  ;;  %1170 = vmatprep.mubr.f32.mxu1 %v963_v13  ;;  %v2859_v46 = vpack.c.bf16 %v1629_v42, %v1628_v41  ;;  %v1593_v12 = vld [vmem:[%s4354_s5 + $0x68] sm:$0xff]  ;;  %v1610_v13 = vld [vmem:[%s4354_s5 + $0xf0] sm:$0xff] }
 0x1b6   : > { %1290 = vmatprep.mubr.f32.mxu0 %v986_v14  ;;  %v1611_v14 = vld [vmem:[%s4354_s5 + $0xf8] sm:$0xff] }
 0x1b7   : > { %2860 = vmatprep.subr.bf16.mxu0 %v2859_v46  ;;  %2838 = vmatpush3.bf16.msra.mxu1 %v2837_v40  ;;  %v1595_v46 = vld [vmem:[%s4354_s5 + $0x78] sm:$0xff] }
 0x1b8   : > { %1171 = vmatmul.mubr.f32.gmra.mrb[46].mxu1 %v923_v38  ;;  %v1603_v38 = vld [vmem:[%s4354_s5 + $0xb8] sm:$0xff] }
 0x1b9   : > { %1291 = vmatmul.mubr.f32.gmra.mrb[58].mxu0 %v974_v16  ;;  %1175 = vmatprep.mubr.f32.mxu1 %v964_v17  ;;  %v2839_v44 = vpack.c.bf16 %v1603_v38, %v1602_v15  ;;  %v2853_v16 = vpack.c.bf16 %v1593_v12, %v1592_v11  ;;  %v2855_v17 = vpack.c.bf16 %v1611_v14, %v1610_v13  ;;  %v3141_v11 = vmov 0.0|0.0   ;;  %v1618_v13 = vld [vmem:[%s4354_s5 + $0x130] sm:$0xff]  ;;  %v1619_v14 = vld [vmem:[%s4354_s5 + $0x138] sm:$0xff] }
 0x1ba   : > { %1295 = vmatprep.mubr.f32.mxu0 %v987_v18  ;;  %v2871_v12 = vpack.c.bf16 %v1635_v6, %v1634_v5 }
 0x1bb   : > { %2840 = vmatprep.subr.bf16.mxu1 %v2839_v44 }
 0x1bc   : > { %1176 = vmatmul.mubr.f32.gmra.mrb[48].mxu1 %v924_v52 }
 0x1bd   : > { %1296 = vmatmul.mubr.f32.gmra.mrb[60].mxu0 %v975_v20  ;;  %1180 = vmatprep.mubr.f32.mxu1 %v965_v21 }
 0x1be   : > { %1300 = vmatprep.mubr.f32.mxu0 %v988_v19  ;;  %2842 = vmatpush3.bf16.msra.mxu1 %v2841_v57  ;;  %v4025_v19 = vld [vmem:[#allocation6] ss:$0 sm:$0xff] }
 0x1bf   : > { %2844 = vmatprep.subr.bf16.mxu1 %v2843_v60  ;;  %v1617_v60 = vld [vmem:[%s4354_s5 + $0x128] sm:$0xff] }
 0x1c0   : > { %1181 = vmatmul.mubr.f32.gmra.mrb[50].mxu1 %v925_v48  ;;  %v1613_v48 = vld [vmem:[%s4354_s5 + $0x108] sm:$0xff]  ;;  %v2869_v61 = vpack.c.bf16 %v1617_v60, %v1616_v56  ;;  %v1639_v56 = vld [vmem:[%s4354_s5 + $0x1d8] sm:$0xff] }
 0x1c1   : > { %1301 = vmatmul.mubr.f32.gmra.mrb[62].mxu0 %v976_v22  ;;  %v2861_v52 = vpack.c.bf16 %v1613_v48, %v1612_v43 }
 0x1c2   : > { %1305 = vmatprep.mubr.f32.mxu0 %v989_v39  ;;  %2846 = vmatpush3.bf16.msra.mxu1 %v2845_v2 }
 0x1c3   : > { %2862 = vmatpush3.bf16.msra.mxu0 %v2861_v52  ;;  %2848 = vmatprep.subr.bf16.mxu1 %v2847_v3  ;;  %v2857_v52 = vpack.c.bf16 %v1595_v46, %v1594_v45 }
 0x1c4   : > { %2864 = vmatprep.subr.bf16.mxu0 %v2863_v58 }
 0x1c5   : > { %1306 = vmatmul.mubr.f32.gmra.mrb[64].mxu0 %v977_v31 }
 0x1c6   : > { %2850 = vmatpush3.bf16.msra.mxu1 %v2849_v9 }
 0x1c7   : > { %2866 = vmatpush3.bf16.msra.mxu0 %v2865_v59  ;;  %2852 = vmatprep.subr.bf16.mxu1 %v2851_v10  ;;  %v2867_v59 = vpack.c.bf16 %v1633_v54, %v1632_v53 }
 0x1c9   : > { %2868 = vmatprep.subr.bf16.mxu0 %v2867_v59 }
 0x1ca   : > { %2854 = vmatpush3.bf16.msra.mxu1 %v2853_v16  ;;  %v2873_v16 = vpack.c.bf16 %v1619_v14, %v1618_v13 }
 0x1cb   : > { %2856 = vmatprep.subr.bf16.mxu1 %v2855_v17  ;;  %2870 = vmatpush3.bf16.msra.mxu0 %v2869_v61 }
 0x1cc   : > { %2872 = vmatprep.subr.bf16.mxu0 %v2871_v12 }
 0x1ce   : > { %2858 = vmatpush3.bf16.msra.mxu1 %v2857_v52 }
 0x1cf   : > { %2891 = vmatprep.subr.bf16.mxu1 %v3141_v11  ;;  %2874 = vmatpush3.bf16.msra.mxu0 %v2873_v16 }
 0x267   : > { %v2364_v18 = vpop.f32.mrb[28].mxu1 }
 0x268   : > { %v2365_v20 = vpop.f32.mrb[29].mxu1 }
 0x269   : > { %v2366_v21 = vadd.f32 %v2365_v20, %v2364_v18 }
 0x26b   : > { %v2367_v22 = vpop.f32.mrb[30].mxu1  ;;  %v1128_v25 = vadd.f32 %v2366_v21, %v4025_v19 }
 0x26c   : > { %v2432_v39 = vpop.f32.mrb[42].mxu0  ;;  %v2368_v31 = vpop.f32.mrb[31].mxu1 }
 0x26d   : > { %v2433_v23 = vpop.f32.mrb[43].mxu0  ;;  %v2369_v55 = vadd.f32 %v2368_v31, %v2367_v22 }
 0x26e   : > { %v2434_v26 = vadd.f32 %v2433_v23, %v2432_v39 }
 0x26f   : > { %v2370_v47 = vpop.f32.mrb[32].mxu1  ;;  %v1133_v63 = vadd.f32 %v2369_v55, %v4025_v19 }
 0x270   : > { %v1253_v27 = vadd.f32 %v2434_v26, %v1128_v25  ;;  %v2435_v28 = vpop.f32.mrb[44].mxu0  ;;  %v2371_v29 = vpop.f32.mrb[33].mxu1 }
 0x271   : > { %v2436_v7 = vpop.f32.mrb[45].mxu0  ;;  %v2372_v32 = vadd.f32 %v2371_v29, %v2370_v47 }
 0x272   : > { %v1311_v30 = vmax.f32 %v1253_v27, 0.0  ;;  %v2437_v24 = vadd.f32 %v2436_v7, %v2435_v28 }
 0x273   : > { %v2373_v35 = vpop.f32.mrb[34].mxu1  ;;  %v1138_v38 = vadd.f32 %v2372_v32, %v4025_v19  ;;  %v1636_v32 = vld [vmem:[%s4354_s5 + $0x1c0] sm:$0xff] }
 0x274   : > { %1323 = vst.msk [vmem:[#allocation3] sm:$0xff] %vm466_vm0, %v1311_v30  ;;  %v1258_v34 = vadd.f32 %v2437_v24, %v1133_v63  ;;  %v2438_v36 = vpop.f32.mrb[46].mxu0  ;;  %v2374_v37 = vpop.f32.mrb[35].mxu1  ;;  %v1637_v24 = vld [vmem:[%s4354_s5 + $0x1c8] sm:$0xff] }
 0x275   : > { %v2439_v15 = vpop.f32.mrb[47].mxu0  ;;  %v2375_v41 = vadd.f32 %v2374_v37, %v2373_v35 }
 0x276   : > { %v1312_v40 = vmax.f32 %v1258_v34, 0.0  ;;  %v2440_v42 = vadd.f32 %v2439_v15, %v2438_v36  ;;  %v1620_v34 = vld [vmem:[%s4354_s5 + $0x140] sm:$0xff]  ;;  %v2875_v15 = vpack.c.bf16 %v1637_v24, %v1636_v32 }
 0x277   : > { %v2376_v44 = vpop.f32.mrb[36].mxu1  ;;  %v1143_v48 = vadd.f32 %v2375_v41, %v4025_v19 }
 0x278   : > { %1324 = vst.msk [vmem:[#allocation3 + $0x8] sm:$0xff] %vm466_vm0, %v1312_v40  ;;  %v1263_v43 = vadd.f32 %v2440_v42, %v1138_v38  ;;  %v2441_v33 = vpop.f32.mrb[48].mxu0  ;;  %v2377_v49 = vpop.f32.mrb[37].mxu1  ;;  %v1621_v38 = vld [vmem:[%s4354_s5 + $0x148] sm:$0xff]  ;;  %2876 = vmatprep.subr.bf16.mxu0 %v2875_v15  ;;  %v1643_v15 = vld [vmem:[%s4354_s5 + $0x1f8] sm:$0xff] }
 0x279   : > { %v2442_v50 = vpop.f32.mrb[49].mxu0  ;;  %v2378_v57 = vadd.f32 %v2377_v49, %v2376_v44  ;;  %v2877_v42 = vpack.c.bf16 %v1621_v38, %v1620_v34  ;;  %v1638_v49 = vld [vmem:[%s4354_s5 + $0x1d0] sm:$0xff] }
 0x27a   : > { %v1313_v51 = vmax.f32 %v1263_v43, 0.0  ;;  %v2443_v58 = vadd.f32 %v2442_v50, %v2441_v33  ;;  %v2879_v60 = vpack.c.bf16 %v1639_v56, %v1638_v49  ;;  %v1626_v38 = vld [vmem:[%s4354_s5 + $0x170] sm:$0xff] }
 0x27b   : > { %v2379_v0 = vpop.f32.mrb[38].mxu1  ;;  %v1148_v2 = vadd.f32 %v2378_v57, %v4025_v19  ;;  %2878 = vmatpush3.bf16.msra.mxu0 %v2877_v42  ;;  %v1623_v57 = vld [vmem:[%s4354_s5 + $0x158] sm:$0xff] }
 0x27c   : > { %1325 = vst.msk [vmem:[#allocation3 + $0x10] sm:$0xff] %vm466_vm0, %v1313_v51  ;;  %v1268_v62 = vadd.f32 %v2443_v58, %v1143_v48  ;;  %v2444_v1 = vpop.f32.mrb[50].mxu0  ;;  %v2380_v3 = vpop.f32.mrb[39].mxu1  ;;  %v1622_v51 = vld [vmem:[%s4354_s5 + $0x150] sm:$0xff]  ;;  %2880 = vmatprep.subr.bf16.mxu0 %v2879_v60 }
 0x27d   : > { %v2445_v4 = vpop.f32.mrb[51].mxu0  ;;  %v2381_v9 = vadd.f32 %v2380_v3, %v2379_v0  ;;  %v2881_v61 = vpack.c.bf16 %v1623_v57, %v1622_v51 }
 0x27e   : > { %v1314_v8 = vmax.f32 %v1268_v62, 0.0  ;;  %v2446_v10 = vadd.f32 %v2445_v4, %v2444_v1 }
 0x27f   : > { %v2382_v18 = vpop.f32.mrb[40].mxu1  ;;  %v1153_v39 = vadd.f32 %v2381_v9, %v4025_v19  ;;  %v1344_v55 = vld [vmem:[#allocation3 + $0x1] sm:$0xff]  ;;  %2882 = vmatpush3.bf16.msra.mxu0 %v2881_v61 }
 0x280   : > { %1326 = vst.msk [vmem:[#allocation3 + $0x18] sm:$0xff] %vm466_vm0, %v1314_v8  ;;  %v1273_v17 = vadd.f32 %v2446_v10, %v1148_v2  ;;  %v2447_v20 = vpop.f32.mrb[52].mxu0  ;;  %v2383_v21 = vpop.f32.mrb[41].mxu1 }
 0x281   : > { %v2448_v22 = vpop.f32.mrb[53].mxu0  ;;  %v2384_v23 = vadd.f32 %v2383_v21, %v2382_v18 }
 0x282   : > { %v1315_v31 = vmax.f32 %v1273_v17, 0.0  ;;  %v2449_v25 = vadd.f32 %v2448_v22, %v2447_v20  ;;  %v1640_v22 = vld [vmem:[%s4354_s5 + $0x1e0] sm:$0xff] }
 0x283   : > { %v4068_v26 = vld [vmem:[#allocation3 + $0xa] sm:$0xff]  ;;  %v2385_v47 = vpop.f32.mrb[42].mxu1  ;;  %v1158_v7 = vadd.f32 %v2384_v23, %v4025_v19 }
 0x284   : > { %1327 = vst.msk [vmem:[#allocation3 + $0x20] sm:$0xff] %vm466_vm0, %v1315_v31  ;;  %v1278_v27 = vadd.f32 %v2449_v25, %v1153_v39  ;;  %v2450_v28 = vpop.f32.mrb[54].mxu0  ;;  %v2948_v29 = vpack.i.bf16 %v1344_v55, %v4068_v26  ;;  %v2386_v63 = vpop.f32.mrb[43].mxu1  ;;  %v1345_v40 = vld [vmem:[#allocation3 + $0x9] sm:$0xff]  ;;  %v1641_v39 = vld [vmem:[%s4354_s5 + $0x1e8] sm:$0xff] }
 0x285   : > { %v2451_v30 = vpop.f32.mrb[55].mxu0  ;;  %v2387_v36 = vadd.f32 %v2386_v63, %v2385_v47  ;;  %v2883_v55 = vpack.c.bf16 %v1641_v39, %v1640_v22  ;;  %v1625_v47 = vld [vmem:[%s4354_s5 + $0x168] sm:$0xff] }
 0x286   : > { %v1316_v35 = vmax.f32 %v1278_v27, 0.0  ;;  %v2452_v37 = vadd.f32 %v2451_v30, %v2450_v28  ;;  %2949 = vrot.lane.b32.xlu0 %v2948_v29, %s3142_s9  ;;  %v1624_v27 = vld [vmem:[%s4354_s5 + $0x160] sm:$0xff] }
 0x287   : > { %v4086_v41 = vld [vmem:[#allocation3 + $0x12] sm:$0xff]  ;;  %v2388_v44 = vpop.f32.mrb[44].mxu1  ;;  %v1163_v50 = vadd.f32 %v2387_v36, %v4025_v19  ;;  %2884 = vmatprep.subr.bf16.mxu0 %v2883_v55 }
 0x288   : > { %1328 = vst.msk [vmem:[#allocation3 + $0x28] sm:$0xff] %vm466_vm0, %v1316_v35  ;;  %v1283_v43 = vadd.f32 %v2452_v37, %v1158_v7  ;;  %v2453_v33 = vpop.f32.mrb[56].mxu0  ;;  %v2953_v45 = vpack.i.bf16 %v1345_v40, %v4086_v41  ;;  %v2389_v46 = vpop.f32.mrb[45].mxu1  ;;  %v1346_v58 = vld [vmem:[#allocation3 + $0x11] sm:$0xff]  ;;  %v2885_v7 = vpack.c.bf16 %v1625_v47, %v1624_v27  ;;  %v1642_v37 = vld [vmem:[%s4354_s5 + $0x1f0] sm:$0xff] }
 0x289   : > { %v2454_v48 = vpop.f32.mrb[57].mxu0  ;;  %v2390_v53 = vadd.f32 %v2389_v46, %v2388_v44  ;;  %v2887_v44 = vpack.c.bf16 %v1643_v15, %v1642_v37 }
 0x28a   : > { %v1317_v52 = vmax.f32 %v1283_v43, 0.0  ;;  %v2455_v54 = vadd.f32 %v2454_v48, %v2453_v33  ;;  %2954 = vrot.lane.b32.xlu0 %v2953_v45, %s3142_s9  ;;  %2886 = vmatpush3.bf16.msra.mxu0 %v2885_v7  ;;  %v1627_v33 = vld [vmem:[%s4354_s5 + $0x178] sm:$0xff] }
 0x28b   : > { %v4104_v59 = vld [vmem:[#allocation3 + $0x1a] sm:$0xff]  ;;  %v2391_v0 = vpop.f32.mrb[46].mxu1  ;;  %v1168_v5 = vadd.f32 %v2390_v53, %v4025_v19  ;;  %v2889_v48 = vpack.c.bf16 %v1627_v33, %v1626_v38  ;;  %2888 = vmatprep.subr.bf16.mxu0 %v2887_v44 }
 0x28c   : > { %1329 = vst.msk [vmem:[#allocation3 + $0x30] sm:$0xff] %vm466_vm0, %v1317_v52  ;;  %v1288_v62 = vadd.f32 %v2455_v54, %v1163_v50  ;;  %v2456_v1 = vpop.f32.mrb[58].mxu0  ;;  %v2958_v2 = vpack.i.bf16 %v1346_v58, %v4104_v59  ;;  %v2392_v3 = vpop.f32.mrb[47].mxu1  ;;  %v1347_v10 = vld [vmem:[#allocation3 + $0x19] sm:$0xff] }
 0x28d   : > { %v2457_v4 = vpop.f32.mrb[59].mxu0  ;;  %v2393_v8 = vadd.f32 %v2392_v3, %v2391_v0  ;;  %v1372_v3 = vld [vmem:[#allocation3 + $0xc] sm:$0xff] }
 0x28e   : > { %v1318_v6 = vmax.f32 %v1288_v62, 0.0  ;;  %v2458_v9 = vadd.f32 %v2457_v4, %v2456_v1  ;;  %2959 = vrot.lane.b32.xlu1 %v2958_v2, %s3142_s9  ;;  %2890 = vmatpush3.bf16.msra.mxu0 %v2889_v48  ;;  %v1647_v48 = vld [vmem:[%s4354_s5 + $0x218] sm:$0xff] }
 0x28f   : > { %v4110_v12 = vld [vmem:[#allocation3 + $0x22] sm:$0xff]  ;;  %v2394_v14 = vpop.f32.mrb[48].mxu1  ;;  %v1173_v18 = vadd.f32 %v2393_v8, %v4025_v19 }
 0x290   : > { %1330 = vst.msk [vmem:[#allocation3 + $0x38] sm:$0xff] %vm466_vm0, %v1318_v6  ;;  %v1293_v13 = vadd.f32 %v2458_v9, %v1168_v5  ;;  %v2459_v16 = vpop.f32.mrb[60].mxu0  ;;  %v2963_v17 = vpack.i.bf16 %v1347_v10, %v4110_v12  ;;  %v2395_v20 = vpop.f32.mrb[49].mxu1  ;;  %v1348_v28 = vld [vmem:[#allocation3 + $0x21] sm:$0xff]  ;;  %v1382_v5 = vld [vmem:[#allocation3 + $0x15] sm:$0xff] }
 0x291   : > { %v2460_v21 = vpop.f32.mrb[61].mxu0  ;;  %v2396_v23 = vadd.f32 %v2395_v20, %v2394_v14  ;;  %v1384_v9 = vld [vmem:[#allocation3 + $0x25] sm:$0xff]  ;;  %v1383_v10 = vld [vmem:[#allocation3 + $0x1d] sm:$0xff]  ;;  %v4166_v14 = vld [vmem:[#allocation3 + $0x14] sm:$0xff] }
 0x292   : > { %v1319_v31 = vmax.f32 %v1293_v13, 0.0  ;;  %v2461_v25 = vadd.f32 %v2460_v21, %v2459_v16  ;;  %2964 = vrot.lane.b32.xlu1 %v2963_v17, %s3142_s9  ;;  %v4164_v13 = vld [vmem:[#allocation3 + $0x1c] sm:$0xff]  ;;  %v2998_v17 = vpack.i.bf16 %v4166_v14, %v1383_v10  ;;  %v4174_v22 = vld [vmem:[#allocation3 + $0x24] sm:$0xff] }
 0x293   : > { %v4128_v29 = vld [vmem:[#allocation3 + $0x2a] sm:$0xff]  ;;  %v2397_v30 = vpop.f32.mrb[50].mxu1  ;;  %v1178_v34 = vadd.f32 %v2396_v23, %v4025_v19  ;;  %v3003_v16 = vpack.i.bf16 %v4164_v13, %v1384_v9  ;;  %v1338_v10 = vld [vmem:[#allocation3 + $0x18] sm:$0xff] }
 0x294   : > { %1331 = vst.msk [vmem:[#allocation3 + $0x40] sm:$0xff] %vm466_vm0, %v1319_v31  ;;  %v1298_v63 = vadd.f32 %v2461_v25, %v1173_v18  ;;  %v2462_v32 = vpop.f32.mrb[62].mxu0  ;;  %v2968_v24 = vpack.i.bf16 %v1348_v28, %v4128_v29  ;;  %v2398_v35 = vpop.f32.mrb[51].mxu1  ;;  %v1349_v45 = vld [vmem:[#allocation3 + $0x29] sm:$0xff] }
 0x295   : > { %v2463_v36 = vpop.f32.mrb[63].mxu0  ;;  %v2399_v42 = vadd.f32 %v2398_v35, %v2397_v30  ;;  %v1385_v20 = vld [vmem:[#allocation3 + $0x2d] sm:$0xff] }
 0x296   : > { %v1320_v40 = vmax.f32 %v1298_v63, 0.0  ;;  %v2464_v43 = vadd.f32 %v2463_v36, %v2462_v32  ;;  %2969 = vrot.lane.b32.xlu0 %v2968_v24, %s3142_s9  ;;  %v4172_v21 = vld [vmem:[#allocation3 + $0x2c] sm:$0xff]  ;;  %v3008_v31 = vpack.i.bf16 %v4174_v22, %v1385_v20  ;;  %v1645_v36 = vld [vmem:[%s4354_s5 + $0x208] sm:$0xff] }
 0x297   : > { %v4146_v46 = vld [vmem:[#allocation3 + $0x32] sm:$0xff]  ;;  %v1183_v54 = vadd.f32 %v2399_v42, %v4025_v19  ;;  %v1335_v42 = vld [vmem:[#allocation3] sm:$0xff] }
 0x298   : > { %1332 = vst.msk [vmem:[#allocation3 + $0x48] sm:$0xff] %vm466_vm0, %v1320_v40  ;;  %v1303_v49 = vadd.f32 %v2464_v43, %v1178_v34  ;;  %v2465_v50 = vpop.f32.mrb[64].mxu0  ;;  %v2973_v52 = vpack.i.bf16 %v1349_v45, %v4146_v46  ;;  %v1350_v57 = vld [vmem:[#allocation3 + $0x31] sm:$0xff]  ;;  %v1353_v40 = vld [vmem:[#allocation3 + $0x2] sm:$0xff] }
 0x299   : > { %v2466_v53 = vpop.f32.mrb[65].mxu0  ;;  %v1386_v18 = vld [vmem:[#allocation3 + $0x35] sm:$0xff]  ;;  %v1646_v45 = vld [vmem:[%s4354_s5 + $0x210] sm:$0xff] }
 0x29a   : > { %v1321_v56 = vmax.f32 %v1303_v49, 0.0  ;;  %v2467_v51 = vadd.f32 %v2466_v53, %v2465_v50  ;;  %2974 = vrot.lane.b32.xlu1 %v2973_v52, %s3142_s9  ;;  %v3013_v39 = vpack.i.bf16 %v4172_v21, %v1386_v18  ;;  %v4182_v27 = vld [vmem:[#allocation3 + $0x34] sm:$0xff]  ;;  %v1336_v53 = vld [vmem:[#allocation3 + $0x8] sm:$0xff] }
 0x29b   : > { %v4152_v58 = vld [vmem:[#allocation3 + $0x3a] sm:$0xff]  ;;  %v1644_v35 = vld [vmem:[%s4354_s5 + $0x200] sm:$0xff] }
 0x29c   : > { %1333 = vst.msk [vmem:[#allocation3 + $0x50] sm:$0xff] %vm466_vm0, %v1321_v56  ;;  %v1308_v60 = vadd.f32 %v2467_v51, %v1183_v54  ;;  %v2978_v61 = vpack.i.bf16 %v1350_v57, %v4152_v58  ;;  %v1351_v0 = vld [vmem:[#allocation3 + $0x39] sm:$0xff]  ;;  %v2892_v43 = vpack.c.bf16 %v1645_v36, %v1644_v35  ;;  %v2895_v54 = vpack.c.bf16 %v1647_v48, %v1646_v45  ;;  %v1648_v57 = vld [vmem:[%s4354_s5 + $0x220] sm:$0xff] }
 0x29d   : > { %v1387_v25 = vld [vmem:[#allocation3 + $0x3d] sm:$0xff]  ;;  %v1341_v36 = vld [vmem:[#allocation3 + $0x30] sm:$0xff] }
 0x29e   : > { %v1322_v62 = vmax.f32 %v1308_v60, 0.0  ;;  %2979 = vrot.lane.b32.xlu0 %v2978_v61, %s3142_s9  ;;  %v4180_v55 = vld [vmem:[#allocation3 + $0x3c] sm:$0xff]  ;;  %v3018_v28 = vpack.i.bf16 %v4182_v27, %v1387_v25 }
 0x29f   : > { %v4157_v1 = vld [vmem:[#allocation3 + $0x42] sm:$0xff]  ;;  %v1649_v60 = vld [vmem:[%s4354_s5 + $0x228] sm:$0xff] }
 0x2a0   : > { %1334 = vst.msk [vmem:[#allocation3 + $0x58] sm:$0xff] %vm466_vm0, %v1322_v62  ;;  %v2983_v19 = vpack.i.bf16 %v1351_v0, %v4157_v1  ;;  %v1352_v2 = vld [vmem:[#allocation3 + $0x41] sm:$0xff] }
 0x2a1   : > { %v2988_v6 = vpack.i.bf16 %v1352_v2, %v1372_v3  ;;  %v1388_v23 = vld [vmem:[#allocation3 + $0x45] sm:$0xff] }
 0x2a2   : > { %2984 = vrot.lane.b32.xlu1 %v2983_v19, %s3142_s9  ;;  %v3023_v47 = vpack.i.bf16 %v4180_v55, %v1388_v23  ;;  %v4190_v32 = vld [vmem:[#allocation3 + $0x44] sm:$0xff]  ;;  %v1337_v19 = vld [vmem:[#allocation3 + $0x10] sm:$0xff] }
 0x2a3   : > { %v1362_v4 = vld [vmem:[#allocation3 + $0x4a] sm:$0xff] }
 0x2a4   : > { %v2993_v8 = vpack.i.bf16 %v1362_v4, %v1382_v5  ;;  %v1389_v63 = vld [vmem:[#allocation3 + $0x4d] sm:$0xff]  ;;  %v1650_v4 = vld [vmem:[%s4354_s5 + $0x230] sm:$0xff] }
 0x2a5   : > { %v4188_v30 = vld [vmem:[#allocation3 + $0x4c] sm:$0xff]  ;;  %v3028_v34 = vpack.i.bf16 %v4190_v32, %v1389_v63 }
 0x2a6   : > { %2989 = vrot.lane.b32.xlu1 %v2988_v6, %s3142_s9  ;;  %2994 = vrot.lane.b32.xlu0 %v2993_v8, %s3142_s9  ;;  %v1651_v5 = vld [vmem:[%s4354_s5 + $0x238] sm:$0xff] }
 0x2a7   : > { %v1390_v7 = vld [vmem:[#allocation3 + $0x55] sm:$0xff] }
 0x2a8   : > { %v3033_v24 = vpack.i.bf16 %v4188_v30, %v1390_v7  ;;  %v1340_v7 = vld [vmem:[#allocation3 + $0x28] sm:$0xff] }
 0x2aa   : > { %3004 = vrot.lane.b32.xlu1 %v3003_v16, %s3142_s9  ;;  %2999 = vrot.lane.b32.xlu0 %v2998_v17, %s3142_s9 }
 0x2ae   : > { %3014 = vrot.lane.b32.xlu1 %v3013_v39, %s3142_s9  ;;  %3009 = vrot.lane.b32.xlu0 %v3008_v31, %s3142_s9  ;;  %v1339_v31 = vld [vmem:[#allocation3 + $0x20] sm:$0xff] }
 0x2b2   : > { %3024 = vrot.lane.b32.xlu1 %v3023_v47, %s3142_s9  ;;  %3019 = vrot.lane.b32.xlu0 %v3018_v28, %s3142_s9 }
 0x2b6   : > { %3034 = vrot.lane.b32.xlu1 %v3033_v24, %s3142_s9  ;;  %3029 = vrot.lane.b32.xlu0 %v3028_v34, %s3142_s9 }
 0x2f8   : > { %v2950_v37 = vpop.permute.xlu0 %2949 }
 0x2f9   : > { %v2952_v15 = vunpack.i.h.bf16 %v2950_v37  ;;  %v2951_v38 = vunpack.i.l.bf16 %v2950_v37 }
 0x2fb   : > { %v1553_v44 = vsel %vm466_vm0, %v1353_v40, %v2951_v38  ;;  %v1544_v33 = vsel %vm466_vm0, %v1335_v42, %v2952_v15  ;;  %v1342_v42 = vld [vmem:[#allocation3 + $0x38] sm:$0xff] }
 0x2fc   : > { %v2955_v49 = vpop.permute.xlu0 %2954  ;;  %1750 = vmatprep.mubr.f32.mxu1 %v1553_v44 }
 0x2fd   : > { %v2957_v50 = vunpack.i.h.bf16 %v2955_v49  ;;  %v2956_v52 = vunpack.i.l.bf16 %v2955_v49  ;;  %1751 = vmatmul.mubr.f32.vlgmr.msra.gmra.mrb[52].mxu1 %v1544_v33 }
 0x2fe   : > { %2893 = vmatpush3.bf16.msra.mxu1 %v2892_v43 }
 0x2ff   : > { %v1554_v56 = vsel %vm466_vm0, %v4068_v26, %v2956_v52  ;;  %v1545_v51 = vsel %vm466_vm0, %v1336_v53, %v2957_v50  ;;  %2894 = vmatprep.subr.bf16.mxu1 %v3141_v11  ;;  %v2898_v26 = vpack.c.bf16 %v1649_v60, %v1648_v57  ;;  %v1343_v50 = vld [vmem:[#allocation3 + $0x40] sm:$0xff]  ;;  %v1363_v52 = vld [vmem:[#allocation3 + $0xb] sm:$0xff] }
 0x300   : > { %v2960_v61 = vpop.permute.xlu1 %2959  ;;  %1755 = vmatprep.mubr.f32.mxu1 %v1554_v56 }
 0x301   : > { %v2962_v62 = vunpack.i.h.bf16 %v2960_v61  ;;  %v2961_v0 = vunpack.i.l.bf16 %v2960_v61  ;;  %1756 = vmatmul.mubr.f32.gmra.mrb[54].mxu1 %v1545_v51 }
 0x302   : > { %2896 = vmatpush3.bf16.msra.mxu1 %v2895_v54 }
 0x303   : > { %v1555_v2 = vsel %vm466_vm0, %v4086_v41, %v2961_v0  ;;  %v1546_v3 = vsel %vm466_vm0, %v1337_v19, %v2962_v62  ;;  %2897 = vmatprep.subr.bf16.mxu1 %v3141_v11  ;;  %v2901_v41 = vpack.c.bf16 %v1651_v5, %v1650_v4  ;;  %v3144_v0 = vmov 0.0  }
 0x304   : > { %v2965_v6 = vpop.permute.xlu1 %2964  ;;  %1760 = vmatprep.mubr.f32.mxu1 %v1555_v2 }
 0x305   : > { %v2967_v8 = vunpack.i.h.bf16 %v2965_v6  ;;  %v2966_v9 = vunpack.i.l.bf16 %v2965_v6  ;;  %1761 = vmatmul.mubr.f32.gmra.mrb[56].mxu1 %v1546_v3  ;;  %v1391_v3 = vld [vmem:[#allocation3 + $0x16] sm:$0xff] }
 0x306   : > { %2899 = vmatpush3.bf16.msra.mxu1 %v2898_v26 }
 0x307   : > { %v1556_v16 = vsel %vm466_vm0, %v4104_v59, %v2966_v9  ;;  %v1547_v17 = vsel %vm466_vm0, %v1338_v10, %v2967_v8  ;;  %2900 = vmatprep.subr.bf16.mxu1 %v3141_v11  ;;  %v1365_v8 = vld [vmem:[#allocation3 + $0x1b] sm:$0xff] }
 0x308   : > { %v2970_v18 = vpop.permute.xlu0 %2969  ;;  %1765 = vmatprep.mubr.f32.mxu1 %v1556_v16  ;;  %v1392_v10 = vld [vmem:[#allocation3 + $0x1e] sm:$0xff] }
 0x309   : > { %v2972_v20 = vunpack.i.h.bf16 %v2970_v18  ;;  %v2971_v39 = vunpack.i.l.bf16 %v2970_v18  ;;  %1766 = vmatmul.mubr.f32.gmra.mrb[58].mxu1 %v1547_v17 }
 0x30a   : > { %2902 = vmatpush3.bf16.msra.mxu1 %v2901_v41 }
 0x30b   : > { %v1557_v23 = vsel %vm466_vm0, %v4110_v12, %v2971_v39  ;;  %v1548_v25 = vsel %vm466_vm0, %v1339_v31, %v2972_v20  ;;  %v1393_v39 = vld [vmem:[#allocation3 + $0x26] sm:$0xff] }
 0x30c   : > { %v2975_v47 = vpop.permute.xlu1 %2974  ;;  %1770 = vmatprep.mubr.f32.mxu1 %v1557_v23 }
 0x30d   : > { %v2977_v28 = vunpack.i.h.bf16 %v2975_v47  ;;  %v2976_v59 = vunpack.i.l.bf16 %v2975_v47  ;;  %1771 = vmatmul.mubr.f32.gmra.mrb[60].mxu1 %v1548_v25 }
 0x30f   : > { %v1558_v11 = vsel %vm466_vm0, %v4128_v29, %v2976_v59  ;;  %v1549_v63 = vsel %vm466_vm0, %v1340_v7, %v2977_v28  ;;  %v1394_v59 = vld [vmem:[#allocation3 + $0x2e] sm:$0xff] }
 0x310   : > { %v2980_v24 = vpop.permute.xlu0 %2979  ;;  %1775 = vmatprep.mubr.f32.mxu1 %v1558_v11 }
 0x311   : > { %v2982_v34 = vunpack.i.h.bf16 %v2980_v24  ;;  %v2981_v35 = vunpack.i.l.bf16 %v2980_v24  ;;  %1776 = vmatmul.mubr.f32.gmra.mrb[62].mxu1 %v1549_v63 }
 0x313   : > { %v1559_v12 = vsel %vm466_vm0, %v4146_v46, %v2981_v35  ;;  %v1550_v37 = vsel %vm466_vm0, %v1341_v36, %v2982_v34  ;;  %v1395_v35 = vld [vmem:[#allocation3 + $0x36] sm:$0xff] }
 0x314   : > { %v2985_v15 = vpop.permute.xlu1 %2984  ;;  %1780 = vmatprep.mubr.f32.mxu1 %v1559_v12 }
 0x315   : > { %v2987_v38 = vunpack.i.h.bf16 %v2985_v15  ;;  %v2986_v40 = vunpack.i.l.bf16 %v2985_v15  ;;  %1781 = vmatmul.mubr.f32.gmra.mrb[64].mxu1 %v1550_v37 }
 0x317   : > { %v1560_v29 = vsel %vm466_vm0, %v4152_v58, %v2986_v40  ;;  %v1551_v43 = vsel %vm466_vm0, %v1342_v42, %v2987_v38  ;;  %v1396_v40 = vld [vmem:[#allocation3 + $0x3e] sm:$0xff] }
 0x318   : > { %v2990_v44 = vpop.permute.xlu1 %2989  ;;  %v2995_v33 = vpop.permute.xlu0 %2994  ;;  %1785 = vmatprep.mubr.f32.mxu1 %v1560_v29 }
 0x319   : > { %v2992_v45 = vunpack.i.h.bf16 %v2990_v44  ;;  %v2991_v48 = vunpack.i.l.bf16 %v2990_v44  ;;  %v2997_v49 = vunpack.i.h.bf16 %v2995_v33  ;;  %v2996_v46 = vunpack.i.l.bf16 %v2995_v33  ;;  %1786 = vmatmul.mubr.f32.gmra.mrb[66].mxu1 %v1551_v43  ;;  %v1397_v33 = vld [vmem:[#allocation3 + $0x46] sm:$0xff] }
 0x31b   : > { %v1561_v53 = vsel %vm466_vm0, %v4157_v1, %v2997_v49  ;;  %v1571_v54 = vsel %vm466_vm0, %v4166_v14, %v2996_v46  ;;  %v1552_v58 = vsel %vm466_vm0, %v1343_v50, %v2992_v45  ;;  %v1562_v56 = vsel %vm466_vm0, %v1363_v52, %v2991_v48  ;;  %v1364_v1 = vld [vmem:[#allocation3 + $0x13] sm:$0xff] }
 0x31c   : > { %v3005_v51 = vpop.permute.xlu1 %3004  ;;  %v3000_v57 = vpop.permute.xlu0 %2999  ;;  %1790 = vmatprep.mubr.f32.mxu1 %v1561_v53  ;;  %1860 = vmatprep.mubr.f32.mxu0 %v1571_v54  ;;  %v1381_v45 = vld [vmem:[#allocation3 + $0x54] sm:$0xff] }
 0x31d   : > { %v3006_v60 = vunpack.i.l.bf16 %v3005_v51  ;;  %v3002_v61 = vunpack.i.h.bf16 %v3000_v57  ;;  %v3001_v62 = vunpack.i.l.bf16 %v3000_v57  ;;  %1791 = vmatmul.mubr.f32.gmra.mrb[68].mxu1 %v1552_v58  ;;  %1861 = vmatmul.mubr.f32.vlgmr.msra.gmra.mrb[66].mxu0 %v1562_v56  ;;  %v3007_v26 = vunpack.i.h.bf16 %v3005_v51  ;;  %v1398_v46 = vld [vmem:[#allocation3 + $0x4e] sm:$0xff]  ;;  %v1399_v50 = vld [vmem:[#allocation3 + $0x56] sm:$0xff] }
 0x31e   : > { %2656 = vmatprep.mubr.msk.f32.mxu1 %vm3143_vm1, %v3144_v0 }
 0x31f   : > { %v1572_v14 = vsel %vm466_vm0, %v4164_v13, %v3001_v62  ;;  %v1563_v19 = vsel %vm466_vm0, %v1364_v1, %v3002_v61  ;;  %v1573_v5 = vsel %vm466_vm0, %v4174_v22, %v3006_v60  ;;  %v1564_v9 = vsel %vm466_vm0, %v1365_v8, %v3007_v26  ;;  %v1366_v22 = vld [vmem:[#allocation3 + $0x23] sm:$0xff] }
 0x320   : > { %v3010_v2 = vpop.permute.xlu0 %3009  ;;  %1865 = vmatprep.mubr.f32.mxu0 %v1572_v14  ;;  %v3015_v6 = vpop.permute.xlu1 %3014 }
 0x321   : > { %v3011_v4 = vunpack.i.l.bf16 %v3010_v2  ;;  %1866 = vmatmul.mubr.f32.gmra.mrb[68].mxu0 %v1563_v19  ;;  %2657 = vmatmul.mubr.msk.f32.vlgmr.msra.gmra.mrb[70].mxu1 %vm466_vm0, %v1391_v3  ;;  %v3012_v13 = vunpack.i.h.bf16 %v3010_v2  ;;  %v3016_v41 = vunpack.i.l.bf16 %v3015_v6  ;;  %v3017_v18 = vunpack.i.h.bf16 %v3015_v6 }
 0x322   : > { %1870 = vmatprep.mubr.f32.mxu0 %v1573_v5  ;;  %2659 = vmatprep.mubr.msk.f32.mxu1 %vm3143_vm1, %v3144_v0 }
 0x323   : > { %v1574_v16 = vsel %vm466_vm0, %v4172_v21, %v3011_v4  ;;  %v1565_v20 = vsel %vm466_vm0, %v1366_v22, %v3012_v13  ;;  %v1575_v23 = vsel %vm466_vm0, %v4182_v27, %v3016_v41  ;;  %v1367_v21 = vld [vmem:[#allocation3 + $0x2b] sm:$0xff]  ;;  %v1368_v27 = vld [vmem:[#allocation3 + $0x33] sm:$0xff]  ;;  %v4306_v41 = vld [vmem:[#allocation8] ss:$0 sm:$0xff] }
 0x324   : > { %v3020_v17 = vpop.permute.xlu0 %3019  ;;  %v3025_v25 = vpop.permute.xlu1 %3024  ;;  %v1566_v28 = vsel %vm466_vm0, %v1367_v21, %v3017_v18 }
 0x325   : > { %1871 = vmatmul.mubr.f32.gmra.mrb[70].mxu0 %v1564_v9  ;;  %2660 = vmatmul.mubr.msk.f32.gmra.mrb[72].mxu1 %vm466_vm0, %v1392_v10  ;;  %v3021_v31 = vunpack.i.l.bf16 %v3020_v17  ;;  %v3022_v47 = vunpack.i.h.bf16 %v3020_v17  ;;  %v3026_v7 = vunpack.i.l.bf16 %v3025_v25  ;;  %v3027_v24 = vunpack.i.h.bf16 %v3025_v25 }
 0x326   : > { %1875 = vmatprep.mubr.f32.mxu0 %v1574_v16  ;;  %2662 = vmatprep.mubr.msk.f32.mxu1 %vm3143_vm1, %v3144_v0 }
 0x327   : > { %v1576_v11 = vsel %vm466_vm0, %v4180_v55, %v3021_v31  ;;  %v1567_v34 = vsel %vm466_vm0, %v1368_v27, %v3022_v47  ;;  %v1577_v12 = vsel %vm466_vm0, %v4190_v32, %v3026_v7  ;;  %v1369_v55 = vld [vmem:[#allocation3 + $0x3b] sm:$0xff]  ;;  %v1370_v32 = vld [vmem:[#allocation3 + $0x43] sm:$0xff] }
 0x328   : > { %v3030_v63 = vpop.permute.xlu0 %3029  ;;  %v3035_v37 = vpop.permute.xlu1 %3034  ;;  %v1568_v38 = vsel %vm466_vm0, %v1369_v55, %v3027_v24 }
 0x329   : > { %1876 = vmatmul.mubr.f32.gmra.mrb[72].mxu0 %v1565_v20  ;;  %2663 = vmatmul.mubr.msk.f32.gmra.mrb[74].mxu1 %vm466_vm0, %v1393_v39  ;;  %v3031_v36 = vunpack.i.l.bf16 %v3030_v63  ;;  %v3032_v15 = vunpack.i.h.bf16 %v3030_v63  ;;  %v3036_v42 = vunpack.i.l.bf16 %v3035_v37  ;;  %v3037_v43 = vunpack.i.h.bf16 %v3035_v37 }
 0x32a   : > { %1880 = vmatprep.mubr.f32.mxu0 %v1575_v23  ;;  %2665 = vmatprep.mubr.msk.f32.mxu1 %vm3143_vm1, %v3144_v0 }
 0x32b   : > { %v1578_v29 = vsel %vm466_vm0, %v4188_v30, %v3031_v36  ;;  %v1569_v44 = vsel %vm466_vm0, %v1370_v32, %v3032_v15  ;;  %v1579_v48 = vsel %vm466_vm0, %v1381_v45, %v3036_v42  ;;  %v1371_v30 = vld [vmem:[#allocation3 + $0x4b] sm:$0xff] }
 0x32c   : > { %v1570_v49 = vsel %vm466_vm0, %v1371_v30, %v3037_v43 }
 0x32d   : > { %1881 = vmatmul.mubr.f32.gmra.mrb[74].mxu0 %v1566_v28  ;;  %2666 = vmatmul.mubr.msk.f32.gmra.mrb[76].mxu1 %vm466_vm0, %v1394_v59 }
 0x32e   : > { %1885 = vmatprep.mubr.f32.mxu0 %v1576_v11  ;;  %2668 = vmatprep.mubr.msk.f32.mxu1 %vm3143_vm1, %v3144_v0 }
 0x331   : > { %1886 = vmatmul.mubr.f32.gmra.mrb[76].mxu0 %v1567_v34  ;;  %2669 = vmatmul.mubr.msk.f32.gmra.mrb[78].mxu1 %vm466_vm0, %v1395_v35 }
 0x332   : > { %1890 = vmatprep.mubr.f32.mxu0 %v1577_v12  ;;  %2671 = vmatprep.mubr.msk.f32.mxu1 %vm3143_vm1, %v3144_v0 }
 0x335   : > { %1891 = vmatmul.mubr.f32.gmra.mrb[78].mxu0 %v1568_v38  ;;  %2672 = vmatmul.mubr.msk.f32.gmra.mrb[80].mxu1 %vm466_vm0, %v1396_v40 }
 0x336   : > { %1895 = vmatprep.mubr.f32.mxu0 %v1578_v29  ;;  %2674 = vmatprep.mubr.msk.f32.mxu1 %vm3143_vm1, %v3144_v0 }
 0x339   : > { %1896 = vmatmul.mubr.f32.gmra.mrb[80].mxu0 %v1569_v44  ;;  %2675 = vmatmul.mubr.msk.f32.gmra.mrb[82].mxu1 %vm466_vm0, %v1397_v33 }
 0x33a   : > { %1900 = vmatprep.mubr.f32.mxu0 %v1579_v48  ;;  %2677 = vmatprep.mubr.msk.f32.mxu1 %vm3143_vm1, %v3144_v0 }
 0x33d   : > { %1901 = vmatmul.mubr.f32.gmra.mrb[82].mxu0 %v1570_v49  ;;  %2678 = vmatmul.mubr.msk.f32.gmra.mrb[84].mxu1 %vm466_vm0, %v1398_v46 }
 0x33e   : > { %2680 = vmatprep.mubr.msk.f32.mxu1 %vm3143_vm1, %v3144_v0 }
 0x341   : > { %2681 = vmatmul.mubr.msk.f32.gmra.mrb[86].mxu1 %vm466_vm0, %v1399_v50 }
 0x3d0   : > { %v2500_v52 = vpop.f32.mrb[52].mxu1 }
 0x3d1   : > { %v2501_v53 = vpop.f32.mrb[53].mxu1 }
 0x3d2   : > { %v2502_v54 = vadd.f32 %v2501_v53, %v2500_v52 }
 0x3d4   : > { %v2503_v58 = vpop.f32.mrb[54].mxu1  ;;  %v1753_v20 = vadd.f32 %v2502_v54, %v4306_v41 }
 0x3d5   : > { %v2504_v56 = vpop.f32.mrb[55].mxu1 }
 0x3d6   : > { %v2505_v51 = vadd.f32 %v2504_v56, %v2503_v58 }
 0x3d8   : > { %v2506_v57 = vpop.f32.mrb[56].mxu1  ;;  %v1758_v59 = vadd.f32 %v2505_v51, %v4306_v41 }
 0x3d9   : > { %v2507_v60 = vpop.f32.mrb[57].mxu1 }
 0x3da   : > { %v2508_v61 = vadd.f32 %v2507_v60, %v2506_v57 }
 0x3dc   : > { %v2509_v62 = vpop.f32.mrb[58].mxu1  ;;  %v1763_v12 = vadd.f32 %v2508_v61, %v4306_v41 }
 0x3dd   : > { %v2510_v1 = vpop.f32.mrb[59].mxu1 }
 0x3de   : > { %v2511_v14 = vadd.f32 %v2510_v1, %v2509_v62 }
 0x3e0   : > { %v2512_v19 = vpop.f32.mrb[60].mxu1  ;;  %v1768_v43 = vadd.f32 %v2511_v14, %v4306_v41 }
 0x3e1   : > { %v2513_v26 = vpop.f32.mrb[61].mxu1 }
 0x3e2   : > { %v2514_v2 = vadd.f32 %v2513_v26, %v2512_v19 }
 0x3e4   : > { %v2515_v3 = vpop.f32.mrb[62].mxu1  ;;  %v1773_v52 = vadd.f32 %v2514_v2, %v4306_v41 }
 0x3e5   : > { %v2516_v0 = vpop.f32.mrb[63].mxu1 }
 0x3e6   : > { %v2517_v4 = vadd.f32 %v2516_v0, %v2515_v3 }
 0x3e8   : > { %v2518_v5 = vpop.f32.mrb[64].mxu1  ;;  %v1778_v62 = vadd.f32 %v2517_v4, %v4306_v41 }
 0x3e9   : > { %v2519_v6 = vpop.f32.mrb[65].mxu1 }
 0x3ea   : > { %v4302_v8 = vadd.f32 %v2519_v6, %v2518_v5 }
 0x3ec   : > { %v2521_v13 = vpop.f32.mrb[66].mxu1  ;;  %v1783_v6 = vadd.f32 %v4302_v8, %v4306_v41 }
 0x3ed   : > { %v2522_v9 = vpop.f32.mrb[67].mxu1 }
 0x3ee   : > { %v4304_v10 = vadd.f32 %v2522_v9, %v2521_v13 }
 0x3f0   : > { %v2524_v16 = vpop.f32.mrb[68].mxu1  ;;  %v2559_v17 = vpop.f32.mrb[66].mxu0 }
 0x3f1   : > { %v2525_v22 = vpop.f32.mrb[69].mxu1  ;;  %v2560_v18 = vpop.f32.mrb[67].mxu0 }
 0x3f2   : > { %v4309_v39 = vadd.f32 %v2525_v22, %v2524_v16  ;;  %v2561_v31 = vadd.f32 %v2560_v18, %v2559_v17 }
 0x3f4   : > { %v2562_v23 = vpop.f32.mrb[68].mxu0  ;;  %v1863_v25 = vadd.f32 %v2561_v31, %v1753_v20  ;;  %v1972_v21 = vpop.f32.mrb[70].mxu1  ;;  %v1788_v31 = vadd.f32 %v4304_v10, %v4306_v41 }
 0x3f5   : > { %v2563_v47 = vpop.f32.mrb[69].mxu0  ;;  %v2658_v28 = vpop.f32.mrb[71].mxu1 }
 0x3f6   : > { %v1973_v7 = vadd.f32 %v1972_v21, %v1863_v25  ;;  %v2564_v11 = vadd.f32 %v2563_v47, %v2562_v23 }
 0x3f8   : > { %v2016_v63 = vmax.f32 %v1973_v7, 0.0  ;;  %v2565_v27 = vpop.f32.mrb[70].mxu0  ;;  %v1868_v24 = vadd.f32 %v2564_v11, %v1758_v59  ;;  %v1977_v34 = vpop.f32.mrb[72].mxu1  ;;  %v1793_v11 = vadd.f32 %v4309_v39, %v4306_v41 }
 0x3f9   : > { %v2566_v35 = vpop.f32.mrb[71].mxu0  ;;  %v2661_v36 = vpop.f32.mrb[73].mxu1 }
 0x3fa   : > { %2026 = vst.msk [vmem:[%s4316_s14] sm:$0xff] %vm2025_vm2, %v2016_v63  ;;  %v1978_v37 = vadd.f32 %v1977_v34, %v1868_v24  ;;  %v2567_v55 = vadd.f32 %v2566_v35, %v2565_v27 }
 0x3fc   : > { %v2017_v15 = vmax.f32 %v1978_v37, 0.0  ;;  %v2568_v38 = vpop.f32.mrb[72].mxu0  ;;  %v1873_v40 = vadd.f32 %v2567_v55, %v1763_v12  ;;  %v1982_v42 = vpop.f32.mrb[74].mxu1 }
 0x3fd   : > { %v2569_v29 = vpop.f32.mrb[73].mxu0  ;;  %v2664_v32 = vpop.f32.mrb[75].mxu1 }
 0x3fe   : > { %2027 = vst.msk [vmem:[%s4316_s14 + $0x8] sm:$0xff] %vm2025_vm2, %v2017_v15  ;;  %v1983_v44 = vadd.f32 %v1982_v42, %v1873_v40  ;;  %v2570_v33 = vadd.f32 %v2569_v29, %v2568_v38 }
 0x400   : > { %v2018_v45 = vmax.f32 %v1983_v44, 0.0  ;;  %v2571_v48 = vpop.f32.mrb[74].mxu0  ;;  %v1878_v30 = vadd.f32 %v2570_v33, %v1768_v43  ;;  %v1987_v49 = vpop.f32.mrb[76].mxu1 }
 0x401   : > { %v2572_v46 = vpop.f32.mrb[75].mxu0  ;;  %v2667_v50 = vpop.f32.mrb[77].mxu1 }
 0x402   : > { %2028 = vst.msk [vmem:[%s4316_s14 + $0x10] sm:$0xff] %vm2025_vm2, %v2018_v45  ;;  %v1988_v53 = vadd.f32 %v1987_v49, %v1878_v30  ;;  %v2573_v54 = vadd.f32 %v2572_v46, %v2571_v48 }
 0x404   : > { %v2019_v58 = vmax.f32 %v1988_v53, 0.0  ;;  %v2574_v56 = vpop.f32.mrb[76].mxu0  ;;  %v1883_v51 = vadd.f32 %v2573_v54, %v1773_v52  ;;  %v1992_v57 = vpop.f32.mrb[78].mxu1 }
 0x405   : > { %v2575_v60 = vpop.f32.mrb[77].mxu0  ;;  %v2670_v61 = vpop.f32.mrb[79].mxu1 }
 0x406   : > { %2029 = vst.msk [vmem:[%s4316_s14 + $0x18] sm:$0xff] %vm2025_vm2, %v2019_v58  ;;  %v1993_v1 = vadd.f32 %v1992_v57, %v1883_v51  ;;  %v2576_v14 = vadd.f32 %v2575_v60, %v2574_v56 }
 0x408   : > { %v2020_v19 = vmax.f32 %v1993_v1, 0.0  ;;  %v2577_v26 = vpop.f32.mrb[78].mxu0  ;;  %v1888_v2 = vadd.f32 %v2576_v14, %v1778_v62  ;;  %v1997_v3 = vpop.f32.mrb[80].mxu1 }
 0x409   : > { %v2578_v0 = vpop.f32.mrb[79].mxu0  ;;  %v2673_v5 = vpop.f32.mrb[81].mxu1 }
 0x40a   : > { %2030 = vst.msk [vmem:[%s4316_s14 + $0x20] sm:$0xff] %vm2025_vm2, %v2020_v19  ;;  %v1998_v13 = vadd.f32 %v1997_v3, %v1888_v2  ;;  %v2579_v9 = vadd.f32 %v2578_v0, %v2577_v26 }
 0x40c   : > { %v2021_v16 = vmax.f32 %v1998_v13, 0.0  ;;  %v2580_v4 = vpop.f32.mrb[80].mxu0  ;;  %v1893_v17 = vadd.f32 %v2579_v9, %v1783_v6  ;;  %v2002_v22 = vpop.f32.mrb[82].mxu1 }
 0x40d   : > { %v2581_v18 = vpop.f32.mrb[81].mxu0  ;;  %v2676_v20 = vpop.f32.mrb[83].mxu1 }
 0x40e   : > { %2031 = vst.msk [vmem:[%s4316_s14 + $0x28] sm:$0xff] %vm2025_vm2, %v2021_v16  ;;  %v2003_v23 = vadd.f32 %v2002_v22, %v1893_v17  ;;  %v2582_v25 = vadd.f32 %v2581_v18, %v2580_v4 }
 0x410   : > { %v2022_v8 = vmax.f32 %v2003_v23, 0.0  ;;  %v2583_v21 = vpop.f32.mrb[82].mxu0  ;;  %v1898_v47 = vadd.f32 %v2582_v25, %v1788_v31  ;;  %v2007_v28 = vpop.f32.mrb[84].mxu1 }
 0x411   : > { %v2584_v59 = vpop.f32.mrb[83].mxu0  ;;  %v2679_v7 = vpop.f32.mrb[85].mxu1 }
 0x412   : > { %2032 = vst.msk [vmem:[%s4316_s14 + $0x30] sm:$0xff] %vm2025_vm2, %v2022_v8  ;;  %v2008_v63 = vadd.f32 %v2007_v28, %v1898_v47  ;;  %v2585_v27 = vadd.f32 %v2584_v59, %v2583_v21 }
 0x414   : > { %v2023_v10 = vmax.f32 %v2008_v63, 0.0  ;;  %v1903_v24 = vadd.f32 %v2585_v27, %v1793_v11  ;;  %v2012_v34 = vpop.f32.mrb[86].mxu1 }
 0x415   : > { %v2682_v35 = vpop.f32.mrb[87].mxu1 }
 0x416   : > { %2033 = vst.msk [vmem:[%s4316_s14 + $0x38] sm:$0xff] %vm2025_vm2, %v2023_v10  ;;  %v2013_v36 = vadd.f32 %v2012_v34, %v1903_v24 }
 0x418   : > { %v2024_v12 = vmax.f32 %v2013_v36, 0.0 }
 0x41a   : > { %2034 = vst.msk [vmem:[%s4316_s14 + $0x40] sm:$0xff] %vm2025_vm2, %v2024_v12 }
 0x41b PF: > { %s19_s24 = sadd.s32 1, %s3136_s24  }
 0x41c   : > { %p16_p3 = scmp.ge.s32.totalorder %s19_s24, 4  }
 0x41e   :  { %18 = sbr.rel (!%p16_p3) target bundleno = 2 (0x2), region = 91 }
 0x425   :  { %2056 = vsyncpa [#allocation5], 1 }
 0x426   :  { %2058 = vsyncpa [#allocation5 + $0x1], 1 }
 0x427   :  { %2059 = vsyncpa [#allocation7], 1 }

</bundles_post_ra>
